<compile_context>
chip_gen: v7x
topology: tpu7x:2x2x1
jax: 0.10.0
libtpu: 0.0.40
codegen_flags: <defaults>
</compile_context>

<pallas_src>
import jax
import jax.numpy as jnp
from jax.experimental import pallas as pl
from jax.experimental.pallas import tpu as pltpu

EPS = 1e-5
CP = 128                      # lane-dense padded channel count


# --------------------------- spec / param helpers ---------------------------

def _batch_spec(shape):
    """One batch element per grid step (leading axis), rest full."""
    nrest = len(shape) - 1
    blk = (1,) + tuple(int(d) for d in shape[1:])
    return pl.BlockSpec(blk, lambda n, _z=(0,) * nrest: (n,) + _z)


def _const_spec(shape):
    """Whole array, same block every grid step (stays VMEM-resident)."""
    nd = len(shape)
    return pl.BlockSpec(tuple(int(d) for d in shape), lambda n, _nd=nd: (0,) * _nd)


def _compiler_params(in_block_bytes, out_block_bytes, scratch_bytes):
    # double buffers for in/out blocks + scratch, then headroom; explicit so
    # the VMEM budget is deterministic across v5e / v6e / v7x.
    need = 2 * (in_block_bytes + out_block_bytes) + scratch_bytes
    limit = int(min(64 * 2**20, max(32 * 2**20, 2 * need)))
    return pltpu.CompilerParams(dimension_semantics=("parallel",),
                                vmem_limit_bytes=limit)


def _pad_axis(a, axis, target):
    pad = target - a.shape[axis]
    if pad == 0:
        return a
    cfg = [(0, 0)] * a.ndim
    cfg[axis] = (0, pad)
    return jnp.pad(a, cfg)


def _space_to_depth(x):
    """(N, H, W, C) -> (N, H//2, W//2, 4*C); channel order (ph, pw, c)."""
    N, H, W, C = x.shape
    x = x.reshape(N, H // 2, 2, W // 2, 2, C)
    x = jnp.transpose(x, (0, 1, 3, 2, 4, 5))
    return x.reshape(N, H // 2, W // 2, 4 * C)


def _bn_affine(stats, count, gamma_p, beta_p):
    """Fold training-mode BN (biased var, eps inside sqrt) into scale/shift."""
    mean = stats[0:1] / count
    var = jnp.maximum(stats[1:2] / count - mean * mean, 0.0)
    scale = gamma_p * jax.lax.rsqrt(var + EPS)
    shift = beta_p - mean * scale
    return scale, shift                     # each (1, CP)


# ----------------------------- in-kernel helpers -----------------------------

def _conv3x3_lanecat(h, cat_ref, w_ref, acc):
    """acc += 3x3 'same' conv of h (H, W, CP) with lane-concat weights
    w_ref (3, 3*CP, CP).  cat_ref (H+2, W, 3*CP) scratch holds the three
    W-shifted copies of h concatenated along lanes; only halo rows/cols are
    zero-filled."""
    H, W, _ = h.shape
    M = H * W
    zrow = jnp.zeros((W, 3 * CP), jnp.float32)
    zcol = jnp.zeros((H, 1, CP), jnp.float32)
    cat_ref[0] = zrow                                           # top halo
    cat_ref[H + 1] = zrow                                       # bottom halo
    cat_ref[1:H + 1, :, CP:2 * CP] = h                          # kw = 1
    cat_ref[1:H + 1, 1:W, 0:CP] = h[:, 0:W - 1, :]              # kw = 0
    cat_ref[1:H + 1, 0:1, 0:CP] = zcol
    cat_ref[1:H + 1, 0:W - 1, 2 * CP:3 * CP] = h[:, 1:W, :]     # kw = 2
    cat_ref[1:H + 1, W - 1:W, 2 * CP:3 * CP] = zcol
    for kh in range(3):
        win = cat_ref[kh:kh + H].reshape(M, 3 * CP)             # aligned rows
        acc = acc + jnp.dot(win, w_ref[kh], preferred_element_type=jnp.float32)
    return acc


def _row_stats(acc):
    """(M, CP) -> (2, CP): per-channel [sum, sum of squares]."""
    return jnp.concatenate(
        [jnp.sum(acc, axis=0, keepdims=True),
         jnp.sum(acc * acc, axis=0, keepdims=True)], axis=0)


# --------------------------------- kernels ----------------------------------

def _stats_kernel(x_ref, st_ref):
    xv = x_ref[0].reshape(-1, CP)
    st_ref[0] = _row_stats(xv)


def _make_kernel_a(Hin, Win, Ho, Wo, stride, equal_in_out):
    """bn1+relu -> conv1 (3x3, stride 1 or 2) -> BN2 partial stats (+ 1x1
    shortcut conv when Cin != Cout).  One batch element per grid step."""
    M2 = Ho * Wo

    def kernel(x_ref, s1_ref, t1_ref, w1_ref, *rest):
        if equal_in_out:
            c1_ref, st_ref = rest[0], rest[1]
            scratch = rest[2:]
            ws_ref = res_ref = None
        else:
            ws_ref, c1_ref, st_ref, res_ref = rest[0], rest[1], rest[2], rest[3]
            scratch = rest[4:]

        xin = x_ref[0]                                           # (Hin, Win, C1)
        # bn1 + relu with the precomputed per-channel affine (single pass)
        h = jnp.maximum(xin * s1_ref[...] + t1_ref[...], 0.0)

        # 1x1 (possibly strided) shortcut conv on h; lanes 0:CP hold the (0,0)
        # space-to-depth phase, i.e. h[s*i, s*j], when stride == 2.
        if not equal_in_out:
            res = jnp.dot(h[..., 0:CP].reshape(M2, CP), ws_ref[...],
                          preferred_element_type=jnp.float32)
            res_ref[0] = res.reshape(Ho, Wo, CP)

        acc = jnp.zeros((M2, CP), jnp.float32)
        if stride == 1:
            acc = _conv3x3_lanecat(h, scratch[0], w1_ref, acc)
        else:
            # stride-2 3x3 conv over the space-to-depth input: only the 9
            # non-zero (tap, phase) combinations are contracted, as three
            # K=3*CP matmuls over per-vertical-phase lane-concat slabs.
            bufs = (scratch[0], scratch[1])                      # (Ho+1, Wo, 3*CP)
            zrow = jnp.zeros((Wo, 3 * CP), jnp.float32)
            zcol = jnp.zeros((Ho, 1, CP), jnp.float32)
            for ph in range(2):
                sa = h[..., (2 * ph + 1) * CP:(2 * ph + 2) * CP]  # phase (ph, 1)
                sb = h[..., (2 * ph) * CP:(2 * ph + 1) * CP]      # phase (ph, 0)
                b = bufs[ph]
                b[0] = zrow                                       # top halo
                b[1:Ho + 1, 1:Wo, 0:CP] = sa[:, 0:Wo - 1, :]      # kw = 0
                b[1:Ho + 1, 0:1, 0:CP] = zcol
                b[1:Ho + 1, :, CP:2 * CP] = sb                    # kw = 1
                b[1:Ho + 1, :, 2 * CP:3 * CP] = sa                # kw = 2
            # kh -> (row offset in buffer, vertical phase)
            for kh, (a, ph) in enumerate(((0, 1), (1, 0), (1, 1))):
                win = bufs[ph][a:a + Ho].reshape(M2, 3 * CP)
                acc = acc + jnp.dot(win, w1_ref[kh],
                                    preferred_element_type=jnp.float32)

        c1_ref[0] = acc.reshape(Ho, Wo, CP)
        st_ref[0] = _row_stats(acc)                               # BN2 partials

    return kernel


def _make_kernel_b(Ho, Wo):
    """bn2+relu -> conv2 (3x3) + residual; emits stats for the next block."""
    M2 = Ho * Wo

    def kernel(c1_ref, s2_ref, t2_ref, w2_ref, r_ref, y_ref, st_ref, cat_ref):
        o = jnp.maximum(c1_ref[0] * s2_ref[...] + t2_ref[...], 0.0)
        # TODO(synk): F.dropout for dropRate > 0 (training) not implemented;
        # module default dropRate = 0.
        acc = _conv3x3_lanecat(o, cat_ref, w2_ref, r_ref[0].reshape(M2, CP))
        y_ref[0] = acc.reshape(Ho, Wo, CP)
        st_ref[0] = _row_stats(acc)                               # next BN1 partials

    return kernel


# ------------------------------ pallas wrappers ------------------------------

def _channel_stats(x):
    """Per-channel (sum, sumsq) over (N, H, W, CP); batch-parallel partials."""
    N, H, W, C = x.shape
    st = pl.pallas_call(
        _stats_kernel,
        out_shape=jax.ShapeDtypeStruct((N, 2, CP), jnp.float32),
        grid=(N,),
        in_specs=[_batch_spec(x.shape)],
        out_specs=_batch_spec((N, 2, CP)),
        compiler_params=_compiler_params(4 * H * W * C, 4 * 2 * CP, 0),
        cost_estimate=pl.CostEstimate(flops=3 * N * H * W * C, transcendentals=0,
                                      bytes_accessed=4 * (x.size + N * 2 * CP)),
    )(x)
    return jnp.sum(st, axis=0)                                   # (2, CP)


def _run_stage_a(xin, scale1, shift1, wcat1, ws, stride, equal_in_out, Ho, Wo):
    N, Hin, Win, C1 = xin.shape
    kern = _make_kernel_a(Hin, Win, Ho, Wo, stride, equal_in_out)

    inputs = [xin, scale1, shift1, wcat1]
    in_specs = [_batch_spec(xin.shape), _const_spec(scale1.shape),
                _const_spec(shift1.shape), _const_spec(wcat1.shape)]
    if not equal_in_out:
        inputs.append(ws)
        in_specs.append(_const_spec(ws.shape))

    out_shape = [jax.ShapeDtypeStruct((N, Ho, Wo, CP), jnp.float32),
                 jax.ShapeDtypeStruct((N, 2, CP), jnp.float32)]
    out_specs = [_batch_spec((N, Ho, Wo, CP)), _batch_spec((N, 2, CP))]
    if not equal_in_out:
        out_shape.append(jax.ShapeDtypeStruct((N, Ho, Wo, CP), jnp.float32))
        out_specs.append(_batch_spec((N, Ho, Wo, CP)))

    if stride == 1:
        scratch = [pltpu.VMEM((Hin + 2, Win, 3 * CP), jnp.float32)]
        scratch_bytes = 4 * (Hin + 2) * Win * 3 * CP
    else:
        scratch = [pltpu.VMEM((Ho + 1, Wo, 3 * CP), jnp.float32),
                   pltpu.VMEM((Ho + 1, Wo, 3 * CP), jnp.float32)]
        scratch_bytes = 8 * (Ho + 1) * Wo * 3 * CP

    in_bytes = 4 * (Hin * Win * C1 + int(scale1.size) + int(shift1.size)
                    + int(wcat1.size) + (int(ws.size) if ws is not None else 0))
    out_bytes = 4 * (Ho * Wo * CP + 2 * CP
                     + (Ho * Wo * CP if not equal_in_out else 0))
    flops = 2 * N * Ho * Wo * CP * CP * (9 + (0 if equal_in_out else 1))
    ce = pl.CostEstimate(flops=int(flops), transcendentals=0,
                         bytes_accessed=int(4 * (xin.size + wcat1.size
                                                 + 2 * N * Ho * Wo * CP)))

    return pl.pallas_call(
        kern,
        out_shape=tuple(out_shape),
        grid=(N,),
        in_specs=in_specs,
        out_specs=tuple(out_specs),
        scratch_shapes=scratch,
        compiler_params=_compiler_params(in_bytes, out_bytes, scratch_bytes),
        cost_estimate=ce,
    )(*inputs)


def _run_stage_b(c1, scale2, shift2, wcat2, resid, Ho, Wo):
    N = c1.shape[0]
    kern = _make_kernel_b(Ho, Wo)
    in_bytes = 4 * (2 * Ho * Wo * CP + int(scale2.size) + int(shift2.size)
                    + int(wcat2.size))
    out_bytes = 4 * (Ho * Wo * CP + 2 * CP)
    scratch_bytes = 4 * (Ho + 2) * Wo * 3 * CP
    ce = pl.CostEstimate(flops=int(2 * N * Ho * Wo * CP * CP * 9),
                         transcendentals=0,
                         bytes_accessed=int(4 * (c1.size + resid.size
                                                 + wcat2.size + N * Ho * Wo * CP)))
    return pl.pallas_call(
        kern,
        out_shape=(jax.ShapeDtypeStruct((N, Ho, Wo, CP), jnp.float32),
                   jax.ShapeDtypeStruct((N, 2, CP), jnp.float32)),
        grid=(N,),
        in_specs=[_batch_spec(c1.shape), _const_spec(scale2.shape),
                  _const_spec(shift2.shape), _const_spec(wcat2.shape),
                  _batch_spec(resid.shape)],
        out_specs=(_batch_spec((N, Ho, Wo, CP)), _batch_spec((N, 2, CP))),
        scratch_shapes=[pltpu.VMEM((Ho + 2, Wo, 3 * CP), jnp.float32)],
        compiler_params=_compiler_params(in_bytes, out_bytes, scratch_bytes),
        cost_estimate=ce,
    )(c1, scale2, shift2, wcat2, resid)


def _basic_block(x, stats_x, p, stride):
    """x: (N, H, W, CP) channel-padded NHWC (padded lanes zero).
       stats_x: (2, CP) per-channel [sum, sumsq] of x over N*H*W rows."""
    N, H, W, _ = x.shape
    cin, cout = p["w1"].shape[2], p["w1"].shape[3]
    assert cin <= CP and cout <= CP, "channel counts > 128 unsupported"
    equal_in_out = (cin == cout)
    assert stride in (1, 2), "only stride 1 / 2 supported (WRN uses these)"
    if equal_in_out:
        assert stride == 1, "identity shortcut with stride > 1 unsupported"
    if stride == 2:
        assert H % 2 == 0 and W % 2 == 0
    Ho, Wo = H // stride, W // stride

    # ---- BN1 per-channel affine (training-mode, biased var) ----
    g1 = _pad_axis(p["gamma1"].reshape(1, cin).astype(jnp.float32), 1, CP)
    b1 = _pad_axis(p["beta1"].reshape(1, cin).astype(jnp.float32), 1, CP)
    scale1, shift1 = _bn_affine(stats_x, float(N * H * W), g1, b1)

    # ---- lane-concat conv weights: w[kh] rows [kw*CP:(kw+1)*CP] = w[kh,kw] ----
    w1p = _pad_axis(_pad_axis(p["w1"].astype(jnp.float32), 2, CP), 3, CP)
    wcat1 = w1p.reshape(3, 3 * CP, CP)
    w2p = _pad_axis(_pad_axis(p["w2"].astype(jnp.float32), 2, CP), 3, CP)
    wcat2 = w2p.reshape(3, 3 * CP, CP)

    if stride == 2:
        xin = _space_to_depth(x)                      # (N, Ho, Wo, 4*CP)
        scale1k = jnp.tile(scale1, (1, 4))
        shift1k = jnp.tile(shift1, (1, 4))
    else:
        xin, scale1k, shift1k = x, scale1, shift1

    ws = None
    if not equal_in_out:
        ws = _pad_axis(_pad_axis(p["ws"].astype(jnp.float32), 0, CP), 1, CP)

    a_out = _run_stage_a(xin, scale1k, shift1k, wcat1, ws,
                         stride, equal_in_out, Ho, Wo)
    if equal_in_out:
        c1, st1 = a_out
        resid = x                                     # identity shortcut
    else:
        c1, st1, resid = a_out

    # ---- BN2 per-channel affine from kernel A partial stats ----
    g2 = _pad_axis(p["gamma2"].reshape(1, cout).astype(jnp.float32), 1, CP)
    b2 = _pad_axis(p["beta2"].reshape(1, cout).astype(jnp.float32), 1, CP)
    scale2, shift2 = _bn_affine(jnp.sum(st1, axis=0), float(N * Ho * Wo), g2, b2)

    y, ysts = _run_stage_b(c1, scale2, shift2, wcat2, resid, Ho, Wo)
    return y, jnp.sum(ysts, axis=0)


def network_block_forward(x_nchw, params, stride):
    """NetworkBlock forward: NCHW in, NCHW out (matches the PyTorch module)."""
    x = jnp.transpose(x_nchw, (0, 2, 3, 1)).astype(jnp.float32)   # NCHW -> NHWC
    x = _pad_axis(x, 3, CP)                                       # lane-dense channels
    stats = _channel_stats(x)                                     # only needed for block 0
    cout = params[-1]["w1"].shape[3]
    for i, p in enumerate(params):
        s = stride if i == 0 else 1
        x, stats = _basic_block(x, stats, p, s)                   # stats chained forward
    y = x[..., :cout]                                             # drop channel pad
    return jnp.transpose(y, (0, 3, 1, 2))                         # NHWC -> NCHW


network_block_forward_jit = jax.jit(network_block_forward, static_argnums=2)


# --------------------------------- parameters --------------------------------

def init_params(key, nb_layers, in_planes, out_planes):
    params = []
    std = (2.0 / (9 * out_planes)) ** 0.5                         # WRN-style init
    for i in range(nb_layers):
        cin = in_planes if i == 0 else out_planes
        key, k1, k2, ks = jax.random.split(key, 4)
        p = {
            "gamma1": jnp.ones((cin,), jnp.float32),              # torch BN defaults
            "beta1": jnp.zeros((cin,), jnp.float32),
            "w1": jax.random.normal(k1, (3, 3, cin, out_planes), jnp.float32) * std,
            "gamma2": jnp.ones((out_planes,), jnp.float32),
            "beta2": jnp.zeros((out_planes,), jnp.float32),
            "w2": jax.random.normal(k2, (3, 3, out_planes, out_planes), jnp.float32) * std,
        }
        if cin != out_planes:
            p["ws"] = jax.random.normal(
                ks, (cin, out_planes), jnp.float32) * (2.0 / out_planes) ** 0.5
        params.append(p)
    return params


# ------------------------------ pure-JAX reference ----------------------------

def _bn_relu_ref(x, gamma, beta):
    mean = x.mean(axis=(0, 1, 2), keepdims=True)
    var = ((x - mean) ** 2).mean(axis=(0, 1, 2), keepdims=True)
    return jnp.maximum((x - mean) * gamma / jnp.sqrt(var + EPS) + beta, 0.0)


def _conv_ref(x, w, stride, pad):
    return jax.lax.conv_general_dilated(
        x, w, (stride, stride), ((pad, pad), (pad, pad)),
        dimension_numbers=("NHWC", "HWIO", "NHWC"))


def _basic_block_ref(x, p, stride):
    Cin, Cout = x.shape[-1], p["w1"].shape[-1]
    h = _bn_relu_ref(x, p["gamma1"], p["beta1"])
    out = _conv_ref(h, p["w1"], stride, 1)
    out = _bn_relu_ref(out, p["gamma2"], p["beta2"])
    out = _conv_ref(out, p["w2"], 1, 1)
    res = x if Cin == Cout else _conv_ref(h, p["ws"].reshape(1, 1, Cin, Cout), stride, 0)
    return out + res


def network_block_ref(x_nchw, params, stride):
    x = jnp.transpose(x_nchw, (0, 2, 3, 1)).astype(jnp.float32)
    for i, p in enumerate(params):
        x = _basic_block_ref(x, p, stride if i == 0 else 1)
    return jnp.transpose(x, (0, 3, 1, 2))


# ------------------------------------ main ------------------------------------

if __name__ == "__main__":
    key = jax.random.PRNGKey(0)
    kx, kp = jax.random.split(key)

    # NetworkBlock(nb_layers=2, in_planes=4, out_planes=8, block=BasicBlock,
    #              stride=2, dropRate=0.0); input NCHW (2, 4, 16, 16).
    nb_layers, in_planes, out_planes, stride = 2, 4, 8, 2
    x = jax.random.normal(kx, (2, in_planes, 16, 16), jnp.float32)
    params = init_params(kp, nb_layers, in_planes, out_planes)

    y = jax.block_until_ready(network_block_forward_jit(x, params, stride))
    y_ref = jax.block_until_ready(network_block_ref(x, params, stride))

    assert y.shape == (2, out_planes, 8, 8), y.shape
    if not bool(jnp.allclose(y, y_ref, atol=1e-4, rtol=1e-4)):
        raise SystemExit(
            "mismatch: max abs err %e" % float(jnp.max(jnp.abs(y - y_ref))))
    print("KERNEL_OK")
</pallas_src>

<mosaic_0001>
module attributes {stable_mosaic.version = 11 : i64} {
  func.func @_stats_kernel(%arg0: i32, %arg1: memref<1x16x16x128xf32, #tpu.memory_space<vmem>>, %arg2: memref<1x2x128xf32, #tpu.memory_space<vmem>>) attributes {dimension_semantics = [#tpu.dimension_semantics<parallel>], iteration_bounds = array<i64: 2>, scalar_prefetch = 0 : i64, scratch_operands = 0 : i64, tpu.core_type = #tpu.core_type<tc>, window_params = [{transform_indices = @transform_0, window_bounds = array<i64: 1, 16, 16, 128>}, {transform_indices = @transform_1, window_bounds = array<i64: 1, 2, 128>}]} {
    %c0 = arith.constant 0 : index
    %c0_0 = arith.constant 0 : index
    %c0_1 = arith.constant 0 : index
    %c0_2 = arith.constant 0 : index
    %0 = vector.load %arg1[%c0, %c0_0, %c0_1, %c0_2] : memref<1x16x16x128xf32, #tpu.memory_space<vmem>>, vector<1x16x16x128xf32>
    %1 = vector.shape_cast %0 : vector<1x16x16x128xf32> to vector<16x16x128xf32>
    %2 = vector.shape_cast %1 : vector<16x16x128xf32> to vector<256x128xf32>
    %cst = arith.constant dense<0.000000e+00> : vector<128xf32>
    %3 = vector.multi_reduction <add>, %2, %cst [0] : vector<256x128xf32> to vector<128xf32>
    %4 = vector.shape_cast %3 : vector<128xf32> to vector<1x128xf32>
    %5 = arith.mulf %2, %2 : vector<256x128xf32>
    %cst_3 = arith.constant dense<0.000000e+00> : vector<128xf32>
    %6 = vector.multi_reduction <add>, %5, %cst_3 [0] : vector<256x128xf32> to vector<128xf32>
    %7 = vector.shape_cast %6 : vector<128xf32> to vector<1x128xf32>
    %8 = tpu.concatenate %4, %7 in 0 : vector<1x128xf32>, vector<1x128xf32> -> vector<2x128xf32>
    %c0_4 = arith.constant 0 : index
    %c0_5 = arith.constant 0 : index
    %c0_6 = arith.constant 0 : index
    %9 = vector.load %arg2[%c0_4, %c0_5, %c0_6] : memref<1x2x128xf32, #tpu.memory_space<vmem>>, vector<1x2x128xf32>
    %10 = vector.shape_cast %9 : vector<1x2x128xf32> to vector<2x128xf32>
    %11 = vector.shape_cast %8 : vector<2x128xf32> to vector<1x2x128xf32>
    tpu.vector_store %arg2[%c0_4, %c0_5, %c0_6], %11 {strides = array<i32>} : memref<1x2x128xf32, #tpu.memory_space<vmem>>, vector<1x2x128xf32>,
    return
  }
  func.func @transform_0(%arg0: i32) -> (i32, i32, i32, i32) {
    %c0_i32 = arith.constant 0 : i32
    %c0_i32_0 = arith.constant 0 : i32
    %c0_i32_1 = arith.constant 0 : i32
    %c0_i32_2 = arith.constant 0 : i32
    return %arg0, %c0_i32, %c0_i32_0, %c0_i32_1 : i32, i32, i32, i32
  }
  func.func @transform_1(%arg0: i32) -> (i32, i32, i32) {
    %c0_i32 = arith.constant 0 : i32
    %c0_i32_0 = arith.constant 0 : i32
    %c0_i32_1 = arith.constant 0 : i32
    return %arg0, %c0_i32, %c0_i32_0 : i32, i32, i32
  }
}

module attributes {stable_mosaic.version = 11 : i64} {
  func.func @kernel(%arg0: i32, %arg1: memref<1x8x8x512xf32, #tpu.memory_space<vmem>>, %arg2: memref<1x512xf32, #tpu.memory_space<vmem>>, %arg3: memref<1x512xf32, #tpu.memory_space<vmem>>, %arg4: memref<3x384x128xf32, #tpu.memory_space<vmem>>, %arg5: memref<128x128xf32, #tpu.memory_space<vmem>>, %arg6: memref<1x8x8x128xf32, #tpu.memory_space<vmem>>, %arg7: memref<1x2x128xf32, #tpu.memory_space<vmem>>, %arg8: memref<1x8x8x128xf32, #tpu.memory_space<vmem>>, %arg9: memref<9x8x384xf32, #tpu.memory_space<vmem>>, %arg10: memref<9x8x384xf32, #tpu.memory_space<vmem>>) attributes {dimension_semantics = [#tpu.dimension_semantics<parallel>], iteration_bounds = array<i64: 2>, scalar_prefetch = 0 : i64, scratch_operands = 2 : i64, tpu.core_type = #tpu.core_type<tc>, window_params = [{transform_indices = @transform_0, window_bounds = array<i64: 1, 8, 8, 512>}, {pipeline_mode = #tpu.pipeline_mode<synchronous>, transform_indices = @transform_1, window_bounds = array<i64: 1, 512>}, {pipeline_mode = #tpu.pipeline_mode<synchronous>, transform_indices = @transform_2, window_bounds = array<i64: 1, 512>}, {pipeline_mode = #tpu.pipeline_mode<synchronous>, transform_indices = @transform_3, window_bounds = array<i64: 3, 384, 128>}, {pipeline_mode = #tpu.pipeline_mode<synchronous>, transform_indices = @transform_4, window_bounds = array<i64: 128, 128>}, {transform_indices = @transform_5, window_bounds = array<i64: 1, 8, 8, 128>}, {transform_indices = @transform_6, window_bounds = array<i64: 1, 2, 128>}, {transform_indices = @transform_7, window_bounds = array<i64: 1, 8, 8, 128>}]} {
    %c0 = arith.constant 0 : index
    %c0_0 = arith.constant 0 : index
    %c0_1 = arith.constant 0 : index
    %c0_2 = arith.constant 0 : index
    %0 = vector.load %arg1[%c0, %c0_0, %c0_1, %c0_2] : memref<1x8x8x512xf32, #tpu.memory_space<vmem>>, vector<1x8x8x512xf32>
    %1 = vector.shape_cast %0 : vector<1x8x8x512xf32> to vector<8x8x512xf32>
    %c0_3 = arith.constant 0 : index
    %c0_4 = arith.constant 0 : index
    %2 = vector.load %arg2[%c0_3, %c0_4] : memref<1x512xf32, #tpu.memory_space<vmem>>, vector<1x512xf32>
    %3 = vector.shape_cast %2 : vector<1x512xf32> to vector<1x1x512xf32>
    %4 = vector.broadcast %3 : vector<1x1x512xf32> to vector<8x8x512xf32>
    %5 = arith.mulf %1, %4 : vector<8x8x512xf32>
    %c0_5 = arith.constant 0 : index
    %c0_6 = arith.constant 0 : index
    %6 = vector.load %arg3[%c0_5, %c0_6] : memref<1x512xf32, #tpu.memory_space<vmem>>, vector<1x512xf32>
    %7 = vector.shape_cast %6 : vector<1x512xf32> to vector<1x1x512xf32>
    %8 = vector.broadcast %7 : vector<1x1x512xf32> to vector<8x8x512xf32>
    %9 = arith.addf %5, %8 : vector<8x8x512xf32>
    %cst = arith.constant 0.000000e+00 : f32
    %10 = vector.broadcast %cst : f32 to vector<8x8x512xf32>
    %11 = arith.maximumf %9, %10 : vector<8x8x512xf32>
    %12 = vector.extract_strided_slice %11 {offsets = [0, 0, 0], sizes = [8, 8, 128], strides = [1, 1, 1]} : vector<8x8x512xf32> to vector<8x8x128xf32>
    %13 = vector.shape_cast %12 : vector<8x8x128xf32> to vector<64x128xf32>
    %c0_7 = arith.constant 0 : index
    %c0_8 = arith.constant 0 : index
    %14 = vector.load %arg5[%c0_7, %c0_8] : memref<128x128xf32, #tpu.memory_space<vmem>>, vector<128x128xf32>
    %cst_9 = arith.constant dense<0.000000e+00> : vector<64x128xf32>
    %15 = tpu.matmul %13, %14, %cst_9 {dimension_numbers = #tpu.dot_dimension_numbers<[1], [0], [0], [1], [0, 0, 1, 1], [], []>} : vector<64x128xf32>, vector<128x128xf32>, vector<64x128xf32> -> vector<64x128xf32>
    %16 = vector.shape_cast %15 : vector<64x128xf32> to vector<8x8x128xf32>
    %c0_10 = arith.constant 0 : index
    %c0_11 = arith.constant 0 : index
    %c0_12 = arith.constant 0 : index
    %c0_13 = arith.constant 0 : index
    %17 = vector.load %arg8[%c0_10, %c0_11, %c0_12, %c0_13] : memref<1x8x8x128xf32, #tpu.memory_space<vmem>>, vector<1x8x8x128xf32>
    %18 = vector.shape_cast %17 : vector<1x8x8x128xf32> to vector<8x8x128xf32>
    %19 = vector.shape_cast %16 : vector<8x8x128xf32> to vector<1x8x8x128xf32>
    tpu.vector_store %arg8[%c0_10, %c0_11, %c0_12, %c0_13], %19 {strides = array<i32>} : memref<1x8x8x128xf32, #tpu.memory_space<vmem>>, vector<1x8x8x128xf32>,
    %cst_14 = arith.constant 0.000000e+00 : f32
    %20 = vector.broadcast %cst_14 : f32 to vector<64x128xf32>
    %cst_15 = arith.constant 0.000000e+00 : f32
    %21 = vector.broadcast %cst_15 : f32 to vector<8x384xf32>
    %cst_16 = arith.constant 0.000000e+00 : f32
    %22 = vector.broadcast %cst_16 : f32 to vector<8x1x128xf32>
    %23 = vector.extract_strided_slice %11 {offsets = [0, 0, 128], sizes = [8, 8, 128], strides = [1, 1, 1]} : vector<8x8x512xf32> to vector<8x8x128xf32>
    %24 = vector.extract_strided_slice %11 {offsets = [0, 0, 0], sizes = [8, 8, 128], strides = [1, 1, 1]} : vector<8x8x512xf32> to vector<8x8x128xf32>
    %c0_17 = arith.constant 0 : index
    %c0_18 = arith.constant 0 : index
    %c0_19 = arith.constant 0 : index
    %25 = vector.load %arg9[%c0_17, %c0_18, %c0_19] : memref<9x8x384xf32, #tpu.memory_space<vmem>>, vector<1x8x384xf32>
    %26 = vector.shape_cast %25 : vector<1x8x384xf32> to vector<8x384xf32>
    %27 = vector.shape_cast %21 : vector<8x384xf32> to vector<1x8x384xf32>
    tpu.vector_store %arg9[%c0_17, %c0_18, %c0_19], %27 {strides = array<i32>} : memref<9x8x384xf32, #tpu.memory_space<vmem>>, vector<1x8x384xf32>,
    %28 = vector.extract_strided_slice %23 {offsets = [0, 0, 0], sizes = [8, 7, 128], strides = [1, 1, 1]} : vector<8x8x128xf32> to vector<8x7x128xf32>
    %c1 = arith.constant 1 : index
    %c1_20 = arith.constant 1 : index
    %c0_21 = arith.constant 0 : index
    %29 = vector.load %arg9[%c1, %c1_20, %c0_21] : memref<9x8x384xf32, #tpu.memory_space<vmem>>, vector<8x7x128xf32>
    tpu.vector_store %arg9[%c1, %c1_20, %c0_21], %28 {strides = array<i32>} : memref<9x8x384xf32, #tpu.memory_space<vmem>>, vector<8x7x128xf32>,
    %c1_22 = arith.constant 1 : index
    %c0_23 = arith.constant 0 : index
    %c0_24 = arith.constant 0 : index
    %30 = vector.load %arg9[%c1_22, %c0_23, %c0_24] : memref<9x8x384xf32, #tpu.memory_space<vmem>>, vector<8x1x128xf32>
    tpu.vector_store %arg9[%c1_22, %c0_23, %c0_24], %22 {strides = array<i32>} : memref<9x8x384xf32, #tpu.memory_space<vmem>>, vector<8x1x128xf32>,
    %c1_25 = arith.constant 1 : index
    %c0_26 = arith.constant 0 : index
    %c128 = arith.constant 128 : index
    %31 = vector.load %arg9[%c1_25, %c0_26, %c128] : memref<9x8x384xf32, #tpu.memory_space<vmem>>, vector<8x8x128xf32>
    tpu.vector_store %arg9[%c1_25, %c0_26, %c128], %24 {strides = array<i32>} : memref<9x8x384xf32, #tpu.memory_space<vmem>>, vector<8x8x128xf32>,
    %c1_27 = arith.constant 1 : index
    %c0_28 = arith.constant 0 : index
    %c256 = arith.constant 256 : index
    %32 = vector.load %arg9[%c1_27, %c0_28, %c256] : memref<9x8x384xf32, #tpu.memory_space<vmem>>, vector<8x8x128xf32>
    tpu.vector_store %arg9[%c1_27, %c0_28, %c256], %23 {strides = array<i32>} : memref<9x8x384xf32, #tpu.memory_space<vmem>>, vector<8x8x128xf32>,
    %33 = vector.extract_strided_slice %11 {offsets = [0, 0, 384], sizes = [8, 8, 128], strides = [1, 1, 1]} : vector<8x8x512xf32> to vector<8x8x128xf32>
    %34 = vector.extract_strided_slice %11 {offsets = [0, 0, 256], sizes = [8, 8, 128], strides = [1, 1, 1]} : vector<8x8x512xf32> to vector<8x8x128xf32>
    %c0_29 = arith.constant 0 : index
    %c0_30 = arith.constant 0 : index
    %c0_31 = arith.constant 0 : index
    %35 = vector.load %arg10[%c0_29, %c0_30, %c0_31] : memref<9x8x384xf32, #tpu.memory_space<vmem>>, vector<1x8x384xf32>
    %36 = vector.shape_cast %35 : vector<1x8x384xf32> to vector<8x384xf32>
    %37 = vector.shape_cast %21 : vector<8x384xf32> to vector<1x8x384xf32>
    tpu.vector_store %arg10[%c0_29, %c0_30, %c0_31], %37 {strides = array<i32>} : memref<9x8x384xf32, #tpu.memory_space<vmem>>, vector<1x8x384xf32>,
    %38 = vector.extract_strided_slice %33 {offsets = [0, 0, 0], sizes = [8, 7, 128], strides = [1, 1, 1]} : vector<8x8x128xf32> to vector<8x7x128xf32>
    %c1_32 = arith.constant 1 : index
    %c1_33 = arith.constant 1 : index
    %c0_34 = arith.constant 0 : index
    %39 = vector.load %arg10[%c1_32, %c1_33, %c0_34] : memref<9x8x384xf32, #tpu.memory_space<vmem>>, vector<8x7x128xf32>
    tpu.vector_store %arg10[%c1_32, %c1_33, %c0_34], %38 {strides = array<i32>} : memref<9x8x384xf32, #tpu.memory_space<vmem>>, vector<8x7x128xf32>,
    %c1_35 = arith.constant 1 : index
    %c0_36 = arith.constant 0 : index
    %c0_37 = arith.constant 0 : index
    %40 = vector.load %arg10[%c1_35, %c0_36, %c0_37] : memref<9x8x384xf32, #tpu.memory_space<vmem>>, vector<8x1x128xf32>
    tpu.vector_store %arg10[%c1_35, %c0_36, %c0_37], %22 {strides = array<i32>} : memref<9x8x384xf32, #tpu.memory_space<vmem>>, vector<8x1x128xf32>,
    %c1_38 = arith.constant 1 : index
    %c0_39 = arith.constant 0 : index
    %c128_40 = arith.constant 128 : index
    %41 = vector.load %arg10[%c1_38, %c0_39, %c128_40] : memref<9x8x384xf32, #tpu.memory_space<vmem>>, vector<8x8x128xf32>
    tpu.vector_store %arg10[%c1_38, %c0_39, %c128_40], %34 {strides = array<i32>} : memref<9x8x384xf32, #tpu.memory_space<vmem>>, vector<8x8x128xf32>,
    %c1_41 = arith.constant 1 : index
    %c0_42 = arith.constant 0 : index
    %c256_43 = arith.constant 256 : index
    %42 = vector.load %arg10[%c1_41, %c0_42, %c256_43] : memref<9x8x384xf32, #tpu.memory_space<vmem>>, vector<8x8x128xf32>
    tpu.vector_store %arg10[%c1_41, %c0_42, %c256_43], %33 {strides = array<i32>} : memref<9x8x384xf32, #tpu.memory_space<vmem>>, vector<8x8x128xf32>,
    %c0_44 = arith.constant 0 : index
    %c0_45 = arith.constant 0 : index
    %c0_46 = arith.constant 0 : index
    %43 = vector.load %arg10[%c0_44, %c0_45, %c0_46] : memref<9x8x384xf32, #tpu.memory_space<vmem>>, vector<8x8x384xf32>
    %44 = vector.shape_cast %43 : vector<8x8x384xf32> to vector<64x384xf32>
    %c0_47 = arith.constant 0 : index
    %c0_48 = arith.constant 0 : index
    %c0_49 = arith.constant 0 : index
    %45 = vector.load %arg4[%c0_47, %c0_48, %c0_49] : memref<3x384x128xf32, #tpu.memory_space<vmem>>, vector<1x384x128xf32>
    %46 = vector.shape_cast %45 : vector<1x384x128xf32> to vector<384x128xf32>
    %cst_50 = arith.constant dense<0.000000e+00> : vector<64x128xf32>
    %47 = tpu.matmul %44, %46, %cst_50 {dimension_numbers = #tpu.dot_dimension_numbers<[1], [0], [0], [1], [0, 0, 1, 1], [], []>} : vector<64x384xf32>, vector<384x128xf32>, vector<64x128xf32> -> vector<64x128xf32>
    %48 = arith.addf %20, %47 : vector<64x128xf32>
    %c1_51 = arith.constant 1 : index
    %c0_52 = arith.constant 0 : index
    %c0_53 = arith.constant 0 : index
    %49 = vector.load %arg9[%c1_51, %c0_52, %c0_53] : memref<9x8x384xf32, #tpu.memory_space<vmem>>, vector<8x8x384xf32>
    %50 = vector.shape_cast %49 : vector<8x8x384xf32> to vector<64x384xf32>
    %c1_54 = arith.constant 1 : index
    %c0_55 = arith.constant 0 : index
    %c0_56 = arith.constant 0 : index
    %51 = vector.load %arg4[%c1_54, %c0_55, %c0_56] : memref<3x384x128xf32, #tpu.memory_space<vmem>>, vector<1x384x128xf32>
    %52 = vector.shape_cast %51 : vector<1x384x128xf32> to vector<384x128xf32>
    %cst_57 = arith.constant dense<0.000000e+00> : vector<64x128xf32>
    %53 = tpu.matmul %50, %52, %cst_57 {dimension_numbers = #tpu.dot_dimension_numbers<[1], [0], [0], [1], [0, 0, 1, 1], [], []>} : vector<64x384xf32>, vector<384x128xf32>, vector<64x128xf32> -> vector<64x128xf32>
    %54 = arith.addf %48, %53 : vector<64x128xf32>
    %c1_58 = arith.constant 1 : index
    %c0_59 = arith.constant 0 : index
    %c0_60 = arith.constant 0 : index
    %55 = vector.load %arg10[%c1_58, %c0_59, %c0_60] : memref<9x8x384xf32, #tpu.memory_space<vmem>>, vector<8x8x384xf32>
    %56 = vector.shape_cast %55 : vector<8x8x384xf32> to vector<64x384xf32>
    %c2 = arith.constant 2 : index
    %c0_61 = arith.constant 0 : index
    %c0_62 = arith.constant 0 : index
    %57 = vector.load %arg4[%c2, %c0_61, %c0_62] : memref<3x384x128xf32, #tpu.memory_space<vmem>>, vector<1x384x128xf32>
    %58 = vector.shape_cast %57 : vector<1x384x128xf32> to vector<384x128xf32>
    %cst_63 = arith.constant dense<0.000000e+00> : vector<64x128xf32>
    %59 = tpu.matmul %56, %58, %cst_63 {dimension_numbers = #tpu.dot_dimension_numbers<[1], [0], [0], [1], [0, 0, 1, 1], [], []>} : vector<64x384xf32>, vector<384x128xf32>, vector<64x128xf32> -> vector<64x128xf32>
    %60 = arith.addf %54, %59 : vector<64x128xf32>
    %61 = vector.shape_cast %60 : vector<64x128xf32> to vector<8x8x128xf32>
    %c0_64 = arith.constant 0 : index
    %c0_65 = arith.constant 0 : index
    %c0_66 = arith.constant 0 : index
    %c0_67 = arith.constant 0 : index
    %62 = vector.load %arg6[%c0_64, %c0_65, %c0_66, %c0_67] : memref<1x8x8x128xf32, #tpu.memory_space<vmem>>, vector<1x8x8x128xf32>
    %63 = vector.shape_cast %62 : vector<1x8x8x128xf32> to vector<8x8x128xf32>
    %64 = vector.shape_cast %61 : vector<8x8x128xf32> to vector<1x8x8x128xf32>
    tpu.vector_store %arg6[%c0_64, %c0_65, %c0_66, %c0_67], %64 {strides = array<i32>} : memref<1x8x8x128xf32, #tpu.memory_space<vmem>>, vector<1x8x8x128xf32>,
    %cst_68 = arith.constant dense<0.000000e+00> : vector<128xf32>
    %65 = vector.multi_reduction <add>, %60, %cst_68 [0] : vector<64x128xf32> to vector<128xf32>
    %66 = vector.shape_cast %65 : vector<128xf32> to vector<1x128xf32>
    %67 = arith.mulf %60, %60 : vector<64x128xf32>
    %cst_69 = arith.constant dense<0.000000e+00> : vector<128xf32>
    %68 = vector.multi_reduction <add>, %67, %cst_69 [0] : vector<64x128xf32> to vector<128xf32>
    %69 = vector.shape_cast %68 : vector<128xf32> to vector<1x128xf32>
    %70 = tpu.concatenate %66, %69 in 0 : vector<1x128xf32>, vector<1x128xf32> -> vector<2x128xf32>
    %c0_70 = arith.constant 0 : index
    %c0_71 = arith.constant 0 : index
    %c0_72 = arith.constant 0 : index
    %71 = vector.load %arg7[%c0_70, %c0_71, %c0_72] : memref<1x2x128xf32, #tpu.memory_space<vmem>>, vector<1x2x128xf32>
    %72 = vector.shape_cast %71 : vector<1x2x128xf32> to vector<2x128xf32>
    %73 = vector.shape_cast %70 : vector<2x128xf32> to vector<1x2x128xf32>
    tpu.vector_store %arg7[%c0_70, %c0_71, %c0_72], %73 {strides = array<i32>} : memref<1x2x128xf32, #tpu.memory_space<vmem>>, vector<1x2x128xf32>,
    return
  }
  func.func @transform_0(%arg0: i32) -> (i32, i32, i32, i32) {
    %c0_i32 = arith.constant 0 : i32
    %c0_i32_0 = arith.constant 0 : i32
    %c0_i32_1 = arith.constant 0 : i32
    %c0_i32_2 = arith.constant 0 : i32
    return %arg0, %c0_i32, %c0_i32_0, %c0_i32_1 : i32, i32, i32, i32
  }
  func.func @transform_1(%arg0: i32) -> (i32, i32) {
    %c0_i32 = arith.constant 0 : i32
    %c0_i32_0 = arith.constant 0 : i32
    %c0_i32_1 = arith.constant 0 : i32
    return %c0_i32, %c0_i32_0 : i32, i32
  }
  func.func @transform_2(%arg0: i32) -> (i32, i32) {
    %c0_i32 = arith.constant 0 : i32
    %c0_i32_0 = arith.constant 0 : i32
    %c0_i32_1 = arith.constant 0 : i32
    return %c0_i32, %c0_i32_0 : i32, i32
  }
  func.func @transform_3(%arg0: i32) -> (i32, i32, i32) {
    %c0_i32 = arith.constant 0 : i32
    %c0_i32_0 = arith.constant 0 : i32
    %c0_i32_1 = arith.constant 0 : i32
    %c0_i32_2 = arith.constant 0 : i32
    return %c0_i32, %c0_i32_0, %c0_i32_1 : i32, i32, i32
  }
  func.func @transform_4(%arg0: i32) -> (i32, i32) {
    %c0_i32 = arith.constant 0 : i32
    %c0_i32_0 = arith.constant 0 : i32
    %c0_i32_1 = arith.constant 0 : i32
    return %c0_i32, %c0_i32_0 : i32, i32
  }
  func.func @transform_5(%arg0: i32) -> (i32, i32, i32, i32) {
    %c0_i32 = arith.constant 0 : i32
    %c0_i32_0 = arith.constant 0 : i32
    %c0_i32_1 = arith.constant 0 : i32
    %c0_i32_2 = arith.constant 0 : i32
    return %arg0, %c0_i32, %c0_i32_0, %c0_i32_1 : i32, i32, i32, i32
  }
  func.func @transform_6(%arg0: i32) -> (i32, i32, i32) {
    %c0_i32 = arith.constant 0 : i32
    %c0_i32_0 = arith.constant 0 : i32
    %c0_i32_1 = arith.constant 0 : i32
    return %arg0, %c0_i32, %c0_i32_0 : i32, i32, i32
  }
  func.func @transform_7(%arg0: i32) -> (i32, i32, i32, i32) {
    %c0_i32 = arith.constant 0 : i32
    %c0_i32_0 = arith.constant 0 : i32
    %c0_i32_1 = arith.constant 0 : i32
    %c0_i32_2 = arith.constant 0 : i32
    return %arg0, %c0_i32, %c0_i32_0, %c0_i32_1 : i32, i32, i32, i32
  }
}

module attributes {stable_mosaic.version = 11 : i64} {
  func.func @kernel(%arg0: i32, %arg1: memref<1x8x8x128xf32, #tpu.memory_space<vmem>>, %arg2: memref<1x128xf32, #tpu.memory_space<vmem>>, %arg3: memref<1x128xf32, #tpu.memory_space<vmem>>, %arg4: memref<3x384x128xf32, #tpu.memory_space<vmem>>, %arg5: memref<1x8x8x128xf32, #tpu.memory_space<vmem>>, %arg6: memref<1x8x8x128xf32, #tpu.memory_space<vmem>>, %arg7: memref<1x2x128xf32, #tpu.memory_space<vmem>>, %arg8: memref<10x8x384xf32, #tpu.memory_space<vmem>>) attributes {dimension_semantics = [#tpu.dimension_semantics<parallel>], iteration_bounds = array<i64: 2>, scalar_prefetch = 0 : i64, scratch_operands = 1 : i64, tpu.core_type = #tpu.core_type<tc>, window_params = [{transform_indices = @transform_0, window_bounds = array<i64: 1, 8, 8, 128>}, {pipeline_mode = #tpu.pipeline_mode<synchronous>, transform_indices = @transform_1, window_bounds = array<i64: 1, 128>}, {pipeline_mode = #tpu.pipeline_mode<synchronous>, transform_indices = @transform_2, window_bounds = array<i64: 1, 128>}, {pipeline_mode = #tpu.pipeline_mode<synchronous>, transform_indices = @transform_3, window_bounds = array<i64: 3, 384, 128>}, {transform_indices = @transform_4, window_bounds = array<i64: 1, 8, 8, 128>}, {transform_indices = @transform_5, window_bounds = array<i64: 1, 8, 8, 128>}, {transform_indices = @transform_6, window_bounds = array<i64: 1, 2, 128>}]} {
    %c0 = arith.constant 0 : index
    %c0_0 = arith.constant 0 : index
    %c0_1 = arith.constant 0 : index
    %c0_2 = arith.constant 0 : index
    %0 = vector.load %arg1[%c0, %c0_0, %c0_1, %c0_2] : memref<1x8x8x128xf32, #tpu.memory_space<vmem>>, vector<1x8x8x128xf32>
    %1 = vector.shape_cast %0 : vector<1x8x8x128xf32> to vector<8x8x128xf32>
    %c0_3 = arith.constant 0 : index
    %c0_4 = arith.constant 0 : index
    %2 = vector.load %arg2[%c0_3, %c0_4] : memref<1x128xf32, #tpu.memory_space<vmem>>, vector<1x128xf32>
    %3 = vector.shape_cast %2 : vector<1x128xf32> to vector<1x1x128xf32>
    %4 = vector.broadcast %3 : vector<1x1x128xf32> to vector<8x8x128xf32>
    %5 = arith.mulf %1, %4 : vector<8x8x128xf32>
    %c0_5 = arith.constant 0 : index
    %c0_6 = arith.constant 0 : index
    %6 = vector.load %arg3[%c0_5, %c0_6] : memref<1x128xf32, #tpu.memory_space<vmem>>, vector<1x128xf32>
    %7 = vector.shape_cast %6 : vector<1x128xf32> to vector<1x1x128xf32>
    %8 = vector.broadcast %7 : vector<1x1x128xf32> to vector<8x8x128xf32>
    %9 = arith.addf %5, %8 : vector<8x8x128xf32>
    %cst = arith.constant 0.000000e+00 : f32
    %10 = vector.broadcast %cst : f32 to vector<8x8x128xf32>
    %11 = arith.maximumf %9, %10 : vector<8x8x128xf32>
    %c0_7 = arith.constant 0 : index
    %c0_8 = arith.constant 0 : index
    %c0_9 = arith.constant 0 : index
    %c0_10 = arith.constant 0 : index
    %12 = vector.load %arg5[%c0_7, %c0_8, %c0_9, %c0_10] : memref<1x8x8x128xf32, #tpu.memory_space<vmem>>, vector<1x8x8x128xf32>
    %13 = vector.shape_cast %12 : vector<1x8x8x128xf32> to vector<8x8x128xf32>
    %14 = vector.shape_cast %13 : vector<8x8x128xf32> to vector<64x128xf32>
    %cst_11 = arith.constant 0.000000e+00 : f32
    %15 = vector.broadcast %cst_11 : f32 to vector<8x384xf32>
    %cst_12 = arith.constant 0.000000e+00 : f32
    %16 = vector.broadcast %cst_12 : f32 to vector<8x1x128xf32>
    %c0_13 = arith.constant 0 : index
    %c0_14 = arith.constant 0 : index
    %c0_15 = arith.constant 0 : index
    %17 = vector.load %arg8[%c0_13, %c0_14, %c0_15] : memref<10x8x384xf32, #tpu.memory_space<vmem>>, vector<1x8x384xf32>
    %18 = vector.shape_cast %17 : vector<1x8x384xf32> to vector<8x384xf32>
    %19 = vector.shape_cast %15 : vector<8x384xf32> to vector<1x8x384xf32>
    tpu.vector_store %arg8[%c0_13, %c0_14, %c0_15], %19 {strides = array<i32>} : memref<10x8x384xf32, #tpu.memory_space<vmem>>, vector<1x8x384xf32>,
    %c9 = arith.constant 9 : index
    %c0_16 = arith.constant 0 : index
    %c0_17 = arith.constant 0 : index
    %20 = vector.load %arg8[%c9, %c0_16, %c0_17] : memref<10x8x384xf32, #tpu.memory_space<vmem>>, vector<1x8x384xf32>
    %21 = vector.shape_cast %20 : vector<1x8x384xf32> to vector<8x384xf32>
    %22 = vector.shape_cast %15 : vector<8x384xf32> to vector<1x8x384xf32>
    tpu.vector_store %arg8[%c9, %c0_16, %c0_17], %22 {strides = array<i32>} : memref<10x8x384xf32, #tpu.memory_space<vmem>>, vector<1x8x384xf32>,
    %c1 = arith.constant 1 : index
    %c0_18 = arith.constant 0 : index
    %c128 = arith.constant 128 : index
    %23 = vector.load %arg8[%c1, %c0_18, %c128] : memref<10x8x384xf32, #tpu.memory_space<vmem>>, vector<8x8x128xf32>
    tpu.vector_store %arg8[%c1, %c0_18, %c128], %11 {strides = array<i32>} : memref<10x8x384xf32, #tpu.memory_space<vmem>>, vector<8x8x128xf32>,
    %24 = vector.extract_strided_slice %11 {offsets = [0, 0, 0], sizes = [8, 7, 128], strides = [1, 1, 1]} : vector<8x8x128xf32> to vector<8x7x128xf32>
    %c1_19 = arith.constant 1 : index
    %c1_20 = arith.constant 1 : index
    %c0_21 = arith.constant 0 : index
    %25 = vector.load %arg8[%c1_19, %c1_20, %c0_21] : memref<10x8x384xf32, #tpu.memory_space<vmem>>, vector<8x7x128xf32>
    tpu.vector_store %arg8[%c1_19, %c1_20, %c0_21], %24 {strides = array<i32>} : memref<10x8x384xf32, #tpu.memory_space<vmem>>, vector<8x7x128xf32>,
    %c1_22 = arith.constant 1 : index
    %c0_23 = arith.constant 0 : index
    %c0_24 = arith.constant 0 : index
    %26 = vector.load %arg8[%c1_22, %c0_23, %c0_24] : memref<10x8x384xf32, #tpu.memory_space<vmem>>, vector<8x1x128xf32>
    tpu.vector_store %arg8[%c1_22, %c0_23, %c0_24], %16 {strides = array<i32>} : memref<10x8x384xf32, #tpu.memory_space<vmem>>, vector<8x1x128xf32>,
    %27 = vector.extract_strided_slice %11 {offsets = [0, 1, 0], sizes = [8, 7, 128], strides = [1, 1, 1]} : vector<8x8x128xf32> to vector<8x7x128xf32>
    %c1_25 = arith.constant 1 : index
    %c0_26 = arith.constant 0 : index
    %c256 = arith.constant 256 : index
    %28 = vector.load %arg8[%c1_25, %c0_26, %c256] : memref<10x8x384xf32, #tpu.memory_space<vmem>>, vector<8x7x128xf32>
    tpu.vector_store %arg8[%c1_25, %c0_26, %c256], %27 {strides = array<i32>} : memref<10x8x384xf32, #tpu.memory_space<vmem>>, vector<8x7x128xf32>,
    %c1_27 = arith.constant 1 : index
    %c7 = arith.constant 7 : index
    %c256_28 = arith.constant 256 : index
    %29 = vector.load %arg8[%c1_27, %c7, %c256_28] : memref<10x8x384xf32, #tpu.memory_space<vmem>>, vector<8x1x128xf32>
    tpu.vector_store %arg8[%c1_27, %c7, %c256_28], %16 {strides = array<i32>} : memref<10x8x384xf32, #tpu.memory_space<vmem>>, vector<8x1x128xf32>,
    %c0_29 = arith.constant 0 : index
    %c0_30 = arith.constant 0 : index
    %c0_31 = arith.constant 0 : index
    %30 = vector.load %arg8[%c0_29, %c0_30, %c0_31] : memref<10x8x384xf32, #tpu.memory_space<vmem>>, vector<8x8x384xf32>
    %31 = vector.shape_cast %30 : vector<8x8x384xf32> to vector<64x384xf32>
    %c0_32 = arith.constant 0 : index
    %c0_33 = arith.constant 0 : index
    %c0_34 = arith.constant 0 : index
    %32 = vector.load %arg4[%c0_32, %c0_33, %c0_34] : memref<3x384x128xf32, #tpu.memory_space<vmem>>, vector<1x384x128xf32>
    %33 = vector.shape_cast %32 : vector<1x384x128xf32> to vector<384x128xf32>
    %cst_35 = arith.constant dense<0.000000e+00> : vector<64x128xf32>
    %34 = tpu.matmul %31, %33, %cst_35 {dimension_numbers = #tpu.dot_dimension_numbers<[1], [0], [0], [1], [0, 0, 1, 1], [], []>} : vector<64x384xf32>, vector<384x128xf32>, vector<64x128xf32> -> vector<64x128xf32>
    %35 = arith.addf %14, %34 : vector<64x128xf32>
    %c1_36 = arith.constant 1 : index
    %c0_37 = arith.constant 0 : index
    %c0_38 = arith.constant 0 : index
    %36 = vector.load %arg8[%c1_36, %c0_37, %c0_38] : memref<10x8x384xf32, #tpu.memory_space<vmem>>, vector<8x8x384xf32>
    %37 = vector.shape_cast %36 : vector<8x8x384xf32> to vector<64x384xf32>
    %c1_39 = arith.constant 1 : index
    %c0_40 = arith.constant 0 : index
    %c0_41 = arith.constant 0 : index
    %38 = vector.load %arg4[%c1_39, %c0_40, %c0_41] : memref<3x384x128xf32, #tpu.memory_space<vmem>>, vector<1x384x128xf32>
    %39 = vector.shape_cast %38 : vector<1x384x128xf32> to vector<384x128xf32>
    %cst_42 = arith.constant dense<0.000000e+00> : vector<64x128xf32>
    %40 = tpu.matmul %37, %39, %cst_42 {dimension_numbers = #tpu.dot_dimension_numbers<[1], [0], [0], [1], [0, 0, 1, 1], [], []>} : vector<64x384xf32>, vector<384x128xf32>, vector<64x128xf32> -> vector<64x128xf32>
    %41 = arith.addf %35, %40 : vector<64x128xf32>
    %c2 = arith.constant 2 : index
    %c0_43 = arith.constant 0 : index
    %c0_44 = arith.constant 0 : index
    %42 = vector.load %arg8[%c2, %c0_43, %c0_44] : memref<10x8x384xf32, #tpu.memory_space<vmem>>, vector<8x8x384xf32>
    %43 = vector.shape_cast %42 : vector<8x8x384xf32> to vector<64x384xf32>
    %c2_45 = arith.constant 2 : index
    %c0_46 = arith.constant 0 : index
    %c0_47 = arith.constant 0 : index
    %44 = vector.load %arg4[%c2_45, %c0_46, %c0_47] : memref<3x384x128xf32, #tpu.memory_space<vmem>>, vector<1x384x128xf32>
    %45 = vector.shape_cast %44 : vector<1x384x128xf32> to vector<384x128xf32>
    %cst_48 = arith.constant dense<0.000000e+00> : vector<64x128xf32>
    %46 = tpu.matmul %43, %45, %cst_48 {dimension_numbers = #tpu.dot_dimension_numbers<[1], [0], [0], [1], [0, 0, 1, 1], [], []>} : vector<64x384xf32>, vector<384x128xf32>, vector<64x128xf32> -> vector<64x128xf32>
    %47 = arith.addf %41, %46 : vector<64x128xf32>
    %48 = vector.shape_cast %47 : vector<64x128xf32> to vector<8x8x128xf32>
    %c0_49 = arith.constant 0 : index
    %c0_50 = arith.constant 0 : index
    %c0_51 = arith.constant 0 : index
    %c0_52 = arith.constant 0 : index
    %49 = vector.load %arg6[%c0_49, %c0_50, %c0_51, %c0_52] : memref<1x8x8x128xf32, #tpu.memory_space<vmem>>, vector<1x8x8x128xf32>
    %50 = vector.shape_cast %49 : vector<1x8x8x128xf32> to vector<8x8x128xf32>
    %51 = vector.shape_cast %48 : vector<8x8x128xf32> to vector<1x8x8x128xf32>
    tpu.vector_store %arg6[%c0_49, %c0_50, %c0_51, %c0_52], %51 {strides = array<i32>} : memref<1x8x8x128xf32, #tpu.memory_space<vmem>>, vector<1x8x8x128xf32>,
    %cst_53 = arith.constant dense<0.000000e+00> : vector<128xf32>
    %52 = vector.multi_reduction <add>, %47, %cst_53 [0] : vector<64x128xf32> to vector<128xf32>
    %53 = vector.shape_cast %52 : vector<128xf32> to vector<1x128xf32>
    %54 = arith.mulf %47, %47 : vector<64x128xf32>
    %cst_54 = arith.constant dense<0.000000e+00> : vector<128xf32>
    %55 = vector.multi_reduction <add>, %54, %cst_54 [0] : vector<64x128xf32> to vector<128xf32>
    %56 = vector.shape_cast %55 : vector<128xf32> to vector<1x128xf32>
    %57 = tpu.concatenate %53, %56 in 0 : vector<1x128xf32>, vector<1x128xf32> -> vector<2x128xf32>
    %c0_55 = arith.constant 0 : index
    %c0_56 = arith.constant 0 : index
    %c0_57 = arith.constant 0 : index
    %58 = vector.load %arg7[%c0_55, %c0_56, %c0_57] : memref<1x2x128xf32, #tpu.memory_space<vmem>>, vector<1x2x128xf32>
    %59 = vector.shape_cast %58 : vector<1x2x128xf32> to vector<2x128xf32>
    %60 = vector.shape_cast %57 : vector<2x128xf32> to vector<1x2x128xf32>
    tpu.vector_store %arg7[%c0_55, %c0_56, %c0_57], %60 {strides = array<i32>} : memref<1x2x128xf32, #tpu.memory_space<vmem>>, vector<1x2x128xf32>,
    return
  }
  func.func @transform_0(%arg0: i32) -> (i32, i32, i32, i32) {
    %c0_i32 = arith.constant 0 : i32
    %c0_i32_0 = arith.constant 0 : i32
    %c0_i32_1 = arith.constant 0 : i32
    %c0_i32_2 = arith.constant 0 : i32
    return %arg0, %c0_i32, %c0_i32_0, %c0_i32_1 : i32, i32, i32, i32
  }
  func.func @transform_1(%arg0: i32) -> (i32, i32) {
    %c0_i32 = arith.constant 0 : i32
    %c0_i32_0 = arith.constant 0 : i32
    %c0_i32_1 = arith.constant 0 : i32
    return %c0_i32, %c0_i32_0 : i32, i32
  }
  func.func @transform_2(%arg0: i32) -> (i32, i32) {
    %c0_i32 = arith.constant 0 : i32
    %c0_i32_0 = arith.constant 0 : i32
    %c0_i32_1 = arith.constant 0 : i32
    return %c0_i32, %c0_i32_0 : i32, i32
  }
  func.func @transform_3(%arg0: i32) -> (i32, i32, i32) {
    %c0_i32 = arith.constant 0 : i32
    %c0_i32_0 = arith.constant 0 : i32
    %c0_i32_1 = arith.constant 0 : i32
    %c0_i32_2 = arith.constant 0 : i32
    return %c0_i32, %c0_i32_0, %c0_i32_1 : i32, i32, i32
  }
  func.func @transform_4(%arg0: i32) -> (i32, i32, i32, i32) {
    %c0_i32 = arith.constant 0 : i32
    %c0_i32_0 = arith.constant 0 : i32
    %c0_i32_1 = arith.constant 0 : i32
    %c0_i32_2 = arith.constant 0 : i32
    return %arg0, %c0_i32, %c0_i32_0, %c0_i32_1 : i32, i32, i32, i32
  }
  func.func @transform_5(%arg0: i32) -> (i32, i32, i32, i32) {
    %c0_i32 = arith.constant 0 : i32
    %c0_i32_0 = arith.constant 0 : i32
    %c0_i32_1 = arith.constant 0 : i32
    %c0_i32_2 = arith.constant 0 : i32
    return %arg0, %c0_i32, %c0_i32_0, %c0_i32_1 : i32, i32, i32, i32
  }
  func.func @transform_6(%arg0: i32) -> (i32, i32, i32) {
    %c0_i32 = arith.constant 0 : i32
    %c0_i32_0 = arith.constant 0 : i32
    %c0_i32_1 = arith.constant 0 : i32
    return %arg0, %c0_i32, %c0_i32_0 : i32, i32, i32
  }
}

module attributes {stable_mosaic.version = 11 : i64} {
  func.func @kernel(%arg0: i32, %arg1: memref<1x8x8x128xf32, #tpu.memory_space<vmem>>, %arg2: memref<1x128xf32, #tpu.memory_space<vmem>>, %arg3: memref<1x128xf32, #tpu.memory_space<vmem>>, %arg4: memref<3x384x128xf32, #tpu.memory_space<vmem>>, %arg5: memref<1x8x8x128xf32, #tpu.memory_space<vmem>>, %arg6: memref<1x2x128xf32, #tpu.memory_space<vmem>>, %arg7: memref<10x8x384xf32, #tpu.memory_space<vmem>>) attributes {dimension_semantics = [#tpu.dimension_semantics<parallel>], iteration_bounds = array<i64: 2>, scalar_prefetch = 0 : i64, scratch_operands = 1 : i64, tpu.core_type = #tpu.core_type<tc>, window_params = [{transform_indices = @transform_0, window_bounds = array<i64: 1, 8, 8, 128>}, {pipeline_mode = #tpu.pipeline_mode<synchronous>, transform_indices = @transform_1, window_bounds = array<i64: 1, 128>}, {pipeline_mode = #tpu.pipeline_mode<synchronous>, transform_indices = @transform_2, window_bounds = array<i64: 1, 128>}, {pipeline_mode = #tpu.pipeline_mode<synchronous>, transform_indices = @transform_3, window_bounds = array<i64: 3, 384, 128>}, {transform_indices = @transform_4, window_bounds = array<i64: 1, 8, 8, 128>}, {transform_indices = @transform_5, window_bounds = array<i64: 1, 2, 128>}]} {
    %c0 = arith.constant 0 : index
    %c0_0 = arith.constant 0 : index
    %c0_1 = arith.constant 0 : index
    %c0_2 = arith.constant 0 : index
    %0 = vector.load %arg1[%c0, %c0_0, %c0_1, %c0_2] : memref<1x8x8x128xf32, #tpu.memory_space<vmem>>, vector<1x8x8x128xf32>
    %1 = vector.shape_cast %0 : vector<1x8x8x128xf32> to vector<8x8x128xf32>
    %c0_3 = arith.constant 0 : index
    %c0_4 = arith.constant 0 : index
    %2 = vector.load %arg2[%c0_3, %c0_4] : memref<1x128xf32, #tpu.memory_space<vmem>>, vector<1x128xf32>
    %3 = vector.shape_cast %2 : vector<1x128xf32> to vector<1x1x128xf32>
    %4 = vector.broadcast %3 : vector<1x1x128xf32> to vector<8x8x128xf32>
    %5 = arith.mulf %1, %4 : vector<8x8x128xf32>
    %c0_5 = arith.constant 0 : index
    %c0_6 = arith.constant 0 : index
    %6 = vector.load %arg3[%c0_5, %c0_6] : memref<1x128xf32, #tpu.memory_space<vmem>>, vector<1x128xf32>
    %7 = vector.shape_cast %6 : vector<1x128xf32> to vector<1x1x128xf32>
    %8 = vector.broadcast %7 : vector<1x1x128xf32> to vector<8x8x128xf32>
    %9 = arith.addf %5, %8 : vector<8x8x128xf32>
    %cst = arith.constant 0.000000e+00 : f32
    %10 = vector.broadcast %cst : f32 to vector<8x8x128xf32>
    %11 = arith.maximumf %9, %10 : vector<8x8x128xf32>
    %cst_7 = arith.constant 0.000000e+00 : f32
    %12 = vector.broadcast %cst_7 : f32 to vector<64x128xf32>
    %cst_8 = arith.constant 0.000000e+00 : f32
    %13 = vector.broadcast %cst_8 : f32 to vector<8x384xf32>
    %cst_9 = arith.constant 0.000000e+00 : f32
    %14 = vector.broadcast %cst_9 : f32 to vector<8x1x128xf32>
    %c0_10 = arith.constant 0 : index
    %c0_11 = arith.constant 0 : index
    %c0_12 = arith.constant 0 : index
    %15 = vector.load %arg7[%c0_10, %c0_11, %c0_12] : memref<10x8x384xf32, #tpu.memory_space<vmem>>, vector<1x8x384xf32>
    %16 = vector.shape_cast %15 : vector<1x8x384xf32> to vector<8x384xf32>
    %17 = vector.shape_cast %13 : vector<8x384xf32> to vector<1x8x384xf32>
    tpu.vector_store %arg7[%c0_10, %c0_11, %c0_12], %17 {strides = array<i32>} : memref<10x8x384xf32, #tpu.memory_space<vmem>>, vector<1x8x384xf32>,
    %c9 = arith.constant 9 : index
    %c0_13 = arith.constant 0 : index
    %c0_14 = arith.constant 0 : index
    %18 = vector.load %arg7[%c9, %c0_13, %c0_14] : memref<10x8x384xf32, #tpu.memory_space<vmem>>, vector<1x8x384xf32>
    %19 = vector.shape_cast %18 : vector<1x8x384xf32> to vector<8x384xf32>
    %20 = vector.shape_cast %13 : vector<8x384xf32> to vector<1x8x384xf32>
    tpu.vector_store %arg7[%c9, %c0_13, %c0_14], %20 {strides = array<i32>} : memref<10x8x384xf32, #tpu.memory_space<vmem>>, vector<1x8x384xf32>,
    %c1 = arith.constant 1 : index
    %c0_15 = arith.constant 0 : index
    %c128 = arith.constant 128 : index
    %21 = vector.load %arg7[%c1, %c0_15, %c128] : memref<10x8x384xf32, #tpu.memory_space<vmem>>, vector<8x8x128xf32>
    tpu.vector_store %arg7[%c1, %c0_15, %c128], %11 {strides = array<i32>} : memref<10x8x384xf32, #tpu.memory_space<vmem>>, vector<8x8x128xf32>,
    %22 = vector.extract_strided_slice %11 {offsets = [0, 0, 0], sizes = [8, 7, 128], strides = [1, 1, 1]} : vector<8x8x128xf32> to vector<8x7x128xf32>
    %c1_16 = arith.constant 1 : index
    %c1_17 = arith.constant 1 : index
    %c0_18 = arith.constant 0 : index
    %23 = vector.load %arg7[%c1_16, %c1_17, %c0_18] : memref<10x8x384xf32, #tpu.memory_space<vmem>>, vector<8x7x128xf32>
    tpu.vector_store %arg7[%c1_16, %c1_17, %c0_18], %22 {strides = array<i32>} : memref<10x8x384xf32, #tpu.memory_space<vmem>>, vector<8x7x128xf32>,
    %c1_19 = arith.constant 1 : index
    %c0_20 = arith.constant 0 : index
    %c0_21 = arith.constant 0 : index
    %24 = vector.load %arg7[%c1_19, %c0_20, %c0_21] : memref<10x8x384xf32, #tpu.memory_space<vmem>>, vector<8x1x128xf32>
    tpu.vector_store %arg7[%c1_19, %c0_20, %c0_21], %14 {strides = array<i32>} : memref<10x8x384xf32, #tpu.memory_space<vmem>>, vector<8x1x128xf32>,
    %25 = vector.extract_strided_slice %11 {offsets = [0, 1, 0], sizes = [8, 7, 128], strides = [1, 1, 1]} : vector<8x8x128xf32> to vector<8x7x128xf32>
    %c1_22 = arith.constant 1 : index
    %c0_23 = arith.constant 0 : index
    %c256 = arith.constant 256 : index
    %26 = vector.load %arg7[%c1_22, %c0_23, %c256] : memref<10x8x384xf32, #tpu.memory_space<vmem>>, vector<8x7x128xf32>
    tpu.vector_store %arg7[%c1_22, %c0_23, %c256], %25 {strides = array<i32>} : memref<10x8x384xf32, #tpu.memory_space<vmem>>, vector<8x7x128xf32>,
    %c1_24 = arith.constant 1 : index
    %c7 = arith.constant 7 : index
    %c256_25 = arith.constant 256 : index
    %27 = vector.load %arg7[%c1_24, %c7, %c256_25] : memref<10x8x384xf32, #tpu.memory_space<vmem>>, vector<8x1x128xf32>
    tpu.vector_store %arg7[%c1_24, %c7, %c256_25], %14 {strides = array<i32>} : memref<10x8x384xf32, #tpu.memory_space<vmem>>, vector<8x1x128xf32>,
    %c0_26 = arith.constant 0 : index
    %c0_27 = arith.constant 0 : index
    %c0_28 = arith.constant 0 : index
    %28 = vector.load %arg7[%c0_26, %c0_27, %c0_28] : memref<10x8x384xf32, #tpu.memory_space<vmem>>, vector<8x8x384xf32>
    %29 = vector.shape_cast %28 : vector<8x8x384xf32> to vector<64x384xf32>
    %c0_29 = arith.constant 0 : index
    %c0_30 = arith.constant 0 : index
    %c0_31 = arith.constant 0 : index
    %30 = vector.load %arg4[%c0_29, %c0_30, %c0_31] : memref<3x384x128xf32, #tpu.memory_space<vmem>>, vector<1x384x128xf32>
    %31 = vector.shape_cast %30 : vector<1x384x128xf32> to vector<384x128xf32>
    %cst_32 = arith.constant dense<0.000000e+00> : vector<64x128xf32>
    %32 = tpu.matmul %29, %31, %cst_32 {dimension_numbers = #tpu.dot_dimension_numbers<[1], [0], [0], [1], [0, 0, 1, 1], [], []>} : vector<64x384xf32>, vector<384x128xf32>, vector<64x128xf32> -> vector<64x128xf32>
    %33 = arith.addf %12, %32 : vector<64x128xf32>
    %c1_33 = arith.constant 1 : index
    %c0_34 = arith.constant 0 : index
    %c0_35 = arith.constant 0 : index
    %34 = vector.load %arg7[%c1_33, %c0_34, %c0_35] : memref<10x8x384xf32, #tpu.memory_space<vmem>>, vector<8x8x384xf32>
    %35 = vector.shape_cast %34 : vector<8x8x384xf32> to vector<64x384xf32>
    %c1_36 = arith.constant 1 : index
    %c0_37 = arith.constant 0 : index
    %c0_38 = arith.constant 0 : index
    %36 = vector.load %arg4[%c1_36, %c0_37, %c0_38] : memref<3x384x128xf32, #tpu.memory_space<vmem>>, vector<1x384x128xf32>
    %37 = vector.shape_cast %36 : vector<1x384x128xf32> to vector<384x128xf32>
    %cst_39 = arith.constant dense<0.000000e+00> : vector<64x128xf32>
    %38 = tpu.matmul %35, %37, %cst_39 {dimension_numbers = #tpu.dot_dimension_numbers<[1], [0], [0], [1], [0, 0, 1, 1], [], []>} : vector<64x384xf32>, vector<384x128xf32>, vector<64x128xf32> -> vector<64x128xf32>
    %39 = arith.addf %33, %38 : vector<64x128xf32>
    %c2 = arith.constant 2 : index
    %c0_40 = arith.constant 0 : index
    %c0_41 = arith.constant 0 : index
    %40 = vector.load %arg7[%c2, %c0_40, %c0_41] : memref<10x8x384xf32, #tpu.memory_space<vmem>>, vector<8x8x384xf32>
    %41 = vector.shape_cast %40 : vector<8x8x384xf32> to vector<64x384xf32>
    %c2_42 = arith.constant 2 : index
    %c0_43 = arith.constant 0 : index
    %c0_44 = arith.constant 0 : index
    %42 = vector.load %arg4[%c2_42, %c0_43, %c0_44] : memref<3x384x128xf32, #tpu.memory_space<vmem>>, vector<1x384x128xf32>
    %43 = vector.shape_cast %42 : vector<1x384x128xf32> to vector<384x128xf32>
    %cst_45 = arith.constant dense<0.000000e+00> : vector<64x128xf32>
    %44 = tpu.matmul %41, %43, %cst_45 {dimension_numbers = #tpu.dot_dimension_numbers<[1], [0], [0], [1], [0, 0, 1, 1], [], []>} : vector<64x384xf32>, vector<384x128xf32>, vector<64x128xf32> -> vector<64x128xf32>
    %45 = arith.addf %39, %44 : vector<64x128xf32>
    %46 = vector.shape_cast %45 : vector<64x128xf32> to vector<8x8x128xf32>
    %c0_46 = arith.constant 0 : index
    %c0_47 = arith.constant 0 : index
    %c0_48 = arith.constant 0 : index
    %c0_49 = arith.constant 0 : index
    %47 = vector.load %arg5[%c0_46, %c0_47, %c0_48, %c0_49] : memref<1x8x8x128xf32, #tpu.memory_space<vmem>>, vector<1x8x8x128xf32>
    %48 = vector.shape_cast %47 : vector<1x8x8x128xf32> to vector<8x8x128xf32>
    %49 = vector.shape_cast %46 : vector<8x8x128xf32> to vector<1x8x8x128xf32>
    tpu.vector_store %arg5[%c0_46, %c0_47, %c0_48, %c0_49], %49 {strides = array<i32>} : memref<1x8x8x128xf32, #tpu.memory_space<vmem>>, vector<1x8x8x128xf32>,
    %cst_50 = arith.constant dense<0.000000e+00> : vector<128xf32>
    %50 = vector.multi_reduction <add>, %45, %cst_50 [0] : vector<64x128xf32> to vector<128xf32>
    %51 = vector.shape_cast %50 : vector<128xf32> to vector<1x128xf32>
    %52 = arith.mulf %45, %45 : vector<64x128xf32>
    %cst_51 = arith.constant dense<0.000000e+00> : vector<128xf32>
    %53 = vector.multi_reduction <add>, %52, %cst_51 [0] : vector<64x128xf32> to vector<128xf32>
    %54 = vector.shape_cast %53 : vector<128xf32> to vector<1x128xf32>
    %55 = tpu.concatenate %51, %54 in 0 : vector<1x128xf32>, vector<1x128xf32> -> vector<2x128xf32>
    %c0_52 = arith.constant 0 : index
    %c0_53 = arith.constant 0 : index
    %c0_54 = arith.constant 0 : index
    %56 = vector.load %arg6[%c0_52, %c0_53, %c0_54] : memref<1x2x128xf32, #tpu.memory_space<vmem>>, vector<1x2x128xf32>
    %57 = vector.shape_cast %56 : vector<1x2x128xf32> to vector<2x128xf32>
    %58 = vector.shape_cast %55 : vector<2x128xf32> to vector<1x2x128xf32>
    tpu.vector_store %arg6[%c0_52, %c0_53, %c0_54], %58 {strides = array<i32>} : memref<1x2x128xf32, #tpu.memory_space<vmem>>, vector<1x2x128xf32>,
    return
  }
  func.func @transform_0(%arg0: i32) -> (i32, i32, i32, i32) {
    %c0_i32 = arith.constant 0 : i32
    %c0_i32_0 = arith.constant 0 : i32
    %c0_i32_1 = arith.constant 0 : i32
    %c0_i32_2 = arith.constant 0 : i32
    return %arg0, %c0_i32, %c0_i32_0, %c0_i32_1 : i32, i32, i32, i32
  }
  func.func @transform_1(%arg0: i32) -> (i32, i32) {
    %c0_i32 = arith.constant 0 : i32
    %c0_i32_0 = arith.constant 0 : i32
    %c0_i32_1 = arith.constant 0 : i32
    return %c0_i32, %c0_i32_0 : i32, i32
  }
  func.func @transform_2(%arg0: i32) -> (i32, i32) {
    %c0_i32 = arith.constant 0 : i32
    %c0_i32_0 = arith.constant 0 : i32
    %c0_i32_1 = arith.constant 0 : i32
    return %c0_i32, %c0_i32_0 : i32, i32
  }
  func.func @transform_3(%arg0: i32) -> (i32, i32, i32) {
    %c0_i32 = arith.constant 0 : i32
    %c0_i32_0 = arith.constant 0 : i32
    %c0_i32_1 = arith.constant 0 : i32
    %c0_i32_2 = arith.constant 0 : i32
    return %c0_i32, %c0_i32_0, %c0_i32_1 : i32, i32, i32
  }
  func.func @transform_4(%arg0: i32) -> (i32, i32, i32, i32) {
    %c0_i32 = arith.constant 0 : i32
    %c0_i32_0 = arith.constant 0 : i32
    %c0_i32_1 = arith.constant 0 : i32
    %c0_i32_2 = arith.constant 0 : i32
    return %arg0, %c0_i32, %c0_i32_0, %c0_i32_1 : i32, i32, i32, i32
  }
  func.func @transform_5(%arg0: i32) -> (i32, i32, i32) {
    %c0_i32 = arith.constant 0 : i32
    %c0_i32_0 = arith.constant 0 : i32
    %c0_i32_1 = arith.constant 0 : i32
    return %arg0, %c0_i32, %c0_i32_0 : i32, i32, i32
  }
}

module attributes {stable_mosaic.version = 11 : i64} {
  func.func @kernel(%arg0: i32, %arg1: memref<1x8x8x128xf32, #tpu.memory_space<vmem>>, %arg2: memref<1x128xf32, #tpu.memory_space<vmem>>, %arg3: memref<1x128xf32, #tpu.memory_space<vmem>>, %arg4: memref<3x384x128xf32, #tpu.memory_space<vmem>>, %arg5: memref<1x8x8x128xf32, #tpu.memory_space<vmem>>, %arg6: memref<1x8x8x128xf32, #tpu.memory_space<vmem>>, %arg7: memref<1x2x128xf32, #tpu.memory_space<vmem>>, %arg8: memref<10x8x384xf32, #tpu.memory_space<vmem>>) attributes {dimension_semantics = [#tpu.dimension_semantics<parallel>], iteration_bounds = array<i64: 2>, scalar_prefetch = 0 : i64, scratch_operands = 1 : i64, tpu.core_type = #tpu.core_type<tc>, window_params = [{transform_indices = @transform_0, window_bounds = array<i64: 1, 8, 8, 128>}, {pipeline_mode = #tpu.pipeline_mode<synchronous>, transform_indices = @transform_1, window_bounds = array<i64: 1, 128>}, {pipeline_mode = #tpu.pipeline_mode<synchronous>, transform_indices = @transform_2, window_bounds = array<i64: 1, 128>}, {pipeline_mode = #tpu.pipeline_mode<synchronous>, transform_indices = @transform_3, window_bounds = array<i64: 3, 384, 128>}, {transform_indices = @transform_4, window_bounds = array<i64: 1, 8, 8, 128>}, {transform_indices = @transform_5, window_bounds = array<i64: 1, 8, 8, 128>}, {transform_indices = @transform_6, window_bounds = array<i64: 1, 2, 128>}]} {
    %c0 = arith.constant 0 : index
    %c0_0 = arith.constant 0 : index
    %c0_1 = arith.constant 0 : index
    %c0_2 = arith.constant 0 : index
    %0 = vector.load %arg1[%c0, %c0_0, %c0_1, %c0_2] : memref<1x8x8x128xf32, #tpu.memory_space<vmem>>, vector<1x8x8x128xf32>
    %1 = vector.shape_cast %0 : vector<1x8x8x128xf32> to vector<8x8x128xf32>
    %c0_3 = arith.constant 0 : index
    %c0_4 = arith.constant 0 : index
    %2 = vector.load %arg2[%c0_3, %c0_4] : memref<1x128xf32, #tpu.memory_space<vmem>>, vector<1x128xf32>
    %3 = vector.shape_cast %2 : vector<1x128xf32> to vector<1x1x128xf32>
    %4 = vector.broadcast %3 : vector<1x1x128xf32> to vector<8x8x128xf32>
    %5 = arith.mulf %1, %4 : vector<8x8x128xf32>
    %c0_5 = arith.constant 0 : index
    %c0_6 = arith.constant 0 : index
    %6 = vector.load %arg3[%c0_5, %c0_6] : memref<1x128xf32, #tpu.memory_space<vmem>>, vector<1x128xf32>
    %7 = vector.shape_cast %6 : vector<1x128xf32> to vector<1x1x128xf32>
    %8 = vector.broadcast %7 : vector<1x1x128xf32> to vector<8x8x128xf32>
    %9 = arith.addf %5, %8 : vector<8x8x128xf32>
    %cst = arith.constant 0.000000e+00 : f32
    %10 = vector.broadcast %cst : f32 to vector<8x8x128xf32>
    %11 = arith.maximumf %9, %10 : vector<8x8x128xf32>
    %c0_7 = arith.constant 0 : index
    %c0_8 = arith.constant 0 : index
    %c0_9 = arith.constant 0 : index
    %c0_10 = arith.constant 0 : index
    %12 = vector.load %arg5[%c0_7, %c0_8, %c0_9, %c0_10] : memref<1x8x8x128xf32, #tpu.memory_space<vmem>>, vector<1x8x8x128xf32>
    %13 = vector.shape_cast %12 : vector<1x8x8x128xf32> to vector<8x8x128xf32>
    %14 = vector.shape_cast %13 : vector<8x8x128xf32> to vector<64x128xf32>
    %cst_11 = arith.constant 0.000000e+00 : f32
    %15 = vector.broadcast %cst_11 : f32 to vector<8x384xf32>
    %cst_12 = arith.constant 0.000000e+00 : f32
    %16 = vector.broadcast %cst_12 : f32 to vector<8x1x128xf32>
    %c0_13 = arith.constant 0 : index
    %c0_14 = arith.constant 0 : index
    %c0_15 = arith.constant 0 : index
    %17 = vector.load %arg8[%c0_13, %c0_14, %c0_15] : memref<10x8x384xf32, #tpu.memory_space<vmem>>, vector<1x8x384xf32>
    %18 = vector.shape_cast %17 : vector<1x8x384xf32> to vector<8x384xf32>
    %19 = vector.shape_cast %15 : vector<8x384xf32> to vector<1x8x384xf32>
    tpu.vector_store %arg8[%c0_13, %c0_14, %c0_15], %19 {strides = array<i32>} : memref<10x8x384xf32, #tpu.memory_space<vmem>>, vector<1x8x384xf32>,
    %c9 = arith.constant 9 : index
    %c0_16 = arith.constant 0 : index
    %c0_17 = arith.constant 0 : index
    %20 = vector.load %arg8[%c9, %c0_16, %c0_17] : memref<10x8x384xf32, #tpu.memory_space<vmem>>, vector<1x8x384xf32>
    %21 = vector.shape_cast %20 : vector<1x8x384xf32> to vector<8x384xf32>
    %22 = vector.shape_cast %15 : vector<8x384xf32> to vector<1x8x384xf32>
    tpu.vector_store %arg8[%c9, %c0_16, %c0_17], %22 {strides = array<i32>} : memref<10x8x384xf32, #tpu.memory_space<vmem>>, vector<1x8x384xf32>,
    %c1 = arith.constant 1 : index
    %c0_18 = arith.constant 0 : index
    %c128 = arith.constant 128 : index
    %23 = vector.load %arg8[%c1, %c0_18, %c128] : memref<10x8x384xf32, #tpu.memory_space<vmem>>, vector<8x8x128xf32>
    tpu.vector_store %arg8[%c1, %c0_18, %c128], %11 {strides = array<i32>} : memref<10x8x384xf32, #tpu.memory_space<vmem>>, vector<8x8x128xf32>,
    %24 = vector.extract_strided_slice %11 {offsets = [0, 0, 0], sizes = [8, 7, 128], strides = [1, 1, 1]} : vector<8x8x128xf32> to vector<8x7x128xf32>
    %c1_19 = arith.constant 1 : index
    %c1_20 = arith.constant 1 : index
    %c0_21 = arith.constant 0 : index
    %25 = vector.load %arg8[%c1_19, %c1_20, %c0_21] : memref<10x8x384xf32, #tpu.memory_space<vmem>>, vector<8x7x128xf32>
    tpu.vector_store %arg8[%c1_19, %c1_20, %c0_21], %24 {strides = array<i32>} : memref<10x8x384xf32, #tpu.memory_space<vmem>>, vector<8x7x128xf32>,
    %c1_22 = arith.constant 1 : index
    %c0_23 = arith.constant 0 : index
    %c0_24 = arith.constant 0 : index
    %26 = vector.load %arg8[%c1_22, %c0_23, %c0_24] : memref<10x8x384xf32, #tpu.memory_space<vmem>>, vector<8x1x128xf32>
    tpu.vector_store %arg8[%c1_22, %c0_23, %c0_24], %16 {strides = array<i32>} : memref<10x8x384xf32, #tpu.memory_space<vmem>>, vector<8x1x128xf32>,
    %27 = vector.extract_strided_slice %11 {offsets = [0, 1, 0], sizes = [8, 7, 128], strides = [1, 1, 1]} : vector<8x8x128xf32> to vector<8x7x128xf32>
    %c1_25 = arith.constant 1 : index
    %c0_26 = arith.constant 0 : index
    %c256 = arith.constant 256 : index
    %28 = vector.load %arg8[%c1_25, %c0_26, %c256] : memref<10x8x384xf32, #tpu.memory_space<vmem>>, vector<8x7x128xf32>
    tpu.vector_store %arg8[%c1_25, %c0_26, %c256], %27 {strides = array<i32>} : memref<10x8x384xf32, #tpu.memory_space<vmem>>, vector<8x7x128xf32>,
    %c1_27 = arith.constant 1 : index
    %c7 = arith.constant 7 : index
    %c256_28 = arith.constant 256 : index
    %29 = vector.load %arg8[%c1_27, %c7, %c256_28] : memref<10x8x384xf32, #tpu.memory_space<vmem>>, vector<8x1x128xf32>
    tpu.vector_store %arg8[%c1_27, %c7, %c256_28], %16 {strides = array<i32>} : memref<10x8x384xf32, #tpu.memory_space<vmem>>, vector<8x1x128xf32>,
    %c0_29 = arith.constant 0 : index
    %c0_30 = arith.constant 0 : index
    %c0_31 = arith.constant 0 : index
    %30 = vector.load %arg8[%c0_29, %c0_30, %c0_31] : memref<10x8x384xf32, #tpu.memory_space<vmem>>, vector<8x8x384xf32>
    %31 = vector.shape_cast %30 : vector<8x8x384xf32> to vector<64x384xf32>
    %c0_32 = arith.constant 0 : index
    %c0_33 = arith.constant 0 : index
    %c0_34 = arith.constant 0 : index
    %32 = vector.load %arg4[%c0_32, %c0_33, %c0_34] : memref<3x384x128xf32, #tpu.memory_space<vmem>>, vector<1x384x128xf32>
    %33 = vector.shape_cast %32 : vector<1x384x128xf32> to vector<384x128xf32>
    %cst_35 = arith.constant dense<0.000000e+00> : vector<64x128xf32>
    %34 = tpu.matmul %31, %33, %cst_35 {dimension_numbers = #tpu.dot_dimension_numbers<[1], [0], [0], [1], [0, 0, 1, 1], [], []>} : vector<64x384xf32>, vector<384x128xf32>, vector<64x128xf32> -> vector<64x128xf32>
    %35 = arith.addf %14, %34 : vector<64x128xf32>
    %c1_36 = arith.constant 1 : index
    %c0_37 = arith.constant 0 : index
    %c0_38 = arith.constant 0 : index
    %36 = vector.load %arg8[%c1_36, %c0_37, %c0_38] : memref<10x8x384xf32, #tpu.memory_space<vmem>>, vector<8x8x384xf32>
    %37 = vector.shape_cast %36 : vector<8x8x384xf32> to vector<64x384xf32>
    %c1_39 = arith.constant 1 : index
    %c0_40 = arith.constant 0 : index
    %c0_41 = arith.constant 0 : index
    %38 = vector.load %arg4[%c1_39, %c0_40, %c0_41] : memref<3x384x128xf32, #tpu.memory_space<vmem>>, vector<1x384x128xf32>
    %39 = vector.shape_cast %38 : vector<1x384x128xf32> to vector<384x128xf32>
    %cst_42 = arith.constant dense<0.000000e+00> : vector<64x128xf32>
    %40 = tpu.matmul %37, %39, %cst_42 {dimension_numbers = #tpu.dot_dimension_numbers<[1], [0], [0], [1], [0, 0, 1, 1], [], []>} : vector<64x384xf32>, vector<384x128xf32>, vector<64x128xf32> -> vector<64x128xf32>
    %41 = arith.addf %35, %40 : vector<64x128xf32>
    %c2 = arith.constant 2 : index
    %c0_43 = arith.constant 0 : index
    %c0_44 = arith.constant 0 : index
    %42 = vector.load %arg8[%c2, %c0_43, %c0_44] : memref<10x8x384xf32, #tpu.memory_space<vmem>>, vector<8x8x384xf32>
    %43 = vector.shape_cast %42 : vector<8x8x384xf32> to vector<64x384xf32>
    %c2_45 = arith.constant 2 : index
    %c0_46 = arith.constant 0 : index
    %c0_47 = arith.constant 0 : index
    %44 = vector.load %arg4[%c2_45, %c0_46, %c0_47] : memref<3x384x128xf32, #tpu.memory_space<vmem>>, vector<1x384x128xf32>
    %45 = vector.shape_cast %44 : vector<1x384x128xf32> to vector<384x128xf32>
    %cst_48 = arith.constant dense<0.000000e+00> : vector<64x128xf32>
    %46 = tpu.matmul %43, %45, %cst_48 {dimension_numbers = #tpu.dot_dimension_numbers<[1], [0], [0], [1], [0, 0, 1, 1], [], []>} : vector<64x384xf32>, vector<384x128xf32>, vector<64x128xf32> -> vector<64x128xf32>
    %47 = arith.addf %41, %46 : vector<64x128xf32>
    %48 = vector.shape_cast %47 : vector<64x128xf32> to vector<8x8x128xf32>
    %c0_49 = arith.constant 0 : index
    %c0_50 = arith.constant 0 : index
    %c0_51 = arith.constant 0 : index
    %c0_52 = arith.constant 0 : index
    %49 = vector.load %arg6[%c0_49, %c0_50, %c0_51, %c0_52] : memref<1x8x8x128xf32, #tpu.memory_space<vmem>>, vector<1x8x8x128xf32>
    %50 = vector.shape_cast %49 : vector<1x8x8x128xf32> to vector<8x8x128xf32>
    %51 = vector.shape_cast %48 : vector<8x8x128xf32> to vector<1x8x8x128xf32>
    tpu.vector_store %arg6[%c0_49, %c0_50, %c0_51, %c0_52], %51 {strides = array<i32>} : memref<1x8x8x128xf32, #tpu.memory_space<vmem>>, vector<1x8x8x128xf32>,
    %cst_53 = arith.constant dense<0.000000e+00> : vector<128xf32>
    %52 = vector.multi_reduction <add>, %47, %cst_53 [0] : vector<64x128xf32> to vector<128xf32>
    %53 = vector.shape_cast %52 : vector<128xf32> to vector<1x128xf32>
    %54 = arith.mulf %47, %47 : vector<64x128xf32>
    %cst_54 = arith.constant dense<0.000000e+00> : vector<128xf32>
    %55 = vector.multi_reduction <add>, %54, %cst_54 [0] : vector<64x128xf32> to vector<128xf32>
    %56 = vector.shape_cast %55 : vector<128xf32> to vector<1x128xf32>
    %57 = tpu.concatenate %53, %56 in 0 : vector<1x128xf32>, vector<1x128xf32> -> vector<2x128xf32>
    %c0_55 = arith.constant 0 : index
    %c0_56 = arith.constant 0 : index
    %c0_57 = arith.constant 0 : index
    %58 = vector.load %arg7[%c0_55, %c0_56, %c0_57] : memref<1x2x128xf32, #tpu.memory_space<vmem>>, vector<1x2x128xf32>
    %59 = vector.shape_cast %58 : vector<1x2x128xf32> to vector<2x128xf32>
    %60 = vector.shape_cast %57 : vector<2x128xf32> to vector<1x2x128xf32>
    tpu.vector_store %arg7[%c0_55, %c0_56, %c0_57], %60 {strides = array<i32>} : memref<1x2x128xf32, #tpu.memory_space<vmem>>, vector<1x2x128xf32>,
    return
  }
  func.func @transform_0(%arg0: i32) -> (i32, i32, i32, i32) {
    %c0_i32 = arith.constant 0 : i32
    %c0_i32_0 = arith.constant 0 : i32
    %c0_i32_1 = arith.constant 0 : i32
    %c0_i32_2 = arith.constant 0 : i32
    return %arg0, %c0_i32, %c0_i32_0, %c0_i32_1 : i32, i32, i32, i32
  }
  func.func @transform_1(%arg0: i32) -> (i32, i32) {
    %c0_i32 = arith.constant 0 : i32
    %c0_i32_0 = arith.constant 0 : i32
    %c0_i32_1 = arith.constant 0 : i32
    return %c0_i32, %c0_i32_0 : i32, i32
  }
  func.func @transform_2(%arg0: i32) -> (i32, i32) {
    %c0_i32 = arith.constant 0 : i32
    %c0_i32_0 = arith.constant 0 : i32
    %c0_i32_1 = arith.constant 0 : i32
    return %c0_i32, %c0_i32_0 : i32, i32
  }
  func.func @transform_3(%arg0: i32) -> (i32, i32, i32) {
    %c0_i32 = arith.constant 0 : i32
    %c0_i32_0 = arith.constant 0 : i32
    %c0_i32_1 = arith.constant 0 : i32
    %c0_i32_2 = arith.constant 0 : i32
    return %c0_i32, %c0_i32_0, %c0_i32_1 : i32, i32, i32
  }
  func.func @transform_4(%arg0: i32) -> (i32, i32, i32, i32) {
    %c0_i32 = arith.constant 0 : i32
    %c0_i32_0 = arith.constant 0 : i32
    %c0_i32_1 = arith.constant 0 : i32
    %c0_i32_2 = arith.constant 0 : i32
    return %arg0, %c0_i32, %c0_i32_0, %c0_i32_1 : i32, i32, i32, i32
  }
  func.func @transform_5(%arg0: i32) -> (i32, i32, i32, i32) {
    %c0_i32 = arith.constant 0 : i32
    %c0_i32_0 = arith.constant 0 : i32
    %c0_i32_1 = arith.constant 0 : i32
    %c0_i32_2 = arith.constant 0 : i32
    return %arg0, %c0_i32, %c0_i32_0, %c0_i32_1 : i32, i32, i32, i32
  }
  func.func @transform_6(%arg0: i32) -> (i32, i32, i32) {
    %c0_i32 = arith.constant 0 : i32
    %c0_i32_0 = arith.constant 0 : i32
    %c0_i32_1 = arith.constant 0 : i32
    return %arg0, %c0_i32, %c0_i32_0 : i32, i32, i32
  }
}

</mosaic_0001>

<bundles_post_ra>
// kernel: network_block_forward.5
= control target key start
LH: loop header
LB: loop body
LE: loop exit
PB: predicated region body
PF: predicated region fallthrough
CT: control target
= control target key end

     0   :  { %s346_s6 = smov 0   ;;  %s401_s0 = inlined_call_operand.vmem [shape: f32[2,16,16,128], index: 0, kind: input, shape index: {}]   ;;  %s402_s1 = inlined_call_operand.vmem [shape: f32[2,2,128], index: 1, kind: output, shape index: {}]  }
   0x1 LB: > { %s309_s7 = sadd.s32 4294967295, %s334_s6   ;;  %p313_p0 = scmp.ge.s32.totalorder %s334_s6, 1  ;;  %s334_s6 = sphi %s346_s6, %s11_s6  }
   0x2   : > { %p87_p1 = scmp.lt.s32.totalorder %s334_s6, 3 }
   0x4   : > { %p88_p2 = pnand %p313_p0, %p87_p1 }
   0x5   : > { %p106_p3 = scmp.lt.s32.totalorder (!%p88_p2), %s309_s7, 1  ;;  %vm253_vm0 = vcmask (!%p88_p2), 1040384  }
   0x6   : > { %91 = sbr.rel (%p88_p2) target bundleno = 95 (0x5f), region = 24 }
   0xd   : > { %s404_s7 = smov (!%p106_p3, %s309_s7), 1 }
   0xe   : > { %s319_s8 = sshll.u32 %s404_s7, 8  ;;  %s316_s12 = sshll.u32 %s404_s7, 1 }
   0xf   : > { %s360_s11 = scalar_lea.vmem %s401_s0, %s319_s8  ;;  %s114_s15 = scalar_lea.vmem %s402_s1, %s316_s12 }
  0x10   : > { %v115_v0 = vld [vmem:[%s360_s11] sm:$0xff]  ;;  %v116_v1 = vld [vmem:[%s360_s11 + $0x8] sm:$0xff]  ;;  %v117_v2 = vld [vmem:[%s360_s11 + $0x10] sm:$0xff] }
  0x11   : > { %v118_v3 = vld [vmem:[%s360_s11 + $0x18] sm:$0xff]  ;;  %v147_v4 = vadd.f32 %v116_v1, %v115_v0  ;;  %v184_v5 = vmul.f32 %v115_v0, %v115_v0  ;;  %v185_v6 = vmul.f32 %v116_v1, %v116_v1  ;;  %v186_v7 = vmul.f32 %v117_v2, %v117_v2  ;;  %v119_v8 = vld [vmem:[%s360_s11 + $0x20] sm:$0xff]  ;;  %v120_v12 = vld [vmem:[%s360_s11 + $0x28] sm:$0xff] }
  0x12   : > { %v187_v10 = vmul.f32 %v118_v3, %v118_v3  ;;  %v188_v14 = vmul.f32 %v119_v8, %v119_v8  ;;  %v121_v16 = vld [vmem:[%s360_s11 + $0x30] sm:$0xff]  ;;  %v189_v18 = vmul.f32 %v120_v12, %v120_v12  ;;  %v122_v20 = vld [vmem:[%s360_s11 + $0x38] sm:$0xff]  ;;  %v123_v24 = vld [vmem:[%s360_s11 + $0x40] sm:$0xff] }
  0x13   : > { %v148_v9 = vadd.f32 %v147_v4, %v117_v2  ;;  %v216_v11 = vadd.f32 %v185_v6, %v184_v5  ;;  %v190_v22 = vmul.f32 %v121_v16, %v121_v16  ;;  %v191_v26 = vmul.f32 %v122_v20, %v122_v20  ;;  %v124_v28 = vld [vmem:[%s360_s11 + $0x48] sm:$0xff]  ;;  %v125_v32 = vld [vmem:[%s360_s11 + $0x50] sm:$0xff]  ;;  %v126_v36 = vld [vmem:[%s360_s11 + $0x58] sm:$0xff] }
  0x14   : > { %v192_v30 = vmul.f32 %v123_v24, %v123_v24  ;;  %v193_v34 = vmul.f32 %v124_v28, %v124_v28  ;;  %v194_v38 = vmul.f32 %v125_v32, %v125_v32  ;;  %v127_v40 = vld [vmem:[%s360_s11 + $0x60] sm:$0xff]  ;;  %v195_v42 = vmul.f32 %v126_v36, %v126_v36  ;;  %v128_v44 = vld [vmem:[%s360_s11 + $0x68] sm:$0xff]  ;;  %v129_v48 = vld [vmem:[%s360_s11 + $0x70] sm:$0xff] }
  0x15   : > { %v149_v13 = vadd.f32 %v148_v9, %v118_v3  ;;  %v217_v15 = vadd.f32 %v216_v11, %v186_v7  ;;  %v196_v46 = vmul.f32 %v127_v40, %v127_v40  ;;  %v197_v50 = vmul.f32 %v128_v44, %v128_v44  ;;  %v130_v52 = vld [vmem:[%s360_s11 + $0x78] sm:$0xff]  ;;  %v131_v56 = vld [vmem:[%s360_s11 + $0x80] sm:$0xff]  ;;  %v132_v60 = vld [vmem:[%s360_s11 + $0x88] sm:$0xff] }
  0x16   : > { %v198_v54 = vmul.f32 %v129_v48, %v129_v48  ;;  %v199_v58 = vmul.f32 %v130_v52, %v130_v52  ;;  %v200_v62 = vmul.f32 %v131_v56, %v131_v56  ;;  %v133_v0 = vld [vmem:[%s360_s11 + $0x90] sm:$0xff]  ;;  %v201_v2 = vmul.f32 %v132_v60, %v132_v60  ;;  %v134_v4 = vld [vmem:[%s360_s11 + $0x98] sm:$0xff] }
  0x17   : > { %v150_v17 = vadd.f32 %v149_v13, %v119_v8  ;;  %v218_v19 = vadd.f32 %v217_v15, %v187_v10  ;;  %v202_v6 = vmul.f32 %v133_v0, %v133_v0  ;;  %v135_v8 = vld [vmem:[%s360_s11 + $0xa0] sm:$0xff]  ;;  %v203_v10 = vmul.f32 %v134_v4, %v134_v4 }
  0x19   : > { %v151_v21 = vadd.f32 %v150_v17, %v120_v12  ;;  %v219_v23 = vadd.f32 %v218_v19, %v188_v14  ;;  %v136_v12 = vld [vmem:[%s360_s11 + $0xa8] sm:$0xff]  ;;  %v204_v14 = vmul.f32 %v135_v8, %v135_v8 }
  0x1b   : > { %v152_v25 = vadd.f32 %v151_v21, %v121_v16  ;;  %v220_v27 = vadd.f32 %v219_v23, %v189_v18  ;;  %v137_v16 = vld [vmem:[%s360_s11 + $0xb0] sm:$0xff]  ;;  %v205_v18 = vmul.f32 %v136_v12, %v136_v12 }
  0x1d   : > { %v153_v29 = vadd.f32 %v152_v25, %v122_v20  ;;  %v221_v31 = vadd.f32 %v220_v27, %v190_v22  ;;  %v138_v20 = vld [vmem:[%s360_s11 + $0xb8] sm:$0xff]  ;;  %v206_v22 = vmul.f32 %v137_v16, %v137_v16 }
  0x1f   : > { %v154_v33 = vadd.f32 %v153_v29, %v123_v24  ;;  %v222_v35 = vadd.f32 %v221_v31, %v191_v26  ;;  %v139_v24 = vld [vmem:[%s360_s11 + $0xc0] sm:$0xff]  ;;  %v207_v26 = vmul.f32 %v138_v20, %v138_v20 }
  0x21   : > { %v155_v37 = vadd.f32 %v154_v33, %v124_v28  ;;  %v223_v39 = vadd.f32 %v222_v35, %v192_v30  ;;  %v140_v28 = vld [vmem:[%s360_s11 + $0xc8] sm:$0xff]  ;;  %v208_v30 = vmul.f32 %v139_v24, %v139_v24 }
  0x23   : > { %v156_v41 = vadd.f32 %v155_v37, %v125_v32  ;;  %v224_v43 = vadd.f32 %v223_v39, %v193_v34  ;;  %v141_v32 = vld [vmem:[%s360_s11 + $0xd0] sm:$0xff]  ;;  %v209_v34 = vmul.f32 %v140_v28, %v140_v28 }
  0x25   : > { %v157_v45 = vadd.f32 %v156_v41, %v126_v36  ;;  %v225_v47 = vadd.f32 %v224_v43, %v194_v38  ;;  %v142_v36 = vld [vmem:[%s360_s11 + $0xd8] sm:$0xff]  ;;  %v210_v38 = vmul.f32 %v141_v32, %v141_v32 }
  0x27   : > { %v158_v49 = vadd.f32 %v157_v45, %v127_v40  ;;  %v226_v51 = vadd.f32 %v225_v47, %v195_v42  ;;  %v143_v40 = vld [vmem:[%s360_s11 + $0xe0] sm:$0xff]  ;;  %v211_v42 = vmul.f32 %v142_v36, %v142_v36 }
  0x29   : > { %v159_v53 = vadd.f32 %v158_v49, %v128_v44  ;;  %v227_v55 = vadd.f32 %v226_v51, %v196_v46  ;;  %v144_v44 = vld [vmem:[%s360_s11 + $0xe8] sm:$0xff]  ;;  %v212_v46 = vmul.f32 %v143_v40, %v143_v40 }
  0x2b   : > { %v160_v57 = vadd.f32 %v159_v53, %v129_v48  ;;  %v228_v59 = vadd.f32 %v227_v55, %v197_v50  ;;  %v145_v48 = vld [vmem:[%s360_s11 + $0xf0] sm:$0xff]  ;;  %v213_v50 = vmul.f32 %v144_v44, %v144_v44 }
  0x2d   : > { %v161_v61 = vadd.f32 %v160_v57, %v130_v52  ;;  %v229_v63 = vadd.f32 %v228_v59, %v198_v54  ;;  %v146_v52 = vld [vmem:[%s360_s11 + $0xf8] sm:$0xff]  ;;  %v214_v54 = vmul.f32 %v145_v48, %v145_v48 }
  0x2e   : > { %v215_v57 = vmul.f32 %v146_v52, %v146_v52 }
  0x2f   : > { %v162_v1 = vadd.f32 %v161_v61, %v131_v56  ;;  %v230_v3 = vadd.f32 %v229_v63, %v199_v58 }
  0x31   : > { %v163_v5 = vadd.f32 %v162_v1, %v132_v60  ;;  %v231_v7 = vadd.f32 %v230_v3, %v200_v62 }
  0x33   : > { %v164_v9 = vadd.f32 %v163_v5, %v133_v0  ;;  %v232_v11 = vadd.f32 %v231_v7, %v201_v2 }
  0x35   : > { %v165_v13 = vadd.f32 %v164_v9, %v134_v4  ;;  %v233_v15 = vadd.f32 %v232_v11, %v202_v6 }
  0x37   : > { %v166_v17 = vadd.f32 %v165_v13, %v135_v8  ;;  %v234_v19 = vadd.f32 %v233_v15, %v203_v10 }
  0x39   : > { %v167_v21 = vadd.f32 %v166_v17, %v136_v12  ;;  %v235_v23 = vadd.f32 %v234_v19, %v204_v14 }
  0x3b   : > { %v168_v25 = vadd.f32 %v167_v21, %v137_v16  ;;  %v236_v27 = vadd.f32 %v235_v23, %v205_v18 }
  0x3d   : > { %v169_v29 = vadd.f32 %v168_v25, %v138_v20  ;;  %v237_v31 = vadd.f32 %v236_v27, %v206_v22 }
  0x3f   : > { %v170_v33 = vadd.f32 %v169_v29, %v139_v24  ;;  %v238_v35 = vadd.f32 %v237_v31, %v207_v26 }
  0x41   : > { %v171_v37 = vadd.f32 %v170_v33, %v140_v28  ;;  %v239_v39 = vadd.f32 %v238_v35, %v208_v30 }
  0x43   : > { %v172_v41 = vadd.f32 %v171_v37, %v141_v32  ;;  %v240_v43 = vadd.f32 %v239_v39, %v209_v34 }
  0x45   : > { %v173_v45 = vadd.f32 %v172_v41, %v142_v36  ;;  %v241_v47 = vadd.f32 %v240_v43, %v210_v38 }
  0x47   : > { %v174_v49 = vadd.f32 %v173_v45, %v143_v40  ;;  %v242_v51 = vadd.f32 %v241_v47, %v211_v42 }
  0x49   : > { %v175_v53 = vadd.f32 %v174_v49, %v144_v44  ;;  %v243_v55 = vadd.f32 %v242_v51, %v212_v46 }
  0x4b   : > { %v176_v56 = vadd.f32 %v175_v53, %v145_v48  ;;  %v244_v58 = vadd.f32 %v243_v55, %v213_v50 }
  0x4d   : > { %v177_v59 = vadd.f32 %v176_v56, %v146_v52  ;;  %v245_v60 = vadd.f32 %v244_v58, %v214_v54 }
  0x4f   : > { %v178_v61 = vrot.slane %v177_v59, 4  ;;  %v246_v62 = vadd.f32 %v245_v60, %v215_v57 }
  0x51   : > { %v179_v63 = vadd.f32 %v178_v61, %v177_v59  ;;  %v247_v0 = vrot.slane %v246_v62, 4 }
  0x53   : > { %v180_v1 = vrot.slane %v179_v63, 2  ;;  %v248_v2 = vadd.f32 %v247_v0, %v246_v62 }
  0x55   : > { %v181_v3 = vadd.f32 %v180_v1, %v179_v63  ;;  %v249_v4 = vrot.slane %v248_v2, 2 }
  0x57   : > { %v182_v5 = vrot.slane %v181_v3, 1  ;;  %v250_v6 = vadd.f32 %v249_v4, %v248_v2 }
  0x59   : > { %v183_v7 = vadd.f32 %v182_v5, %v181_v3  ;;  %v251_v8 = vrot.slane %v250_v6, 1 }
  0x5b   : > { %v252_v9 = vadd.f32 %v251_v8, %v250_v6 }
  0x5d   : > { %v254_v10 = vsel %vm253_vm0, %v183_v7, %v252_v9 }
  0x5e   : > { %255 = vst [vmem:[%s114_s15] sm:$0x3] %v254_v10 }
  0x5f PF: > { %s11_s6 = sadd.s32 1, %s334_s6  }
  0x60   : > { %p8_p4 = scmp.ge.s32.totalorder %s11_s6, 4  }
  0x62   :  { %10 = sbr.rel (!%p8_p4) target bundleno = 1 (0x1), region = 54 }

// kernel: network_block_forward.6
= control target key start
LH: loop header
LB: loop body
LE: loop exit
PB: predicated region body
PF: predicated region fallthrough
CT: control target
= control target key end

     0   :  { %s2635_s24 = smov 0   ;;  %s3570_s0 = inlined_call_operand.vmem [shape: f32[2,8,8,512], index: 0, kind: input, shape index: {}]   ;;  %s3571_s1 = inlined_call_operand.vmem [shape: f32[1,512], index: 1, kind: input, shape index: {}]   ;;  %s3572_s2 = inlined_call_operand.vmem [shape: f32[1,512], index: 2, kind: input, shape index: {}]   ;;  %s3573_s3 = inlined_call_operand.vmem [shape: f32[3,384,128], index: 3, kind: input, shape index: {}]   ;;  %s3574_s4 = inlined_call_operand.vmem [shape: f32[128,128], index: 4, kind: input, shape index: {}]   ;;  %s3575_s5 = inlined_call_operand.vmem [shape: f32[2,8,8,128], index: 5, kind: output, shape index: {0}]   ;;  %s3576_s6 = inlined_call_operand.vmem [shape: f32[2,2,128], index: 6, kind: output, shape index: {1}]   ;;  %s3577_s7 = inlined_call_operand.vmem [shape: f32[2,8,8,128], index: 7, kind: output, shape index: {2}]  }
   0x1 LB: > { %s1743_s25 = sadd.s32 4294967295, %s2592_s24   ;;  %p1747_p0 = scmp.ge.s32.totalorder %s2592_s24, 1  ;;  %s2592_s24 = sphi %s2635_s24, %s18_s24  }
   0x2   : > { %p242_p1 = scmp.lt.s32.totalorder %s2592_s24, 3 }
   0x4   : > { %p243_p2 = pnand %p1747_p0, %p242_p1 }
   0x5   : > { %v474_v0 = vld [vmem:[%s3574_s4] sm:$0xff] (!%p243_p2)  ;;  %v475_v1 = vld [vmem:[%s3574_s4 + $0x8] sm:$0xff] (!%p243_p2)  ;;  %v2594_v7 = vmov (!%p243_p2), 0.0   ;;  %v476_v10 = vld [vmem:[%s3574_s4 + $0x10] sm:$0xff] (!%p243_p2)  ;;  %p2698_p3 = scmp.lt.s32.totalorder (!%p243_p2), %s1743_s25, 1  ;;  %v336_v25 = vlaneseq (!%p243_p2)  ;;  %vm1621_vm0 = vcmask (!%p243_p2), 1040384  }
   0x6   : > { %246 = sbr.rel (%p243_p2) target bundleno = 383 (0x17f), region = 40  ;;  %v1771_v2 = vld [vmem:[%s3573_s3 + $0x200] sm:$0xff] (!%p243_p2)  ;;  %v2296_v3 = vpack.c.bf16 (!%p243_p2), %v475_v1, %v474_v0  ;;  %v1772_v4 = vld [vmem:[%s3573_s3 + $0x208] sm:$0xff] (!%p243_p2)  ;;  %603 = vst [vmem:[#allocation2] sm:$0xff] (!%p243_p2), %v2594_v7  ;;  %639 = vst [vmem:[#allocation2 + $0x18] sm:$0x1] (!%p243_p2), %v2594_v7 }
   0x7   : > { %v1755_v5 = vld [vmem:[%s3573_s3 + $0x180] sm:$0xff] (!%p243_p2)  ;;  %v1756_v6 = vld [vmem:[%s3573_s3 + $0x188] sm:$0xff] (!%p243_p2)  ;;  %640 = vst [vmem:[#allocation2 + $0x30] sm:$0x1] (!%p243_p2), %v2594_v7  ;;  %641 = vst [vmem:[#allocation2 + $0x48] sm:$0x1] (!%p243_p2), %v2594_v7  ;;  %v2328_v8 = vpack.c.bf16 (!%p243_p2), %v1772_v4, %v1771_v2 }
   0x8   : > { %642 = vst [vmem:[#allocation2 + $0x60] sm:$0x1] (!%p243_p2), %v2594_v7  ;;  %643 = vst [vmem:[#allocation2 + $0x78] sm:$0x1] (!%p243_p2), %v2594_v7  ;;  %v2330_v9 = vpack.c.bf16 (!%p243_p2), %v1756_v6, %v1755_v5  ;;  %v477_v11 = vld [vmem:[%s3574_s4 + $0x18] sm:$0xff] (!%p243_p2)  ;;  %v1773_v12 = vld [vmem:[%s3573_s3 + $0x210] sm:$0xff] (!%p243_p2)  ;;  %2297 = vmatprep.subr.bf16.mxu0 (!%p243_p2), %v2296_v3 }
   0x9   : > { %644 = vst [vmem:[#allocation2 + $0x90] sm:$0x1] (!%p243_p2), %v2594_v7  ;;  %645 = vst [vmem:[#allocation2 + $0xa8] sm:$0x1] (!%p243_p2), %v2594_v7  ;;  %v2300_v13 = vpack.c.bf16 (!%p243_p2), %v477_v11, %v476_v10  ;;  %v1774_v14 = vld [vmem:[%s3573_s3 + $0x218] sm:$0xff] (!%p243_p2)  ;;  %v1757_v15 = vld [vmem:[%s3573_s3 + $0x190] sm:$0xff] (!%p243_p2)  ;;  %2329 = vmatprep.subr.bf16.mxu1 (!%p243_p2), %v2328_v8  ;;  %2299 = vmatpush3.bf16.msra.mxu0 (!%p243_p2), %v2296_v3 }
   0xa   : > { %646 = vst [vmem:[#allocation2 + $0xc0] sm:$0x1] (!%p243_p2), %v2594_v7  ;;  %699 = vst [vmem:[#allocation3 + $0x18] sm:$0x1] (!%p243_p2), %v2594_v7  ;;  %v1758_v16 = vld [vmem:[%s3573_s3 + $0x198] sm:$0xff] (!%p243_p2)  ;;  %v2332_v17 = vpack.c.bf16 (!%p243_p2), %v1774_v14, %v1773_v12  ;;  %v478_v18 = vld [vmem:[%s3574_s4 + $0x20] sm:$0xff] (!%p243_p2)  ;;  %2331 = vmatpush3.bf16.msra.mxu1 (!%p243_p2), %v2330_v9 }
   0xb   : > { %700 = vst [vmem:[#allocation3 + $0x30] sm:$0x1] (!%p243_p2), %v2594_v7  ;;  %701 = vst [vmem:[#allocation3 + $0x48] sm:$0x1] (!%p243_p2), %v2594_v7  ;;  %v479_v19 = vld [vmem:[%s3574_s4 + $0x28] sm:$0xff] (!%p243_p2)  ;;  %v1775_v20 = vld [vmem:[%s3573_s3 + $0x220] sm:$0xff] (!%p243_p2)  ;;  %2301 = vmatprep.subr.bf16.mxu0 (!%p243_p2), %v2300_v13  ;;  %v2334_v21 = vpack.c.bf16 (!%p243_p2), %v1758_v16, %v1757_v15 }
   0xc   : > { %702 = vst [vmem:[#allocation3 + $0x60] sm:$0x1] (!%p243_p2), %v2594_v7  ;;  %703 = vst [vmem:[#allocation3 + $0x78] sm:$0x1] (!%p243_p2), %v2594_v7  ;;  %v2304_v22 = vpack.c.bf16 (!%p243_p2), %v479_v19, %v478_v18  ;;  %v1776_v23 = vld [vmem:[%s3573_s3 + $0x228] sm:$0xff] (!%p243_p2)  ;;  %v1759_v24 = vld [vmem:[%s3573_s3 + $0x1a0] sm:$0xff] (!%p243_p2)  ;;  %2333 = vmatprep.subr.bf16.mxu1 (!%p243_p2), %v2332_v17 }
   0xd   : > { %704 = vst [vmem:[#allocation3 + $0x90] sm:$0x1] %v2594_v7  ;;  %705 = vst [vmem:[#allocation3 + $0xa8] sm:$0x1] %v2594_v7  ;;  %v2336_v26 = vpack.c.bf16 %v1776_v23, %v1775_v20  ;;  %v1760_v27 = vld [vmem:[%s3573_s3 + $0x1a8] sm:$0xff]  ;;  %v480_v28 = vld [vmem:[%s3574_s4 + $0x30] sm:$0xff]  ;;  %2303 = vmatpush3.bf16.msra.mxu0 %v2300_v13 }
   0xe   : > { %706 = vst [vmem:[#allocation3 + $0xc0] sm:$0x1] %v2594_v7  ;;  %v481_v29 = vld [vmem:[%s3574_s4 + $0x38] sm:$0xff]  ;;  %v1777_v30 = vld [vmem:[%s3573_s3 + $0x230] sm:$0xff]  ;;  %s3580_s25 = smov (!%p2698_p3, %s1743_s25), 1  ;;  %2335 = vmatpush3.bf16.msra.mxu1 %v2334_v21  ;;  %2305 = vmatprep.subr.bf16.mxu0 %v2304_v22  ;;  %v2338_v32 = vpack.c.bf16 %v1760_v27, %v1759_v24  ;;  %v2741_v35 = vshrl.u32 %v336_v25, 7 }
   0xf   : > { %v1778_v31 = vld [vmem:[%s3573_s3 + $0x238] sm:$0xff]  ;;  %v2308_v33 = vpack.c.bf16 %v481_v29, %v480_v28  ;;  %v1761_v34 = vld [vmem:[%s3573_s3 + $0x1b0] sm:$0xff]  ;;  %2337 = vmatprep.subr.bf16.mxu1 %v2336_v26  ;;  %v482_v38 = vld [vmem:[%s3574_s4 + $0x40] sm:$0xff]  ;;  %s1853_s18 = sshll.u32 %s3580_s25, 8  ;;  %s1854_s26 = sshll.u32 %s3580_s25, 6 }
  0x10   : > { %v2340_v36 = vpack.c.bf16 %v1778_v31, %v1777_v30  ;;  %v1762_v37 = vld [vmem:[%s3573_s3 + $0x1b8] sm:$0xff]  ;;  %v483_v39 = vld [vmem:[%s3574_s4 + $0x48] sm:$0xff]  ;;  %v1779_v40 = vld [vmem:[%s3573_s3 + $0x240] sm:$0xff]  ;;  %v338_v47 = vsub.s32 0, %v2741_v35  ;;  %v342_v48 = vsub.s32 1, %v2741_v35  ;;  %s2782_s12 = scalar_lea.vmem %s3570_s0, %s1853_s18  ;;  %s3538_s30 = scalar_lea.vmem %s3577_s7, %s1854_s26 }
  0x11   : > { %v1780_v41 = vld [vmem:[%s3573_s3 + $0x248] sm:$0xff]  ;;  %2307 = vmatpush3.bf16.msra.mxu0 %v2304_v22  ;;  %v2342_v42 = vpack.c.bf16 %v1762_v37, %v1761_v34  ;;  %v2312_v43 = vpack.c.bf16 %v483_v39, %v482_v38  ;;  %v1763_v44 = vld [vmem:[%s3573_s3 + $0x1c0] sm:$0xff]  ;;  %v484_v46 = vld [vmem:[%s3574_s4 + $0x50] sm:$0xff]  ;;  %s3553_s10 = scalar_lea.vmem %s3575_s5, %s1854_s26  ;;  %s1752_s29 = sshll.u32 %s3580_s25, 1 }
  0x12   : > { %2339 = vmatpush3.bf16.msra.mxu1 %v2338_v32  ;;  %2309 = vmatprep.subr.bf16.mxu0 %v2308_v33  ;;  %v1764_v45 = vld [vmem:[%s3573_s3 + $0x1c8] sm:$0xff]  ;;  %v2344_v49 = vpack.c.bf16 %v1780_v41, %v1779_v40  ;;  %v485_v50 = vld [vmem:[%s3574_s4 + $0x58] sm:$0xff]  ;;  %v1781_v51 = vld [vmem:[%s3573_s3 + $0x250] sm:$0xff]  ;;  %s296_s13 = scalar_lea.vmem %s3576_s6, %s1752_s29 }
  0x13   : > { %2341 = vmatprep.subr.bf16.mxu1 %v2340_v36  ;;  %v1782_v52 = vld [vmem:[%s3573_s3 + $0x258] sm:$0xff]  ;;  %v1765_v53 = vld [vmem:[%s3573_s3 + $0x1d0] sm:$0xff]  ;;  %v486_v55 = vld [vmem:[%s3574_s4 + $0x60] sm:$0xff]  ;;  %v2346_v56 = vpack.c.bf16 %v1764_v45, %v1763_v44  ;;  %v2316_v60 = vpack.c.bf16 %v485_v50, %v484_v46 }
  0x14   : > { %v1766_v54 = vld [vmem:[%s3573_s3 + $0x1d8] sm:$0xff]  ;;  %v302_v57 = vld [vmem:[%s2782_s12] sm:$0xff]  ;;  %v487_v61 = vld [vmem:[%s3574_s4 + $0x68] sm:$0xff]  ;;  %v2348_v2 = vpack.c.bf16 %v1782_v52, %v1781_v51 }
  0x15   : > { %2311 = vmatpush3.bf16.msra.mxu0 %v2308_v33  ;;  %v2797_v58 = vld [vmem:[%s3571_s1] sm:$0xf]  ;;  %v303_v1 = vld [vmem:[%s2782_s12 + $0x8] sm:$0xff]  ;;  %v2350_v12 = vpack.c.bf16 %v1766_v54, %v1765_v53  ;;  %v2320_v13 = vpack.c.bf16 %v487_v61, %v486_v55  ;;  %v488_v17 = vld [vmem:[%s3574_s4 + $0x70] sm:$0xff] }
  0x16   : > { %v2802_v59 = vld [vmem:[%s3572_s2] sm:$0xf]  ;;  %2343 = vmatpush3.bf16.msra.mxu1 %v2342_v42  ;;  %2313 = vmatprep.subr.bf16.mxu0 %v2312_v43  ;;  %v2808_v62 = vrot.slane %v2797_v58, %v338_v47  ;;  %v2811_v63 = vrot.slane %v2797_v58, %v342_v48  ;;  %v1784_v6 = vld [vmem:[%s3573_s3 + $0x268] sm:$0xff]  ;;  %v489_v22 = vld [vmem:[%s3574_s4 + $0x78] sm:$0xff] }
  0x17   : > { %v306_v0 = vld [vmem:[%s2782_s12 + $0x20] sm:$0xff]  ;;  %2345 = vmatprep.subr.bf16.mxu1 %v2344_v49  ;;  %v2816_v3 = vrot.slane %v2802_v59, %v338_v47  ;;  %v2819_v4 = vrot.slane %v2802_v59, %v342_v48  ;;  %v307_v11 = vld [vmem:[%s2782_s12 + $0x28] sm:$0xff]  ;;  %v1785_v26 = vld [vmem:[%s3573_s3 + $0x270] sm:$0xff]  ;;  %v2324_v37 = vpack.c.bf16 %v489_v22, %v488_v17 }
  0x18   : > { %v1783_v5 = vld [vmem:[%s3573_s3 + $0x260] sm:$0xff]  ;;  %v356_v8 = vmul.f32 %v2808_v62, %v302_v57  ;;  %v360_v9 = vmul.f32 %v2808_v62, %v306_v0  ;;  %v357_v10 = vmul.f32 %v2811_v63, %v303_v1  ;;  %v361_v14 = vmul.f32 %v2811_v63, %v307_v11  ;;  %v1768_v16 = vld [vmem:[%s3573_s3 + $0x1e8] sm:$0xff]  ;;  %v1786_v27 = vld [vmem:[%s3573_s3 + $0x278] sm:$0xff] }
  0x19   : > { %2315 = vmatpush3.bf16.msra.mxu0 %v2312_v43  ;;  %v1767_v15 = vld [vmem:[%s3573_s3 + $0x1e0] sm:$0xff]  ;;  %v2352_v21 = vpack.c.bf16 %v1784_v6, %v1783_v5  ;;  %v311_v25 = vld [vmem:[%s2782_s12 + $0x48] sm:$0xff]  ;;  %v1769_v38 = vld [vmem:[%s3573_s3 + $0x1f0] sm:$0xff]  ;;  %v2356_v44 = vpack.c.bf16 %v1786_v27, %v1785_v26 }
  0x1a   : > { %2347 = vmatpush3.bf16.msra.mxu1 %v2346_v56  ;;  %2317 = vmatprep.subr.bf16.mxu0 %v2316_v60  ;;  %v410_v18 = vadd.f32 %v2816_v3, %v356_v8  ;;  %v2843_v19 = vadd.f32 %v2816_v3, %v360_v9  ;;  %v2846_v20 = vadd.f32 %v2819_v4, %v357_v10  ;;  %v310_v24 = vld [vmem:[%s2782_s12 + $0x40] sm:$0xff]  ;;  %v1770_v39 = vld [vmem:[%s3573_s3 + $0x1f8] sm:$0xff]  ;;  %v315_v43 = vld [vmem:[%s2782_s12 + $0x68] sm:$0xff] }
  0x1b   : > { %2349 = vmatprep.subr.bf16.mxu1 %v2348_v2  ;;  %v2852_v23 = vadd.f32 %v2819_v4, %v361_v14  ;;  %v364_v31 = vmul.f32 %v2808_v62, %v310_v24  ;;  %v2354_v32 = vpack.c.bf16 %v1768_v16, %v1767_v15  ;;  %v365_v34 = vmul.f32 %v2811_v63, %v311_v25  ;;  %v314_v36 = vld [vmem:[%s2782_s12 + $0x60] sm:$0xff]  ;;  %v1788_v46 = vld [vmem:[%s3573_s3 + $0x288] sm:$0xff]  ;;  %v1789_v9 = vld [vmem:[%s3573_s3 + $0x290] sm:$0xff] }
  0x1c   : > { %v442_v28 = vmax.f32 %v410_v18, 0.0  ;;  %v446_v29 = vmax.f32 %v2843_v19, 0.0  ;;  %v443_v30 = vmax.f32 %v2846_v20, 0.0  ;;  %v368_v42 = vmul.f32 %v2808_v62, %v314_v36  ;;  %v1787_v45 = vld [vmem:[%s3573_s3 + $0x280] sm:$0xff]  ;;  %v764_v51 = vld [vmem:[%s3573_s3 + $0x88] sm:$0xff]  ;;  %v1790_v16 = vld [vmem:[%s3573_s3 + $0x298] sm:$0xff] }
  0x1d   : > { %2319 = vmatpush3.bf16.msra.mxu0 %v2316_v60  ;;  %v447_v33 = vmax.f32 %v2852_v23, 0.0  ;;  %v2877_v41 = vadd.f32 %v2816_v3, %v364_v31  ;;  %v763_v47 = vld [vmem:[%s3573_s3 + $0x80] sm:$0xff]  ;;  %v2893_v49 = vadd.f32 %v2819_v4, %v365_v34  ;;  %v369_v50 = vmul.f32 %v2811_v63, %v315_v43  ;;  %v319_v55 = vld [vmem:[%s2782_s12 + $0x88] sm:$0xff]  ;;  %v765_v17 = vld [vmem:[%s3573_s3 + $0x90] sm:$0xff] }
  0x1e   : > { %2351 = vmatpush3.bf16.msra.mxu1 %v2350_v12  ;;  %2321 = vmatprep.subr.bf16.mxu0 %v2320_v13  ;;  %v614_v40 = vrot.slane %v443_v30, 7  ;;  %v2901_v53 = vadd.f32 %v2816_v3, %v368_v42  ;;  %v318_v54 = vld [vmem:[%s2782_s12 + $0x80] sm:$0xff]  ;;  %v2358_v61 = vpack.c.bf16 %v1770_v39, %v1769_v38  ;;  %v2360_v0 = vpack.c.bf16 %v1788_v46, %v1787_v45  ;;  %v748_v2 = vld [vmem:[%s3573_s3 + $0x8] sm:$0xff]  ;;  %v766_v18 = vld [vmem:[%s3573_s3 + $0x98] sm:$0xff] }
  0x1f   : > { %2353 = vmatprep.subr.bf16.mxu1 %v2352_v21  ;;  %2152 = vmatprep.mubr.f32.mxu0 %v442_v28  ;;  %v615_v48 = vrot.slane %v447_v33, 7  ;;  %v450_v52 = vmax.f32 %v2877_v41, 0.0  ;;  %v451_v56 = vmax.f32 %v2893_v49, 0.0  ;;  %v2907_v57 = vadd.f32 %v2819_v4, %v369_v50  ;;  %v747_v1 = vld [vmem:[%s3573_s3] sm:$0xff]  ;;  %v323_v14 = vld [vmem:[%s2782_s12 + $0xa8] sm:$0xff]  ;;  %v750_v43 = vld [vmem:[%s3573_s3 + $0x18] sm:$0xff] }
  0x20   : > { %932 = vmatprep.mubr.f32.mxu1 %v442_v28  ;;  %631 = vst [vmem:[#allocation2 + $0x18] sm:$0xfe] %v614_v40  ;;  %v372_v60 = vmul.f32 %v2808_v62, %v318_v54  ;;  %v454_v5 = vmax.f32 %v2901_v53, 0.0  ;;  %v373_v6 = vmul.f32 %v2811_v63, %v319_v55  ;;  %v2392_v8 = vpack.c.bf16 %v764_v51, %v763_v47  ;;  %v326_v28 = vld [vmem:[%s2782_s12 + $0xc0] sm:$0xff]  ;;  %v327_v38 = vld [vmem:[%s2782_s12 + $0xc8] sm:$0xff]  ;;  %v754_v41 = vld [vmem:[%s3573_s3 + $0x38] sm:$0xff] }
  0x21   : > { %2323 = vmatpush3.bf16.msra.mxu0 %v2320_v13  ;;  %632 = vst [vmem:[#allocation2 + $0x30] sm:$0xfe] %v615_v48  ;;  %v616_v10 = vrot.slane %v451_v56, 7  ;;  %v455_v11 = vmax.f32 %v2907_v57, 0.0  ;;  %v322_v13 = vld [vmem:[%s2782_s12 + $0xa0] sm:$0xff]  ;;  %v346_v15 = vsub.s32 2, %v2741_v35  ;;  %v377_v24 = vmul.f32 %v2811_v63, %v323_v14 }
  0x22   : > { %2355 = vmatpush3.bf16.msra.mxu1 %v2354_v32  ;;  %2325 = vmatprep.subr.bf16.mxu0 %v2324_v37  ;;  %v2925_v12 = vadd.f32 %v2816_v3, %v372_v60  ;;  %v2940_v21 = vadd.f32 %v2819_v4, %v373_v6  ;;  %v376_v22 = vmul.f32 %v2808_v62, %v322_v13  ;;  %v350_v25 = vsub.s32 3, %v2741_v35  ;;  %v749_v32 = vld [vmem:[%s3573_s3 + $0x10] sm:$0xff]  ;;  %v1792_v48 = vld [vmem:[%s3573_s3 + $0x2a8] sm:$0xff]  ;;  %v767_v50 = vld [vmem:[%s3573_s3 + $0xa0] sm:$0xff] }
  0x23   : > { %2357 = vmatprep.subr.bf16.mxu1 %v2356_v44  ;;  %633 = vst [vmem:[#allocation2 + $0x48] sm:$0xfe] %v616_v10  ;;  %v617_v26 = vrot.slane %v455_v11, 7  ;;  %v2394_v31 = vpack.c.bf16 %v748_v2, %v747_v1  ;;  %v2364_v40 = vpack.c.bf16 %v1790_v16, %v1789_v9  ;;  %v2396_v42 = vpack.c.bf16 %v766_v18, %v765_v17  ;;  %v1791_v44 = vld [vmem:[%s3573_s3 + $0x2a0] sm:$0xff]  ;;  %v768_v51 = vld [vmem:[%s3573_s3 + $0xa8] sm:$0xff]  ;;  %v1794_v18 = vld [vmem:[%s3573_s3 + $0x2b8] sm:$0xff] }
  0x24   : > { %v458_v27 = vmax.f32 %v2925_v12, 0.0  ;;  %v459_v34 = vmax.f32 %v2940_v21, 0.0  ;;  %v2954_v36 = vadd.f32 %v2816_v3, %v376_v22  ;;  %v380_v45 = vmul.f32 %v2808_v62, %v326_v28  ;;  %v330_v6 = vld [vmem:[%s2782_s12 + $0xe0] sm:$0xff]  ;;  %v752_v19 = vld [vmem:[%s3573_s3 + $0x28] sm:$0xff]  ;;  %v769_v22 = vld [vmem:[%s3573_s3 + $0xb0] sm:$0xff] }
  0x25   : > { %2327 = vmatpush3.bf16.msra.mxu0 %v2324_v37  ;;  %v2957_v37 = vadd.f32 %v2819_v4, %v377_v24  ;;  %634 = vst [vmem:[#allocation2 + $0x60] sm:$0xfe] %v617_v26  ;;  %v381_v46 = vmul.f32 %v2811_v63, %v327_v38  ;;  %v2971_v47 = vrot.slane %v2797_v58, %v346_v15  ;;  %v770_v24 = vld [vmem:[%s3573_s3 + $0xb8] sm:$0xff]  ;;  %v1809_v49 = vld [vmem:[%s3573_s3 + $0x330] sm:$0xff]  ;;  %v1811_v57 = vld [vmem:[%s3573_s3 + $0x340] sm:$0xff] }
  0x26   : > { %2359 = vmatpush3.bf16.msra.mxu1 %v2358_v61  ;;  %2361 = vmatprep.subr.bf16.mxu0 %v2360_v0  ;;  %v618_v54 = vrot.slane %v459_v34, 7  ;;  %v462_v55 = vmax.f32 %v2954_v36, 0.0  ;;  %v2989_v61 = vrot.slane %v2797_v58, %v350_v25  ;;  %v2992_v1 = vadd.f32 %v2816_v3, %v380_v45  ;;  %v751_v58 = vld [vmem:[%s3573_s3 + $0x20] sm:$0xff]  ;;  %v1796_v45 = vld [vmem:[%s3573_s3 + $0x2c8] sm:$0xff]  ;;  %v1814_v21 = vld [vmem:[%s3573_s3 + $0x358] sm:$0xff] }
  0x27   : > { %v795_v39 = vld [vmem:[#allocation2 + $0x18] sm:$0xff]  ;;  %2393 = vmatprep.subr.bf16.mxu1 %v2392_v8  ;;  %v463_v60 = vmax.f32 %v2957_v37, 0.0  ;;  %v2995_v2 = vadd.f32 %v2819_v4, %v381_v46  ;;  %v331_v8 = vld [vmem:[%s2782_s12 + $0xe8] sm:$0xff]  ;;  %v2398_v10 = vpack.c.bf16 %v750_v43, %v749_v32  ;;  %v384_v13 = vmul.f32 %v2808_v62, %v330_v6  ;;  %v771_v46 = vld [vmem:[%s3573_s3 + $0xc0] sm:$0xff] }
  0x28   : > { %2153 = vmatmul.mubr.f32.vlgmr.msra.gmra.mrb[0].mxu0 %v446_v29  ;;  %v798_v9 = vld [vmem:[#allocation2 + $0x30] sm:$0xff]  ;;  %635 = vst [vmem:[#allocation2 + $0x78] sm:$0xfe] %v618_v54  ;;  %v385_v14 = vmul.f32 %v2811_v63, %v331_v8  ;;  %v2368_v16 = vpack.c.bf16 %v1792_v48, %v1791_v44  ;;  %v2400_v17 = vpack.c.bf16 %v768_v51, %v767_v50  ;;  %v466_v62 = vmax.f32 %v2992_v1, 0.0  ;;  %v305_v43 = vld [vmem:[%s2782_s12 + $0x18] sm:$0xff]  ;;  %v772_v48 = vld [vmem:[%s3573_s3 + $0xc8] sm:$0xff] }
  0x29   : > { %933 = vmatmul.mubr.f32.vlgmr.msra.gmra.mrb[0].mxu1 %v795_v39  ;;  %2363 = vmatpush3.bf16.msra.mxu0 %v2360_v0  ;;  %v619_v0 = vrot.slane %v463_v60, 7  ;;  %v467_v63 = vmax.f32 %v2995_v2, 0.0  ;;  %v3028_v26 = vadd.f32 %v2816_v3, %v384_v13  ;;  %v3039_v32 = vrot.slane %v2802_v59, %v350_v25  ;;  %v753_v25 = vld [vmem:[%s3573_s3 + $0x30] sm:$0xff]  ;;  %v309_v8 = vld [vmem:[%s2782_s12 + $0x38] sm:$0xff]  ;;  %v760_v36 = vld [vmem:[%s3573_s3 + $0x68] sm:$0xff] }
  0x2a   : > { %2395 = vmatpush3.bf16.msra.mxu1 %v2394_v31  ;;  %937 = vmatprep.mubr.f32.mxu1 %v446_v29  ;;  %v1793_v29 = vld [vmem:[%s3573_s3 + $0x2b0] sm:$0xff]  ;;  %v3031_v28 = vadd.f32 %v2819_v4, %v385_v14  ;;  %v3036_v31 = vrot.slane %v2802_v59, %v346_v15  ;;  %v801_v3 = vld [vmem:[#allocation2 + $0x48] sm:$0xff]  ;;  %v2402_v4 = vpack.c.bf16 %v752_v19, %v751_v58  ;;  %v755_v58 = vld [vmem:[%s3573_s3 + $0x40] sm:$0xff] }
  0x2b   : > { %2365 = vmatprep.subr.bf16.mxu0 %v2364_v40  ;;  %2397 = vmatprep.subr.bf16.mxu1 %v2396_v42  ;;  %636 = vst [vmem:[#allocation2 + $0x90] sm:$0xfe] %v619_v0  ;;  %v620_v38 = vrot.slane %v467_v63, 7  ;;  %v2372_v39 = vpack.c.bf16 %v1794_v18, %v1793_v29  ;;  %v470_v35 = vmax.f32 %v3028_v26, 0.0  ;;  %v304_v42 = vld [vmem:[%s2782_s12 + $0x10] sm:$0xff]  ;;  %v2404_v59 = vpack.c.bf16 %v770_v24, %v769_v22  ;;  %v756_v0 = vld [vmem:[%s3573_s3 + $0x48] sm:$0xff] }
  0x2c   : > { %2155 = vmatprep.mubr.f32.mxu0 %v450_v52  ;;  %v471_v15 = vmax.f32 %v3031_v28, 0.0  ;;  %v359_v44 = vmul.f32 %v2989_v61, %v305_v43  ;;  %v308_v6 = vld [vmem:[%s2782_s12 + $0x30] sm:$0xff]  ;;  %v363_v14 = vmul.f32 %v2989_v61, %v309_v8  ;;  %v774_v22 = vld [vmem:[%s3573_s3 + $0xd8] sm:$0xff]  ;;  %v775_v8 = vld [vmem:[%s3573_s3 + $0xe0] sm:$0xff] }
  0x2d   : > { %938 = vmatmul.mubr.f32.gmra.mrb[2].mxu1 %v798_v9  ;;  %2367 = vmatpush3.bf16.msra.mxu0 %v2364_v40  ;;  %637 = vst [vmem:[#allocation2 + $0xa8] sm:$0xfe] %v620_v38  ;;  %v358_v40 = vmul.f32 %v2971_v47, %v304_v42  ;;  %v804_v9 = vld [vmem:[#allocation2 + $0x60] sm:$0xff]  ;;  %v362_v13 = vmul.f32 %v2971_v47, %v308_v6  ;;  %v773_v19 = vld [vmem:[%s3573_s3 + $0xd0] sm:$0xff]  ;;  %v317_v6 = vld [vmem:[%s2782_s12 + $0x78] sm:$0xff] }
  0x2e   : > { %2399 = vmatpush3.bf16.msra.mxu1 %v2398_v10  ;;  %942 = vmatprep.mubr.f32.mxu1 %v450_v52  ;;  %v1795_v52 = vld [vmem:[%s3573_s3 + $0x2c0] sm:$0xff]  ;;  %v621_v50 = vrot.slane %v471_v15, 7  ;;  %v413_v54 = vadd.f32 %v3039_v32, %v359_v44  ;;  %v2406_v10 = vpack.c.bf16 %v754_v41, %v753_v25  ;;  %v417_v38 = vadd.f32 %v3039_v32, %v363_v14  ;;  %v3115_v42 = vld [vmem:[%s3573_s3 + $0x50] sm:$0xff] }
  0x2f   : > { %2369 = vmatprep.subr.bf16.mxu0 %v2368_v16  ;;  %2401 = vmatprep.subr.bf16.mxu1 %v2400_v17  ;;  %v3074_v51 = vadd.f32 %v3036_v31, %v358_v40  ;;  %v2376_v53 = vpack.c.bf16 %v1796_v45, %v1795_v52  ;;  %v1798_v17 = vld [vmem:[%s3573_s3 + $0x2d8] sm:$0xff]  ;;  %v3107_v24 = vadd.f32 %v3036_v31, %v362_v13  ;;  %v1799_v44 = vld [vmem:[%s3573_s3 + $0x2e0] sm:$0xff]  ;;  %v781_v26 = vld [vmem:[%s3573_s3 + $0x110] sm:$0xff] }
  0x30   : > { %2156 = vmatmul.mubr.f32.gmra.mrb[2].mxu0 %v454_v5  ;;  %638 = vst [vmem:[#allocation2 + $0xc0] sm:$0xfe] %v621_v50  ;;  %v3099_v18 = vmax.f32 %v413_v54, 0.0  ;;  %v807_v41 = vld [vmem:[#allocation2 + $0x78] sm:$0xff]  ;;  %v2410_v52 = vpack.c.bf16 %v756_v0, %v755_v58  ;;  %v2412_v12 = vpack.c.bf16 %v774_v22, %v773_v19  ;;  %v316_v54 = vld [vmem:[%s2782_s12 + $0x70] sm:$0xff]  ;;  %v371_v0 = vmul.f32 %v2989_v61, %v317_v6 }
  0x31   : > { %943 = vmatmul.mubr.f32.gmra.mrb[4].mxu1 %v801_v3  ;;  %2371 = vmatpush3.bf16.msra.mxu0 %v2368_v16  ;;  %v1797_v16 = vld [vmem:[%s3573_s3 + $0x2d0] sm:$0xff]  ;;  %v444_v29 = vmax.f32 %v3074_v51, 0.0  ;;  %v758_v40 = vld [vmem:[%s3573_s3 + $0x58] sm:$0xff]  ;;  %v448_v45 = vmax.f32 %v3107_v24, 0.0  ;;  %v370_v58 = vmul.f32 %v2971_v47, %v316_v54 }
  0x32   : > { %2403 = vmatpush3.bf16.msra.mxu1 %v2402_v4  ;;  %947 = vmatprep.mubr.f32.mxu1 %v454_v5  ;;  %v2408_v5 = vpack.c.bf16 %v772_v48, %v771_v46  ;;  %v312_v3 = vld [vmem:[%s2782_s12 + $0x50] sm:$0xff]  ;;  %v313_v4 = vld [vmem:[%s2782_s12 + $0x58] sm:$0xff]  ;;  %v674_v43 = vrot.slane %v3099_v18, 7  ;;  %v3129_v46 = vmax.f32 %v417_v38, 0.0  ;;  %v2414_v13 = vpack.c.bf16 %v758_v40, %v3115_v42 }
  0x33   : > { %2373 = vmatprep.subr.bf16.mxu0 %v2372_v39  ;;  %2405 = vmatprep.subr.bf16.mxu1 %v2404_v59  ;;  %v366_v59 = vmul.f32 %v2971_v47, %v312_v3  ;;  %v367_v25 = vmul.f32 %v2989_v61, %v313_v4  ;;  %v3158_v19 = vadd.f32 %v3036_v31, %v370_v58  ;;  %v320_v38 = vld [vmem:[%s2782_s12 + $0x90] sm:$0xff]  ;;  %v759_v4 = vld [vmem:[%s3573_s3 + $0x60] sm:$0xff]  ;;  %v325_v54 = vld [vmem:[%s2782_s12 + $0xb8] sm:$0xff] }
  0x34   : > { %2158 = vmatprep.mubr.f32.mxu0 %v458_v27  ;;  %691 = vst [vmem:[#allocation3 + $0x18] sm:$0xfe] %v674_v43  ;;  %v425_v22 = vadd.f32 %v3039_v32, %v371_v0  ;;  %v374_v43 = vmul.f32 %v2971_v47, %v320_v38  ;;  %v813_v6 = vld [vmem:[#allocation2 + $0xa8] sm:$0xff]  ;;  %v379_v0 = vmul.f32 %v2989_v61, %v325_v54 }
  0x35   : > { %948 = vmatmul.mubr.f32.gmra.mrb[6].mxu1 %v804_v9  ;;  %2375 = vmatpush3.bf16.msra.mxu0 %v2372_v39  ;;  %v2380_v39 = vpack.c.bf16 %v1798_v17, %v1797_v16  ;;  %v3135_v48 = vadd.f32 %v3036_v31, %v366_v59  ;;  %v421_v50 = vadd.f32 %v3039_v32, %v367_v25  ;;  %v776_v9 = vld [vmem:[%s3573_s3 + $0xe8] sm:$0xff]  ;;  %v810_v16 = vld [vmem:[#allocation2 + $0x90] sm:$0xff]  ;;  %v1802_v25 = vld [vmem:[%s3573_s3 + $0x2f8] sm:$0xff]  ;;  %v456_v40 = vmax.f32 %v3158_v19, 0.0 }
  0x36   : > { %2407 = vmatpush3.bf16.msra.mxu1 %v2406_v10  ;;  %952 = vmatprep.mubr.f32.mxu1 %v458_v27  ;;  %v1800_v27 = vld [vmem:[%s3573_s3 + $0x2e8] sm:$0xff]  ;;  %v675_v10 = vrot.slane %v3129_v46, 7  ;;  %v2416_v3 = vpack.c.bf16 %v776_v9, %v775_v8  ;;  %v2418_v8 = vpack.c.bf16 %v760_v36, %v759_v4  ;;  %v761_v9 = vld [vmem:[%s3573_s3 + $0x70] sm:$0xff]  ;;  %v433_v36 = vadd.f32 %v3039_v32, %v379_v0 }
  0x37   : > { %2377 = vmatprep.subr.bf16.mxu0 %v2376_v53  ;;  %2409 = vmatprep.subr.bf16.mxu1 %v2408_v5  ;;  %v452_v14 = vmax.f32 %v3135_v48, 0.0  ;;  %v3153_v5 = vmax.f32 %v421_v50, 0.0  ;;  %v2384_v17 = vpack.c.bf16 %v1800_v27, %v1799_v44  ;;  %v3187_v44 = vmax.f32 %v425_v22, 0.0  ;;  %v324_v50 = vld [vmem:[%s2782_s12 + $0xb0] sm:$0xff]  ;;  %v1819_v22 = vld [vmem:[%s3573_s3 + $0x380] sm:$0xff] }
  0x38   : > { %2159 = vmatmul.mubr.f32.gmra.mrb[4].mxu0 %v462_v55  ;;  %692 = vst [vmem:[#allocation3 + $0x30] sm:$0xfe] %v675_v10  ;;  %v378_v58 = vmul.f32 %v2971_v47, %v324_v50  ;;  %v3235_v54 = vmax.f32 %v433_v36, 0.0  ;;  %v784_v36 = vld [vmem:[%s3573_s3 + $0x128] sm:$0xff] }
  0x39   : > { %953 = vmatmul.mubr.f32.gmra.mrb[8].mxu1 %v807_v41  ;;  %2379 = vmatpush3.bf16.msra.mxu0 %v2376_v53  ;;  %v321_v53 = vld [vmem:[%s2782_s12 + $0x98] sm:$0xff]  ;;  %v676_v42 = vrot.slane %v3153_v5, 7  ;;  %v777_v41 = vld [vmem:[%s3573_s3 + $0xf0] sm:$0xff]  ;;  %v677_v10 = vrot.slane %v3187_v44, 7 }
  0x3a   : > { %2411 = vmatpush3.bf16.msra.mxu1 %v2410_v52  ;;  %957 = vmatprep.mubr.f32.mxu1 %v462_v55  ;;  %v1801_v55 = vld [vmem:[%s3573_s3 + $0x2f0] sm:$0xff]  ;;  %v375_v59 = vmul.f32 %v2989_v61, %v321_v53  ;;  %v778_v52 = vld [vmem:[%s3573_s3 + $0xf8] sm:$0xff]  ;;  %v3224_v4 = vadd.f32 %v3036_v31, %v378_v58  ;;  %v679_v0 = vrot.slane %v3235_v54, 7 }
  0x3b   : > { %2381 = vmatprep.subr.bf16.mxu0 %v2380_v39  ;;  %2413 = vmatprep.subr.bf16.mxu1 %v2412_v12  ;;  %693 = vst [vmem:[#allocation3 + $0x48] sm:$0xfe] %v676_v42  ;;  %v3190_v12 = vadd.f32 %v3036_v31, %v374_v43  ;;  %v2388_v1 = vpack.c.bf16 %v1802_v25, %v1801_v55  ;;  %694 = vst [vmem:[#allocation3 + $0x60] sm:$0xfe] %v677_v10  ;;  %v328_v55 = vld [vmem:[%s2782_s12 + $0xd0] sm:$0xff]  ;;  %v329_v42 = vld [vmem:[%s2782_s12 + $0xd8] sm:$0xff] }
  0x3c   : > { %2161 = vmatprep.mubr.f32.mxu0 %v466_v62  ;;  %v429_v27 = vadd.f32 %v3039_v32, %v375_v59  ;;  %v382_v59 = vmul.f32 %v2971_v47, %v328_v55  ;;  %v383_v25 = vmul.f32 %v2989_v61, %v329_v42  ;;  %v464_v50 = vmax.f32 %v3224_v4, 0.0  ;;  %v1821_v10 = vld [vmem:[%s3573_s3 + $0x390] sm:$0xff]  ;;  %v1822_v58 = vld [vmem:[%s3573_s3 + $0x398] sm:$0xff]  ;;  %696 = vst [vmem:[#allocation3 + $0x90] sm:$0xfe] %v679_v0  ;;  %v1823_v55 = vld [vmem:[%s3573_s3 + $0x3a0] sm:$0xff] }
  0x3d   : > { %958 = vmatmul.mubr.f32.gmra.mrb[10].mxu1 %v810_v16  ;;  %2383 = vmatpush3.bf16.msra.mxu0 %v2380_v39  ;;  %v762_v39 = vld [vmem:[%s3573_s3 + $0x78] sm:$0xff]  ;;  %v780_v16 = vld [vmem:[%s3573_s3 + $0x108] sm:$0xff]  ;;  %v460_v38 = vmax.f32 %v3190_v12, 0.0  ;;  %v3294_v23 = vld [vmem:[#allocation3 + $0x18] sm:$0xff] }
  0x3e   : > { %2415 = vmatpush3.bf16.msra.mxu1 %v2414_v13  ;;  %962 = vmatprep.mubr.f32.mxu1 %v466_v62  ;;  %v2420_v62 = vpack.c.bf16 %v778_v52, %v777_v41  ;;  %v779_v13 = vld [vmem:[%s3573_s3 + $0x100] sm:$0xff]  ;;  %v3216_v53 = vmax.f32 %v429_v27, 0.0  ;;  %v2422_v52 = vpack.c.bf16 %v762_v39, %v761_v9  ;;  %v437_v9 = vadd.f32 %v3039_v32, %v383_v25  ;;  %v782_v39 = vld [vmem:[%s3573_s3 + $0x118] sm:$0xff] }
  0x3f   : > { %2385 = vmatprep.subr.bf16.mxu0 %v2384_v17  ;;  %2417 = vmatprep.subr.bf16.mxu1 %v2416_v3  ;;  %v1820_v3 = vld [vmem:[%s3573_s3 + $0x388] sm:$0xff]  ;;  %v816_v41 = vld [vmem:[#allocation2 + $0xc0] sm:$0xff]  ;;  %v2424_v27 = vpack.c.bf16 %v780_v16, %v779_v13  ;;  %v1805_v13 = vld [vmem:[%s3573_s3 + $0x310] sm:$0xff] }
  0x40   : > { %2162 = vmatmul.mubr.f32.gmra.mrb[6].mxu0 %v470_v35  ;;  %v678_v43 = vrot.slane %v3216_v53, 7  ;;  %v3263_v20 = vmax.f32 %v437_v9, 0.0  ;;  %v1806_v16 = vld [vmem:[%s3573_s3 + $0x318] sm:$0xff]  ;;  %v1825_v9 = vld [vmem:[%s3573_s3 + $0x3b0] sm:$0xff] }
  0x41   : > { %963 = vmatmul.mubr.f32.gmra.mrb[12].mxu1 %v813_v6  ;;  %2387 = vmatpush3.bf16.msra.mxu0 %v2384_v17  ;;  %v2456_v17 = vpack.c.bf16 %v1820_v3, %v1819_v22  ;;  %v1803_v6 = vld [vmem:[%s3573_s3 + $0x300] sm:$0xff]  ;;  %v2460_v22 = vpack.c.bf16 %v1822_v58, %v1821_v10  ;;  %v333_v25 = vld [vmem:[%s2782_s12 + $0xf8] sm:$0xff]  ;;  %v3327_v10 = vld [vmem:[#allocation3 + $0x30] sm:$0xff] }
  0x42   : > { %2419 = vmatpush3.bf16.msra.mxu1 %v2418_v8  ;;  %967 = vmatprep.mubr.f32.mxu1 %v470_v35  ;;  %v1804_v8 = vld [vmem:[%s3573_s3 + $0x308] sm:$0xff]  ;;  %695 = vst [vmem:[#allocation3 + $0x78] sm:$0xfe] %v678_v43  ;;  %v3247_v35 = vadd.f32 %v3036_v31, %v382_v59  ;;  %v783_v3 = vld [vmem:[%s3573_s3 + $0x120] sm:$0xff]  ;;  %v680_v42 = vrot.slane %v3263_v20, 7  ;;  %v332_v59 = vld [vmem:[%s2782_s12 + $0xf0] sm:$0xff] }
  0x43   : > { %2389 = vmatprep.subr.bf16.mxu0 %v2388_v1  ;;  %2421 = vmatprep.subr.bf16.mxu1 %v2420_v62  ;;  %v1824_v43 = vld [vmem:[%s3573_s3 + $0x3a8] sm:$0xff] }
  0x44   : > { %2196 = vmatprep.mubr.f32.mxu0 %v443_v30  ;;  %v468_v62 = vmax.f32 %v3247_v35, 0.0  ;;  %v2458_v30 = vpack.c.bf16 %v1804_v8, %v1803_v6  ;;  %697 = vst [vmem:[#allocation3 + $0xa8] sm:$0xfe] %v680_v42  ;;  %v2464_v6 = vpack.c.bf16 %v1824_v43, %v1823_v55  ;;  %v3429_v2 = vld [vmem:[#allocation3 + $0x90] sm:$0xff] }
  0x45   : > { %968 = vmatmul.mubr.f32.gmra.mrb[14].mxu1 %v816_v41  ;;  %2391 = vmatpush3.bf16.msra.mxu0 %v2388_v1  ;;  %v2428_v1 = vpack.c.bf16 %v782_v39, %v781_v26  ;;  %v386_v41 = vmul.f32 %v2971_v47, %v332_v59  ;;  %v1808_v47 = vld [vmem:[%s3573_s3 + $0x328] sm:$0xff]  ;;  %v786_v26 = vld [vmem:[%s3573_s3 + $0x138] sm:$0xff]  ;;  %v789_v59 = vld [vmem:[%s3573_s3 + $0x150] sm:$0xff] }
  0x46   : > { %2423 = vmatpush3.bf16.msra.mxu1 %v2422_v52  ;;  %1142 = vmatprep.mubr.f32.mxu1 %v2594_v7  ;;  %v387_v52 = vmul.f32 %v2989_v61, %v333_v25  ;;  %v785_v61 = vld [vmem:[%s3573_s3 + $0x130] sm:$0xff]  ;;  %v1826_v39 = vld [vmem:[%s3573_s3 + $0x3b8] sm:$0xff] }
  0x47   : > { %2425 = vmatprep.subr.bf16.mxu0 %v2424_v27  ;;  %2457 = vmatprep.subr.bf16.mxu1 %v2456_v17  ;;  %v2432_v17 = vpack.c.bf16 %v784_v36, %v783_v3  ;;  %v2436_v0 = vpack.c.bf16 %v786_v26, %v785_v61  ;;  %v1828_v3 = vld [vmem:[%s3573_s3 + $0x3c8] sm:$0xff]  ;;  %v3354_v36 = vld [vmem:[#allocation3 + $0x48] sm:$0xff]  ;;  %v790_v25 = vld [vmem:[%s3573_s3 + $0x158] sm:$0xff] }
  0x48   : > { %2197 = vmatmul.mubr.f32.vlgmr.msra.gmra.mrb[8].mxu0 %v447_v33  ;;  %v2462_v33 = vpack.c.bf16 %v1806_v16, %v1805_v13  ;;  %v3309_v8 = vadd.f32 %v3039_v32, %v387_v52  ;;  %v787_v13 = vld [vmem:[%s3573_s3 + $0x140] sm:$0xff]  ;;  %v1830_v52 = vld [vmem:[%s3573_s3 + $0x3d8] sm:$0xff]  ;;  %v792_v61 = vld [vmem:[%s3573_s3 + $0x168] sm:$0xff] }
  0x49   : > { %1143 = vmatmul.mubr.f32.vlgmr.msra.gmra.mrb[16].mxu1 %v2594_v7  ;;  %2427 = vmatpush3.bf16.msra.mxu0 %v2424_v27  ;;  %v1807_v7 = vld [vmem:[%s3573_s3 + $0x320] sm:$0xff]  ;;  %v3306_v27 = vadd.f32 %v3036_v31, %v386_v41  ;;  %v1829_v41 = vld [vmem:[%s3573_s3 + $0x3d0] sm:$0xff] }
  0x4a   : > { %2459 = vmatpush3.bf16.msra.mxu1 %v2458_v30  ;;  %1147 = vmatprep.mubr.f32.mxu1 %v444_v29  ;;  %v473_v32 = vmax.f32 %v3309_v8, 0.0  ;;  %v2466_v58 = vpack.c.bf16 %v1808_v47, %v1807_v7  ;;  %v2468_v30 = vpack.c.bf16 %v1826_v39, %v1825_v9  ;;  %v2476_v7 = vpack.c.bf16 %v1830_v52, %v1829_v41  ;;  %v1813_v47 = vld [vmem:[%s3573_s3 + $0x350] sm:$0xff]  ;;  %v1831_v26 = vld [vmem:[%s3573_s3 + $0x3e0] sm:$0xff]  ;;  %v1832_v9 = vld [vmem:[%s3573_s3 + $0x3e8] sm:$0xff] }
  0x4b   : > { %2429 = vmatprep.subr.bf16.mxu0 %v2428_v1  ;;  %2461 = vmatprep.subr.bf16.mxu1 %v2460_v22  ;;  %v472_v31 = vmax.f32 %v3306_v27, 0.0  ;;  %v1827_v22 = vld [vmem:[%s3573_s3 + $0x3c0] sm:$0xff]  ;;  %v3404_v37 = vld [vmem:[#allocation3 + $0x78] sm:$0xff] }
  0x4c   : > { %2199 = vmatprep.mubr.f32.mxu0 %v451_v56  ;;  %v1810_v56 = vld [vmem:[%s3573_s3 + $0x338] sm:$0xff]  ;;  %v681_v16 = vrot.slane %v473_v32, 7  ;;  %v2472_v43 = vpack.c.bf16 %v1828_v3, %v1827_v22  ;;  %v1817_v3 = vld [vmem:[%s3573_s3 + $0x370] sm:$0xff]  ;;  %v1839_v52 = vld [vmem:[%s3573_s3 + $0x420] sm:$0xff] }
  0x4d   : > { %1148 = vmatmul.mubr.f32.gmra.mrb[18].mxu1 %v3294_v23  ;;  %2431 = vmatpush3.bf16.msra.mxu0 %v2428_v1  ;;  %v788_v1 = vld [vmem:[%s3573_s3 + $0x148] sm:$0xff]  ;;  %v2470_v55 = vpack.c.bf16 %v1810_v56, %v1809_v49  ;;  %v793_v49 = vld [vmem:[%s3573_s3 + $0x170] sm:$0xff]  ;;  %v794_v56 = vld [vmem:[%s3573_s3 + $0x178] sm:$0xff] }
  0x4e   : > { %2463 = vmatpush3.bf16.msra.mxu1 %v2462_v33  ;;  %1152 = vmatprep.mubr.f32.mxu1 %v448_v45  ;;  %698 = vst [vmem:[#allocation3 + $0xc0] sm:$0xfe] %v681_v16  ;;  %v2440_v42 = vpack.c.bf16 %v788_v1, %v787_v13  ;;  %v3379_v33 = vld [vmem:[#allocation3 + $0x60] sm:$0xff]  ;;  %v1833_v13 = vld [vmem:[%s3573_s3 + $0x3f0] sm:$0xff]  ;;  %v2452_v1 = vpack.c.bf16 %v794_v56, %v793_v49 }
  0x4f   : > { %2433 = vmatprep.subr.bf16.mxu0 %v2432_v17  ;;  %2465 = vmatprep.subr.bf16.mxu1 %v2464_v6  ;;  %v2444_v6 = vpack.c.bf16 %v790_v25, %v789_v59  ;;  %v1834_v16 = vld [vmem:[%s3573_s3 + $0x3f8] sm:$0xff]  ;;  %v1837_v59 = vld [vmem:[%s3573_s3 + $0x410] sm:$0xff] }
  0x50   : > { %2200 = vmatmul.mubr.f32.gmra.mrb[10].mxu0 %v455_v11  ;;  %v1812_v11 = vld [vmem:[%s3573_s3 + $0x348] sm:$0xff]  ;;  %v2484_v22 = vpack.c.bf16 %v1834_v16, %v1833_v13  ;;  %v1838_v25 = vld [vmem:[%s3573_s3 + $0x418] sm:$0xff] }
  0x51   : > { %1153 = vmatmul.mubr.f32.gmra.mrb[20].mxu1 %v3327_v10  ;;  %2435 = vmatpush3.bf16.msra.mxu0 %v2432_v17  ;;  %v2474_v17 = vpack.c.bf16 %v1812_v11, %v1811_v57  ;;  %v3448_v57 = vld [vmem:[#allocation3 + $0xa8] sm:$0xff]  ;;  %v2492_v41 = vpack.c.bf16 %v1838_v25, %v1837_v59 }
  0x52   : > { %2467 = vmatpush3.bf16.msra.mxu1 %v2466_v58  ;;  %1157 = vmatprep.mubr.f32.mxu1 %v452_v14  ;;  %v2480_v58 = vpack.c.bf16 %v1832_v9, %v1831_v26 }
  0x53   : > { %2437 = vmatprep.subr.bf16.mxu0 %v2436_v0  ;;  %2469 = vmatprep.subr.bf16.mxu1 %v2468_v30  ;;  %v1816_v30 = vld [vmem:[%s3573_s3 + $0x368] sm:$0xff] }
  0x54   : > { %2202 = vmatprep.mubr.f32.mxu0 %v459_v34  ;;  %v791_v34 = vld [vmem:[%s3573_s3 + $0x160] sm:$0xff] }
  0x55   : > { %1158 = vmatmul.mubr.f32.gmra.mrb[22].mxu1 %v3354_v36  ;;  %2439 = vmatpush3.bf16.msra.mxu0 %v2436_v0  ;;  %v2448_v39 = vpack.c.bf16 %v792_v61, %v791_v34  ;;  %v1815_v0 = vld [vmem:[%s3573_s3 + $0x360] sm:$0xff]  ;;  %v1309_v4 = vld [vmem:[#allocation3 + $0xc0] sm:$0xff] }
  0x56   : > { %2471 = vmatpush3.bf16.msra.mxu1 %v2470_v55  ;;  %1162 = vmatprep.mubr.f32.mxu1 %v456_v40  ;;  %v1818_v55 = vld [vmem:[%s3573_s3 + $0x378] sm:$0xff] }
  0x57   : > { %2441 = vmatprep.subr.bf16.mxu0 %v2440_v42  ;;  %2473 = vmatprep.subr.bf16.mxu1 %v2472_v43  ;;  %v1836_v43 = vld [vmem:[%s3573_s3 + $0x408] sm:$0xff]  ;;  %v2486_v11 = vpack.c.bf16 %v1818_v55, %v1817_v3 }
  0x58   : > { %2203 = vmatmul.mubr.f32.gmra.mrb[12].mxu0 %v463_v60  ;;  %v2478_v60 = vpack.c.bf16 %v1814_v21, %v1813_v47 }
  0x59   : > { %1163 = vmatmul.mubr.f32.gmra.mrb[24].mxu1 %v3379_v33  ;;  %2443 = vmatpush3.bf16.msra.mxu0 %v2440_v42  ;;  %v1835_v42 = vld [vmem:[%s3573_s3 + $0x400] sm:$0xff] }
  0x5a   : > { %2475 = vmatpush3.bf16.msra.mxu1 %v2474_v17  ;;  %1167 = vmatprep.mubr.f32.mxu1 %v460_v38  ;;  %v2488_v28 = vpack.c.bf16 %v1836_v43, %v1835_v42  ;;  %v1840_v17 = vld [vmem:[%s3573_s3 + $0x428] sm:$0xff] }
  0x5b   : > { %2445 = vmatprep.subr.bf16.mxu0 %v2444_v6  ;;  %2477 = vmatprep.subr.bf16.mxu1 %v2476_v7  ;;  %v2496_v51 = vpack.c.bf16 %v1840_v17, %v1839_v52 }
  0x5c   : > { %2205 = vmatprep.mubr.f32.mxu0 %v467_v63  ;;  %v2482_v63 = vpack.c.bf16 %v1816_v30, %v1815_v0 }
  0x5d   : > { %1168 = vmatmul.mubr.f32.gmra.mrb[26].mxu1 %v3404_v37  ;;  %2447 = vmatpush3.bf16.msra.mxu0 %v2444_v6  ;;  %v1848_v6 = vld [vmem:[%s3573_s3 + $0x468] sm:$0xff] }
  0x5e   : > { %2479 = vmatpush3.bf16.msra.mxu1 %v2478_v60  ;;  %1172 = vmatprep.mubr.f32.mxu1 %v464_v50 }
  0x5f   : > { %2449 = vmatprep.subr.bf16.mxu0 %v2448_v39  ;;  %2481 = vmatprep.subr.bf16.mxu1 %v2480_v58 }
  0x60   : > { %2206 = vmatmul.mubr.f32.gmra.mrb[14].mxu0 %v471_v15  ;;  %v2585_v15 = vld [vmem:[#allocation2] sm:$0xff] }
  0x61   : > { %1173 = vmatmul.mubr.f32.gmra.mrb[28].mxu1 %v3429_v2  ;;  %2451 = vmatpush3.bf16.msra.mxu0 %v2448_v39 }
  0x62   : > { %2483 = vmatpush3.bf16.msra.mxu1 %v2482_v63  ;;  %1177 = vmatprep.mubr.f32.mxu1 %v468_v62 }
  0x63   : > { %2453 = vmatprep.subr.bf16.mxu0 %v2452_v1  ;;  %2485 = vmatprep.subr.bf16.mxu1 %v2484_v22 }
  0x64   : > { %2240 = vmatprep.mubr.f32.mxu0 %v2585_v15 }
  0x65   : > { %1178 = vmatmul.mubr.f32.gmra.mrb[30].mxu1 %v3448_v57  ;;  %2455 = vmatpush3.bf16.msra.mxu0 %v2452_v1 }
  0x66   : > { %2487 = vmatpush3.bf16.msra.mxu1 %v2486_v11  ;;  %1425 = vmatprep.mubr.f32.mxu1 %v444_v29  ;;  %v1841_v29 = vld [vmem:[%s3573_s3 + $0x430] sm:$0xff] }
  0x67   : > { %2489 = vmatprep.subr.bf16.mxu0 %v2488_v28  ;;  %2520 = vmatprep.subr.bf16.mxu1 %v2488_v28 }
  0x68   : > { %2241 = vmatmul.mubr.f32.vlgmr.msra.gmra.mrb[8].mxu0 %v3099_v18 }
  0x69   : > { %1426 = vmatmul.mubr.f32.vlgmr.msra.gmra.mrb[32].mxu1 %v3294_v23  ;;  %2491 = vmatpush3.bf16.msra.mxu0 %v2488_v28  ;;  %v1842_v23 = vld [vmem:[%s3573_s3 + $0x438] sm:$0xff] }
  0x6a   : > { %2528 = vmatpush3.bf16.msra.mxu1 %v2488_v28  ;;  %2243 = vmatprep.mubr.f32.mxu0 %v3129_v46  ;;  %v2500_v24 = vpack.c.bf16 %v1842_v23, %v1841_v29 }
  0x6b   : > { %1430 = vmatprep.mubr.f32.mxu1 %v448_v45  ;;  %2493 = vmatprep.subr.bf16.mxu0 %v2492_v41  ;;  %v1843_v45 = vld [vmem:[%s3573_s3 + $0x440] sm:$0xff] }
  0x6c   : > { %2244 = vmatmul.mubr.f32.gmra.mrb[10].mxu0 %v3153_v5  ;;  %2521 = vmatprep.subr.bf16.mxu1 %v2492_v41 }
  0x6d   : > { %1431 = vmatmul.mubr.f32.gmra.mrb[34].mxu1 %v3327_v10  ;;  %2495 = vmatpush3.bf16.msra.mxu0 %v2492_v41  ;;  %v1844_v10 = vld [vmem:[%s3573_s3 + $0x448] sm:$0xff] }
  0x6e   : > { %2529 = vmatpush3.bf16.msra.mxu1 %v2492_v41  ;;  %2246 = vmatprep.mubr.f32.mxu0 %v3187_v44  ;;  %v2504_v48 = vpack.c.bf16 %v1844_v10, %v1843_v45 }
  0x6f   : > { %1435 = vmatprep.mubr.f32.mxu1 %v452_v14  ;;  %2497 = vmatprep.subr.bf16.mxu0 %v2496_v51  ;;  %v1845_v14 = vld [vmem:[%s3573_s3 + $0x450] sm:$0xff] }
  0x70   : > { %2247 = vmatmul.mubr.f32.gmra.mrb[12].mxu0 %v3216_v53  ;;  %2522 = vmatprep.subr.bf16.mxu1 %v2496_v51 }
  0x71   : > { %1436 = vmatmul.mubr.f32.gmra.mrb[36].mxu1 %v3354_v36  ;;  %2499 = vmatpush3.bf16.msra.mxu0 %v2496_v51  ;;  %v1846_v36 = vld [vmem:[%s3573_s3 + $0x458] sm:$0xff] }
  0x72   : > { %2530 = vmatpush3.bf16.msra.mxu1 %v2496_v51  ;;  %2249 = vmatprep.mubr.f32.mxu0 %v3235_v54  ;;  %v2508_v19 = vpack.c.bf16 %v1846_v36, %v1845_v14 }
  0x73   : > { %1440 = vmatprep.mubr.f32.mxu1 %v456_v40  ;;  %2501 = vmatprep.subr.bf16.mxu0 %v2500_v24  ;;  %v1847_v40 = vld [vmem:[%s3573_s3 + $0x460] sm:$0xff] }
  0x74   : > { %2250 = vmatmul.mubr.f32.gmra.mrb[14].mxu0 %v3263_v20  ;;  %2523 = vmatprep.subr.bf16.mxu1 %v2500_v24  ;;  %v2512_v12 = vpack.c.bf16 %v1848_v6, %v1847_v40 }
  0x75   : > { %1441 = vmatmul.mubr.f32.gmra.mrb[38].mxu1 %v3379_v33  ;;  %2503 = vmatpush3.bf16.msra.mxu0 %v2500_v24  ;;  %v1850_v33 = vld [vmem:[%s3573_s3 + $0x478] sm:$0xff] }
  0x76   : > { %2531 = vmatpush3.bf16.msra.mxu1 %v2500_v24  ;;  %1445 = vmatprep.mubr.f32.mxu1 %v460_v38  ;;  %v1849_v38 = vld [vmem:[%s3573_s3 + $0x470] sm:$0xff] }
  0x77   : > { %2505 = vmatprep.subr.bf16.mxu0 %v2504_v48  ;;  %2524 = vmatprep.subr.bf16.mxu1 %v2504_v48 }
  0x78   : > { %2284 = vmatprep.mubr.f32.mxu0 %v3099_v18  ;;  %v2516_v18 = vpack.c.bf16 %v1850_v33, %v1849_v38 }
  0x79   : > { %1446 = vmatmul.mubr.f32.gmra.mrb[40].mxu1 %v3404_v37  ;;  %2507 = vmatpush3.bf16.msra.mxu0 %v2504_v48 }
  0x7a   : > { %2532 = vmatpush3.bf16.msra.mxu1 %v2504_v48  ;;  %1450 = vmatprep.mubr.f32.mxu1 %v464_v50 }
  0x7b   : > { %2509 = vmatprep.subr.bf16.mxu0 %v2508_v19  ;;  %2525 = vmatprep.subr.bf16.mxu1 %v2508_v19 }
  0x7d   : > { %1451 = vmatmul.mubr.f32.gmra.mrb[42].mxu1 %v3429_v2  ;;  %2511 = vmatpush3.bf16.msra.mxu0 %v2508_v19 }
  0x7e   : > { %2533 = vmatpush3.bf16.msra.mxu1 %v2508_v19  ;;  %1455 = vmatprep.mubr.f32.mxu1 %v468_v62 }
  0x7f   : > { %2513 = vmatprep.subr.bf16.mxu0 %v2512_v12  ;;  %2526 = vmatprep.subr.bf16.mxu1 %v2512_v12 }
  0x81   : > { %1456 = vmatmul.mubr.f32.gmra.mrb[44].mxu1 %v3448_v57  ;;  %2515 = vmatpush3.bf16.msra.mxu0 %v2512_v12 }
  0x82   : > { %2534 = vmatpush3.bf16.msra.mxu1 %v2512_v12  ;;  %1460 = vmatprep.mubr.f32.mxu1 %v472_v31 }
  0x83   : > { %2517 = vmatprep.subr.bf16.mxu0 %v2516_v18  ;;  %2527 = vmatprep.subr.bf16.mxu1 %v2516_v18 }
  0x85   : > { %1461 = vmatmul.mubr.f32.gmra.mrb[46].mxu1 %v1309_v4  ;;  %2519 = vmatpush3.bf16.msra.mxu0 %v2516_v18 }
  0x86   : > { %2535 = vmatpush3.bf16.msra.mxu1 %v2516_v18  ;;  %2290 = vmatprep.mubr.f32.mxu1 %v3216_v53 }
  0x88   : > { %2285 = vmatmul.mubr.f32.vlgmr.msra.gmra.mrb[8].mxu0 %v3129_v46 }
  0x89   : > { %2291 = vmatmul.mubr.f32.vlgmr.msra.gmra.mrb[48].mxu1 %v3235_v54  ;;  %2287 = vmatprep.mubr.f32.mxu0 %v3153_v5 }
  0x8a   : > { %2293 = vmatprep.mubr.f32.mxu1 %v3263_v20 }
  0x8c   : > { %2288 = vmatmul.mubr.f32.gmra.mrb[10].mxu0 %v3187_v44 }
  0x8d   : > { %2294 = vmatmul.mubr.f32.gmra.mrb[50].mxu1 %v473_v32 }
  0xfb   : > { %v2154_v46 = vpop.f32.mrb[0].mxu0 }
  0xfc   : > { %596 = vst [vmem:[%s3538_s30 + $0x8] sm:$0xff] %v2154_v46  ;;  %v556_v5 = vpop.f32.mrb[1].mxu0  ;;  %v1912_v53 = vpop.f32.mrb[0].mxu1 }
  0xfd   : > { %595 = vst [vmem:[%s3538_s30] sm:$0xff] %v556_v5  ;;  %v1913_v44 = vpop.f32.mrb[1].mxu1 }
  0xfe   : > { %v1914_v50 = vadd.f32 %v1913_v44, %v1912_v53 }
 0x100   : > { %v1915_v54 = vpop.f32.mrb[2].mxu1 }
 0x101   : > { %v1916_v35 = vpop.f32.mrb[3].mxu1 }
 0x102   : > { %v1917_v62 = vadd.f32 %v1916_v35, %v1915_v54 }
 0x103   : > { %v2157_v20 = vpop.f32.mrb[2].mxu0 }
 0x104   : > { %v1918_v27 = vpop.f32.mrb[4].mxu1  ;;  %598 = vst [vmem:[%s3538_s30 + $0x18] sm:$0xff] %v2157_v20  ;;  %v566_v8 = vpop.f32.mrb[3].mxu0 }
 0x105   : > { %v1919_v31 = vpop.f32.mrb[5].mxu1  ;;  %597 = vst [vmem:[%s3538_s30 + $0x10] sm:$0xff] %v566_v8 }
 0x106   : > { %v1920_v32 = vadd.f32 %v1919_v31, %v1918_v27 }
 0x108   : > { %v1921_v7 = vpop.f32.mrb[6].mxu1 }
 0x109   : > { %v1922_v47 = vpop.f32.mrb[7].mxu1 }
 0x10a   : > { %v1923_v21 = vadd.f32 %v1922_v47, %v1921_v7 }
 0x10b   : > { %v2160_v34 = vpop.f32.mrb[4].mxu0 }
 0x10c   : > { %v1924_v61 = vpop.f32.mrb[8].mxu1  ;;  %600 = vst [vmem:[%s3538_s30 + $0x28] sm:$0xff] %v2160_v34  ;;  %v576_v26 = vpop.f32.mrb[5].mxu0 }
 0x10d   : > { %v1925_v9 = vpop.f32.mrb[9].mxu1  ;;  %599 = vst [vmem:[%s3538_s30 + $0x20] sm:$0xff] %v576_v26 }
 0x10e   : > { %v1926_v37 = vadd.f32 %v1925_v9, %v1924_v61 }
 0x110   : > { %v1927_v60 = vpop.f32.mrb[10].mxu1 }
 0x111   : > { %v1928_v39 = vpop.f32.mrb[11].mxu1 }
 0x112   : > { %v1929_v58 = vadd.f32 %v1928_v39, %v1927_v60 }
 0x113   : > { %v2163_v0 = vpop.f32.mrb[6].mxu0 }
 0x114   : > { %602 = vst [vmem:[%s3538_s30 + $0x38] sm:$0xff] %v2163_v0  ;;  %v1930_v30 = vpop.f32.mrb[12].mxu1  ;;  %v586_v49 = vpop.f32.mrb[7].mxu0 }
 0x115   : > { %601 = vst [vmem:[%s3538_s30 + $0x30] sm:$0xff] %v586_v49  ;;  %v1931_v56 = vpop.f32.mrb[13].mxu1 }
 0x116   : > { %v1932_v13 = vadd.f32 %v1931_v56, %v1930_v30 }
 0x118   : > { %v1933_v16 = vpop.f32.mrb[14].mxu1 }
 0x119   : > { %v1934_v2 = vpop.f32.mrb[15].mxu1 }
 0x11a   : > { %v1935_v63 = vadd.f32 %v1934_v2, %v1933_v16 }
 0x11c   : > { %v1992_v1 = vpop.f32.mrb[16].mxu1 }
 0x11d   : > { %v1993_v22 = vpop.f32.mrb[17].mxu1 }
 0x11e   : > { %v1994_v3 = vadd.f32 %v1993_v22, %v1992_v1 }
 0x120   : > { %v2539_v55 = vadd.f32 %v1994_v3, %v1914_v50  ;;  %v1995_v42 = vpop.f32.mrb[18].mxu1 }
 0x121   : > { %v1996_v43 = vpop.f32.mrb[19].mxu1 }
 0x122   : > { %v1997_v57 = vadd.f32 %v1996_v43, %v1995_v42 }
 0x124   : > { %v2536_v11 = vadd.f32 %v1997_v57, %v1917_v62  ;;  %v1998_v28 = vpop.f32.mrb[20].mxu1 }
 0x125   : > { %v1999_v15 = vpop.f32.mrb[21].mxu1 }
 0x126   : > { %v2000_v59 = vadd.f32 %v1999_v15, %v1998_v28 }
 0x128   : > { %v2545_v25 = vadd.f32 %v2000_v59, %v1920_v32  ;;  %v2001_v41 = vpop.f32.mrb[22].mxu1 }
 0x129   : > { %v2002_v52 = vpop.f32.mrb[23].mxu1 }
 0x12a   : > { %v2003_v17 = vadd.f32 %v2002_v52, %v2001_v41 }
 0x12c   : > { %v2542_v51 = vadd.f32 %v2003_v17, %v1923_v21  ;;  %v2004_v29 = vpop.f32.mrb[24].mxu1 }
 0x12d   : > { %v2005_v23 = vpop.f32.mrb[25].mxu1 }
 0x12e   : > { %v2006_v24 = vadd.f32 %v2005_v23, %v2004_v29 }
 0x130   : > { %v2007_v45 = vpop.f32.mrb[26].mxu1  ;;  %v2552_v10 = vadd.f32 %v2006_v24, %v1926_v37 }
 0x131   : > { %v2008_v48 = vpop.f32.mrb[27].mxu1 }
 0x132   : > { %v2009_v14 = vadd.f32 %v2008_v48, %v2007_v45 }
 0x134   : > { %v2010_v36 = vpop.f32.mrb[28].mxu1  ;;  %v2548_v19 = vadd.f32 %v2009_v14, %v1929_v58 }
 0x135   : > { %v2011_v40 = vpop.f32.mrb[29].mxu1 }
 0x136   : > { %v2012_v6 = vadd.f32 %v2011_v40, %v2010_v36 }
 0x138   : > { %v2013_v12 = vpop.f32.mrb[30].mxu1  ;;  %v2560_v38 = vadd.f32 %v2012_v6, %v1932_v13 }
 0x139   : > { %v2014_v33 = vpop.f32.mrb[31].mxu1 }
 0x13a   : > { %v2015_v18 = vadd.f32 %v2014_v33, %v2013_v12 }
 0x13c   : > { %v2072_v4 = vpop.f32.mrb[32].mxu1  ;;  %v2556_v46 = vadd.f32 %v2015_v18, %v1935_v63 }
 0x13d   : > { %v2073_v5 = vpop.f32.mrb[33].mxu1 }
 0x13e   : > { %v2074_v53 = vadd.f32 %v2073_v5, %v2072_v4 }
 0x140   : > { %v2075_v44 = vpop.f32.mrb[34].mxu1  ;;  %v2540_v50 = vadd.f32 %v2539_v55, %v2074_v53 }
 0x141   : > { %v2076_v54 = vpop.f32.mrb[35].mxu1 }
 0x142   : > { %v2077_v35 = vadd.f32 %v2076_v54, %v2075_v44 }
 0x143   : > { %v2248_v62 = vpop.f32.mrb[12].mxu0 }
 0x144   : > { %v2549_v20 = vadd.f32 %v2548_v19, %v2248_v62  ;;  %v2078_v27 = vpop.f32.mrb[36].mxu1  ;;  %v1269_v8 = vpop.f32.mrb[13].mxu0  ;;  %v2537_v31 = vadd.f32 %v2536_v11, %v2077_v35 }
 0x145   : > { %v2553_v32 = vadd.f32 %v2552_v10, %v1269_v8  ;;  %v2079_v7 = vpop.f32.mrb[37].mxu1 }
 0x146   : > { %v2080_v47 = vadd.f32 %v2079_v7, %v2078_v27 }
 0x147   : > { %v2251_v21 = vpop.f32.mrb[14].mxu0 }
 0x148   : > { %v2557_v34 = vadd.f32 %v2556_v46, %v2251_v21  ;;  %v2081_v61 = vpop.f32.mrb[38].mxu1  ;;  %v1279_v26 = vpop.f32.mrb[15].mxu0  ;;  %v2546_v9 = vadd.f32 %v2545_v25, %v2080_v47 }
 0x149   : > { %v2561_v37 = vadd.f32 %v2560_v38, %v1279_v26  ;;  %v2082_v60 = vpop.f32.mrb[39].mxu1 }
 0x14a   : > { %v2083_v39 = vadd.f32 %v2082_v60, %v2081_v61 }
 0x14c   : > { %v2084_v58 = vpop.f32.mrb[40].mxu1  ;;  %v2543_v0 = vadd.f32 %v2542_v51, %v2083_v39 }
 0x14d   : > { %v2085_v30 = vpop.f32.mrb[41].mxu1 }
 0x14e   : > { %v2086_v49 = vadd.f32 %v2085_v30, %v2084_v58 }
 0x150   : > { %v2087_v56 = vpop.f32.mrb[42].mxu1  ;;  %v2554_v13 = vadd.f32 %v2553_v32, %v2086_v49 }
 0x151   : > { %v2088_v16 = vpop.f32.mrb[43].mxu1 }
 0x152   : > { %v2089_v2 = vadd.f32 %v2088_v16, %v2087_v56 }
 0x154   : > { %v2090_v63 = vpop.f32.mrb[44].mxu1  ;;  %v2550_v1 = vadd.f32 %v2549_v20, %v2089_v2 }
 0x155   : > { %v2091_v22 = vpop.f32.mrb[45].mxu1 }
 0x156   : > { %v2092_v3 = vadd.f32 %v2091_v22, %v2090_v63 }
 0x158   : > { %v2093_v55 = vpop.f32.mrb[46].mxu1  ;;  %v2562_v42 = vadd.f32 %v2561_v37, %v2092_v3 }
 0x159   : > { %v2094_v43 = vpop.f32.mrb[47].mxu1 }
 0x15a   : > { %v2095_v57 = vadd.f32 %v2094_v43, %v2093_v55 }
 0x15b   : > { %v2286_v11 = vpop.f32.mrb[8].mxu0 }
 0x15c   : > { %v2538_v28 = vadd.f32 %v2537_v31, %v2286_v11  ;;  %v2292_v15 = vpop.f32.mrb[48].mxu1  ;;  %v1532_v59 = vpop.f32.mrb[9].mxu0  ;;  %v2558_v25 = vadd.f32 %v2557_v34, %v2095_v57 }
 0x15d   : > { %v2551_v41 = vadd.f32 %v2550_v1, %v2292_v15  ;;  %v2541_v52 = vadd.f32 %v2540_v50, %v1532_v59  ;;  %v1552_v17 = vpop.f32.mrb[49].mxu1 }
 0x15e   : > { %1580 = vst [vmem:[%s3553_s10 + $0x8] sm:$0xff] %v2538_v28  ;;  %v1601_v51 = vmul.f32 %v2538_v28, %v2538_v28  ;;  %v2555_v29 = vadd.f32 %v2554_v13, %v1552_v17 }
 0x15f   : > { %1584 = vst [vmem:[%s3553_s10 + $0x28] sm:$0xff] %v2551_v41  ;;  %1579 = vst [vmem:[%s3553_s10] sm:$0xff] %v2541_v52  ;;  %v1587_v23 = vadd.f32 %v2541_v52, %v2538_v28  ;;  %v1600_v24 = vmul.f32 %v2541_v52, %v2541_v52  ;;  %v2289_v45 = vpop.f32.mrb[10].mxu0  ;;  %v1605_v50 = vmul.f32 %v2551_v41, %v2551_v41 }
 0x160   : > { %1583 = vst [vmem:[%s3553_s10 + $0x20] sm:$0xff] %v2555_v29  ;;  %v2544_v10 = vadd.f32 %v2543_v0, %v2289_v45  ;;  %v2295_v48 = vpop.f32.mrb[50].mxu1  ;;  %v1542_v14 = vpop.f32.mrb[11].mxu0  ;;  %v1604_v5 = vmul.f32 %v2555_v29, %v2555_v29 }
 0x161   : > { %v1608_v36 = vadd.f32 %v1601_v51, %v1600_v24  ;;  %v2559_v19 = vadd.f32 %v2558_v25, %v2295_v48  ;;  %v2547_v40 = vadd.f32 %v2546_v9, %v1542_v14  ;;  %v1562_v6 = vpop.f32.mrb[51].mxu1 }
 0x162   : > { %1582 = vst [vmem:[%s3553_s10 + $0x18] sm:$0xff] %v2544_v10  ;;  %v2563_v12 = vadd.f32 %v2562_v42, %v1562_v6  ;;  %v1603_v18 = vmul.f32 %v2544_v10, %v2544_v10 }
 0x163   : > { %1586 = vst [vmem:[%s3553_s10 + $0x38] sm:$0xff] %v2559_v19  ;;  %1581 = vst [vmem:[%s3553_s10 + $0x10] sm:$0xff] %v2547_v40  ;;  %v1588_v38 = vadd.f32 %v2547_v40, %v1587_v23  ;;  %v1602_v33 = vmul.f32 %v2547_v40, %v2547_v40  ;;  %v1607_v8 = vmul.f32 %v2559_v19, %v2559_v19 }
 0x164   : > { %1585 = vst [vmem:[%s3553_s10 + $0x30] sm:$0xff] %v2563_v12  ;;  %v1606_v20 = vmul.f32 %v2563_v12, %v2563_v12 }
 0x165   : > { %v1589_v4 = vadd.f32 %v2544_v10, %v1588_v38  ;;  %v1609_v46 = vadd.f32 %v1608_v36, %v1602_v33 }
 0x167   : > { %v1610_v53 = vadd.f32 %v1609_v46, %v1603_v18  ;;  %v1590_v44 = vadd.f32 %v2555_v29, %v1589_v4 }
 0x169   : > { %v1591_v54 = vadd.f32 %v2551_v41, %v1590_v44  ;;  %v1611_v35 = vadd.f32 %v1610_v53, %v1604_v5 }
 0x16b   : > { %v1592_v62 = vadd.f32 %v2563_v12, %v1591_v54  ;;  %v1612_v27 = vadd.f32 %v1611_v35, %v1605_v50 }
 0x16d   : > { %v1593_v31 = vadd.f32 %v2559_v19, %v1592_v62  ;;  %v1613_v32 = vadd.f32 %v1612_v27, %v1606_v20 }
 0x16f   : > { %v1594_v7 = vrot.slane %v1593_v31, 4  ;;  %v1614_v47 = vadd.f32 %v1613_v32, %v1607_v8 }
 0x171   : > { %v1595_v21 = vadd.f32 %v1594_v7, %v1593_v31  ;;  %v1615_v34 = vrot.slane %v1614_v47, 4 }
 0x173   : > { %v1596_v61 = vrot.slane %v1595_v21, 2  ;;  %v1616_v26 = vadd.f32 %v1615_v34, %v1614_v47 }
 0x175   : > { %v1597_v9 = vadd.f32 %v1596_v61, %v1595_v21  ;;  %v1617_v37 = vrot.slane %v1616_v26, 2 }
 0x177   : > { %v1598_v60 = vrot.slane %v1597_v9, 1  ;;  %v1618_v39 = vadd.f32 %v1617_v37, %v1616_v26 }
 0x179   : > { %v1619_v58 = vrot.slane %v1618_v39, 1  ;;  %v1599_v0 = vadd.f32 %v1598_v60, %v1597_v9 }
 0x17b   : > { %v1620_v30 = vadd.f32 %v1619_v58, %v1618_v39 }
 0x17d   : > { %v1622_v49 = vsel %vm1621_vm0, %v1599_v0, %v1620_v30 }
 0x17e   : > { %1623 = vst [vmem:[%s296_s13] sm:$0x3] %v1622_v49 }
 0x17f PF: > { %s18_s24 = sadd.s32 1, %s2592_s24  }
 0x180   : > { %p15_p4 = scmp.ge.s32.totalorder %s18_s24, 4  }
 0x182   :  { %17 = sbr.rel (!%p15_p4) target bundleno = 1 (0x1), region = 98 }

// kernel: network_block_forward.7
= control target key start
LH: loop header
LB: loop body
LE: loop exit
PB: predicated region body
PF: predicated region fallthrough
CT: control target
= control target key end

     0   :  { %s2221_s21 = smov 0   ;;  %s2911_s0 = inlined_call_operand.vmem [shape: f32[2,8,8,128], index: 0, kind: input, shape index: {}]   ;;  %s2912_s1 = inlined_call_operand.vmem [shape: f32[1,128], index: 1, kind: input, shape index: {}]   ;;  %s2913_s2 = inlined_call_operand.vmem [shape: f32[1,128], index: 2, kind: input, shape index: {}]   ;;  %s2914_s3 = inlined_call_operand.vmem [shape: f32[3,384,128], index: 3, kind: input, shape index: {}]   ;;  %s2915_s4 = inlined_call_operand.vmem [shape: f32[2,8,8,128], index: 4, kind: input, shape index: {}]   ;;  %s2916_s5 = inlined_call_operand.vmem [shape: f32[2,8,8,128], index: 5, kind: output, shape index: {0}]   ;;  %s2917_s6 = inlined_call_operand.vmem [shape: f32[2,2,128], index: 6, kind: output, shape index: {1}]  }
   0x1 LB: > { %s1441_s22 = sadd.s32 4294967295, %s2183_s21   ;;  %p1445_p0 = scmp.ge.s32.totalorder %s2183_s21, 1  ;;  %s2183_s21 = sphi %s2221_s21, %s17_s21  }
   0x2   : > { %p225_p1 = scmp.lt.s32.totalorder %s2183_s21, 3 }
   0x4   : > { %p226_p2 = pnand %p1445_p0, %p225_p1 }
   0x5   : > { %v465_v0 = vld [vmem:[%s2914_s3 + $0x80] sm:$0xff] (!%p226_p2)  ;;  %v466_v1 = vld [vmem:[%s2914_s3 + $0x88] sm:$0xff] (!%p226_p2)  ;;  %v2185_v7 = vmov (!%p226_p2), 0.0   ;;  %v467_v10 = vld [vmem:[%s2914_s3 + $0x90] sm:$0xff] (!%p226_p2)  ;;  %p2285_p3 = scmp.lt.s32.totalorder (!%p226_p2), %s1441_s22, 1  ;;  %vm1340_vm0 = vcmask (!%p226_p2), 1040384  }
   0x6   : > { %229 = sbr.rel (%p226_p2) target bundleno = 370 (0x172), region = 40  ;;  %v481_v2 = vld [vmem:[%s2914_s3 + $0x100] sm:$0xff] (!%p226_p2)  ;;  %v1928_v3 = vpack.c.bf16 (!%p226_p2), %v466_v1, %v465_v0  ;;  %v482_v4 = vld [vmem:[%s2914_s3 + $0x108] sm:$0xff] (!%p226_p2)  ;;  %561 = vmatprep.mubr.f32.mxu0 (!%p226_p2), %v2185_v7  ;;  %385 = vst [vmem:[#allocation2 + $0x18] sm:$0x1] (!%p226_p2), %v2185_v7  ;;  %1828 = vmatprep.mubr.f32.mxu1 (!%p226_p2), %v2185_v7  ;;  %v468_v11 = vld [vmem:[%s2914_s3 + $0x98] sm:$0xff] (!%p226_p2) }
   0x7   : > { %v449_v5 = vld [vmem:[%s2914_s3] sm:$0xff] (!%p226_p2)  ;;  %v450_v6 = vld [vmem:[%s2914_s3 + $0x8] sm:$0xff] (!%p226_p2)  ;;  %386 = vst [vmem:[#allocation2 + $0x30] sm:$0x1] (!%p226_p2), %v2185_v7  ;;  %387 = vst [vmem:[#allocation2 + $0x48] sm:$0x1] (!%p226_p2), %v2185_v7  ;;  %v1960_v8 = vpack.c.bf16 (!%p226_p2), %v482_v4, %v481_v2  ;;  %v1932_v13 = vpack.c.bf16 (!%p226_p2), %v468_v11, %v467_v10 }
   0x8   : > { %388 = vst [vmem:[#allocation2 + $0x60] sm:$0x1] (!%p226_p2), %v2185_v7  ;;  %389 = vst [vmem:[#allocation2 + $0x78] sm:$0x1] (!%p226_p2), %v2185_v7  ;;  %v1930_v9 = vpack.c.bf16 (!%p226_p2), %v450_v6, %v449_v5  ;;  %v483_v12 = vld [vmem:[%s2914_s3 + $0x110] sm:$0xff] (!%p226_p2)  ;;  %1929 = vmatprep.subr.bf16.mxu0 (!%p226_p2), %v1928_v3  ;;  %v484_v14 = vld [vmem:[%s2914_s3 + $0x118] sm:$0xff] (!%p226_p2) }
   0x9   : > { %390 = vst [vmem:[#allocation2 + $0x90] sm:$0x1] (!%p226_p2), %v2185_v7  ;;  %391 = vst [vmem:[#allocation2 + $0xa8] sm:$0x1] (!%p226_p2), %v2185_v7  ;;  %v451_v15 = vld [vmem:[%s2914_s3 + $0x10] sm:$0xff] (!%p226_p2)  ;;  %v452_v16 = vld [vmem:[%s2914_s3 + $0x18] sm:$0xff] (!%p226_p2)  ;;  %1961 = vmatprep.subr.bf16.mxu1 (!%p226_p2), %v1960_v8  ;;  %v1964_v17 = vpack.c.bf16 (!%p226_p2), %v484_v14, %v483_v12 }
   0xa   : > { %392 = vst [vmem:[#allocation2 + $0xc0] sm:$0x1] (!%p226_p2), %v2185_v7  ;;  %417 = vst [vmem:[#allocation2 + $0x2f] sm:$0x1] (!%p226_p2), %v2185_v7  ;;  %1931 = vmatpush3.bf16.msra.mxu0 (!%p226_p2), %v1930_v9  ;;  %v1934_v18 = vpack.c.bf16 (!%p226_p2), %v452_v16, %v451_v15  ;;  %v469_v19 = vld [vmem:[%s2914_s3 + $0xa0] sm:$0xff] (!%p226_p2)  ;;  %v470_v20 = vld [vmem:[%s2914_s3 + $0xa8] sm:$0xff] (!%p226_p2)  ;;  %1963 = vmatpush3.bf16.msra.mxu1 (!%p226_p2), %v1960_v8 }
   0xb   : > { %418 = vst [vmem:[#allocation2 + $0x47] sm:$0x1] (!%p226_p2), %v2185_v7  ;;  %419 = vst [vmem:[#allocation2 + $0x5f] sm:$0x1] (!%p226_p2), %v2185_v7  ;;  %v485_v21 = vld [vmem:[%s2914_s3 + $0x120] sm:$0xff] (!%p226_p2)  ;;  %1933 = vmatprep.subr.bf16.mxu0 (!%p226_p2), %v1932_v13  ;;  %v1936_v22 = vpack.c.bf16 (!%p226_p2), %v470_v20, %v469_v19  ;;  %v486_v23 = vld [vmem:[%s2914_s3 + $0x128] sm:$0xff] (!%p226_p2)  ;;  %1965 = vmatprep.subr.bf16.mxu1 (!%p226_p2), %v1964_v17 }
   0xc   : > { %420 = vst [vmem:[#allocation2 + $0x77] sm:$0x1] (!%p226_p2), %v2185_v7  ;;  %421 = vst [vmem:[#allocation2 + $0x8f] sm:$0x1] (!%p226_p2), %v2185_v7  ;;  %v453_v24 = vld [vmem:[%s2914_s3 + $0x20] sm:$0xff] (!%p226_p2)  ;;  %v454_v25 = vld [vmem:[%s2914_s3 + $0x28] sm:$0xff] (!%p226_p2)  ;;  %v1968_v26 = vpack.c.bf16 (!%p226_p2), %v486_v23, %v485_v21 }
   0xd   : > { %422 = vst [vmem:[#allocation2 + $0xa7] sm:$0x1] %v2185_v7  ;;  %423 = vst [vmem:[#allocation2 + $0xbf] sm:$0x1] %v2185_v7  ;;  %v471_v27 = vld [vmem:[%s2914_s3 + $0xb0] sm:$0xff]  ;;  %v472_v28 = vld [vmem:[%s2914_s3 + $0xb8] sm:$0xff]  ;;  %v1938_v31 = vpack.c.bf16 %v454_v25, %v453_v24 }
   0xe   : > { %424 = vst [vmem:[#allocation2 + $0xd7] sm:$0x1] %v2185_v7  ;;  %v487_v29 = vld [vmem:[%s2914_s3 + $0x130] sm:$0xff]  ;;  %v488_v30 = vld [vmem:[%s2914_s3 + $0x138] sm:$0xff]  ;;  %s2920_s22 = smov (!%p2285_p3, %s1441_s22), 1  ;;  %1935 = vmatpush3.bf16.msra.mxu0 %v1934_v18  ;;  %1967 = vmatpush3.bf16.msra.mxu1 %v1964_v17  ;;  %v1940_v32 = vpack.c.bf16 %v472_v28, %v471_v27  ;;  %v473_v36 = vld [vmem:[%s2914_s3 + $0xc0] sm:$0xff] }
   0xf   : > { %1937 = vmatprep.subr.bf16.mxu0 %v1936_v22  ;;  %v455_v33 = vld [vmem:[%s2914_s3 + $0x30] sm:$0xff]  ;;  %v456_v34 = vld [vmem:[%s2914_s3 + $0x38] sm:$0xff]  ;;  %1969 = vmatprep.subr.bf16.mxu1 %v1968_v26  ;;  %v1972_v35 = vpack.c.bf16 %v488_v30, %v487_v29  ;;  %v474_v37 = vld [vmem:[%s2914_s3 + $0xc8] sm:$0xff]  ;;  %s2344_s12 = sshll.u32 %s2920_s22, 6 }
  0x10   : > { %v489_v38 = vld [vmem:[%s2914_s3 + $0x140] sm:$0xff]  ;;  %v490_v39 = vld [vmem:[%s2914_s3 + $0x148] sm:$0xff]  ;;  %v1942_v40 = vpack.c.bf16 %v456_v34, %v455_v33  ;;  %v1944_v41 = vpack.c.bf16 %v474_v37, %v473_v36  ;;  %v475_v45 = vld [vmem:[%s2914_s3 + $0xd0] sm:$0xff]  ;;  %s2362_s26 = scalar_lea.vmem %s2911_s0, %s2344_s12  ;;  %s2868_s7 = scalar_lea.vmem %s2915_s4, %s2344_s12 }
  0x11   : > { %v457_v42 = vld [vmem:[%s2914_s3 + $0x40] sm:$0xff]  ;;  %v458_v43 = vld [vmem:[%s2914_s3 + $0x48] sm:$0xff]  ;;  %v1976_v44 = vpack.c.bf16 %v490_v39, %v489_v38  ;;  %v476_v46 = vld [vmem:[%s2914_s3 + $0xd8] sm:$0xff]  ;;  %s2890_s9 = scalar_lea.vmem %s2916_s5, %s2344_s12  ;;  %s1452_s12 = sshll.u32 %s2920_s22, 1 }
  0x12   : > { %1939 = vmatpush3.bf16.msra.mxu0 %v1938_v31  ;;  %1971 = vmatpush3.bf16.msra.mxu1 %v1968_v26  ;;  %v491_v47 = vld [vmem:[%s2914_s3 + $0x150] sm:$0xff]  ;;  %v492_v48 = vld [vmem:[%s2914_s3 + $0x158] sm:$0xff]  ;;  %v1946_v49 = vpack.c.bf16 %v458_v43, %v457_v42  ;;  %v1948_v51 = vpack.c.bf16 %v476_v46, %v475_v45  ;;  %v283_v53 = vld [vmem:[%s2362_s26] sm:$0xff]  ;;  %s282_s13 = scalar_lea.vmem %s2917_s6, %s1452_s12 }
  0x13   : > { %1941 = vmatprep.subr.bf16.mxu0 %v1940_v32  ;;  %1973 = vmatprep.subr.bf16.mxu1 %v1972_v35  ;;  %v459_v50 = vld [vmem:[%s2914_s3 + $0x50] sm:$0xff]  ;;  %v460_v52 = vld [vmem:[%s2914_s3 + $0x58] sm:$0xff]  ;;  %v2380_v54 = vld [vmem:[%s2912_s1] ss:$0 sm:$0xff]  ;;  %v1980_v55 = vpack.c.bf16 %v492_v48, %v491_v47 }
  0x14   : > { %v477_v56 = vld [vmem:[%s2914_s3 + $0xe0] sm:$0xff]  ;;  %v478_v57 = vld [vmem:[%s2914_s3 + $0xe8] sm:$0xff]  ;;  %v298_v58 = vmul.f32 %v2380_v54, %v283_v53  ;;  %v1950_v62 = vpack.c.bf16 %v460_v52, %v459_v50  ;;  %v479_v5 = vld [vmem:[%s2914_s3 + $0xf0] sm:$0xff] }
  0x15   : > { %v2392_v59 = vld [vmem:[%s2913_s2] ss:$0 sm:$0xff]  ;;  %v494_v61 = vld [vmem:[%s2914_s3 + $0x168] sm:$0xff]  ;;  %v1952_v0 = vpack.c.bf16 %v478_v57, %v477_v56  ;;  %v480_v6 = vld [vmem:[%s2914_s3 + $0xf8] sm:$0xff] }
  0x16   : > { %1943 = vmatpush3.bf16.msra.mxu0 %v1942_v40  ;;  %1975 = vmatpush3.bf16.msra.mxu1 %v1972_v35  ;;  %v493_v60 = vld [vmem:[%s2914_s3 + $0x160] sm:$0xff]  ;;  %v313_v63 = vadd.f32 %v2392_v59, %v298_v58  ;;  %v462_v2 = vld [vmem:[%s2914_s3 + $0x68] sm:$0xff]  ;;  %v495_v10 = vld [vmem:[%s2914_s3 + $0x170] sm:$0xff]  ;;  %v1956_v17 = vpack.c.bf16 %v480_v6, %v479_v5 }
  0x17   : > { %1945 = vmatprep.subr.bf16.mxu0 %v1944_v41  ;;  %1977 = vmatprep.subr.bf16.mxu1 %v1976_v44  ;;  %v461_v1 = vld [vmem:[%s2914_s3 + $0x60] sm:$0xff]  ;;  %v284_v3 = vld [vmem:[%s2362_s26 + $0x8] sm:$0xff]  ;;  %v1984_v4 = vpack.c.bf16 %v494_v61, %v493_v60  ;;  %v496_v11 = vld [vmem:[%s2914_s3 + $0x178] sm:$0xff] }
  0x18   : > { %v2414_v8 = vmax.f32 %v313_v63, 0.0  ;;  %v299_v9 = vmul.f32 %v2380_v54, %v284_v3  ;;  %v285_v12 = vld [vmem:[%s2362_s26 + $0x10] sm:$0xff]  ;;  %v1954_v13 = vpack.c.bf16 %v462_v2, %v461_v1  ;;  %v464_v19 = vld [vmem:[%s2914_s3 + $0x78] sm:$0xff]  ;;  %v1988_v22 = vpack.c.bf16 %v496_v11, %v495_v10  ;;  %v1471_v23 = vld [vmem:[%s2914_s3 + $0x200] sm:$0xff] }
  0x19   : > { %v463_v18 = vld [vmem:[%s2914_s3 + $0x70] sm:$0xff]  ;;  %v300_v20 = vmul.f32 %v2380_v54, %v285_v12  ;;  %v286_v21 = vld [vmem:[%s2362_s26 + $0x18] sm:$0xff]  ;;  %v1472_v24 = vld [vmem:[%s2914_s3 + $0x208] sm:$0xff] }
  0x1a   : > { %1947 = vmatpush3.bf16.msra.mxu0 %v1946_v49  ;;  %1979 = vmatpush3.bf16.msra.mxu1 %v1976_v44  ;;  %v393_v14 = vrot.slane %v2414_v8, 1  ;;  %v361_v15 = vrot.slane %v2414_v8, 7  ;;  %v314_v16 = vadd.f32 %v2392_v59, %v299_v9  ;;  %v301_v26 = vmul.f32 %v2380_v54, %v286_v21  ;;  %v1487_v27 = vld [vmem:[%s2914_s3 + $0x280] sm:$0xff]  ;;  %v1488_v28 = vld [vmem:[%s2914_s3 + $0x288] sm:$0xff]  ;;  %v1473_v41 = vld [vmem:[%s2914_s3 + $0x210] sm:$0xff] }
  0x1b   : > { %1949 = vmatprep.subr.bf16.mxu0 %v1948_v51  ;;  %1981 = vmatprep.subr.bf16.mxu1 %v1980_v55  ;;  %v315_v29 = vadd.f32 %v2392_v59, %v300_v20  ;;  %v1958_v30 = vpack.c.bf16 %v464_v19, %v463_v18  ;;  %v287_v33 = vld [vmem:[%s2362_s26 + $0x20] sm:$0xff]  ;;  %v1992_v34 = vpack.c.bf16 %v1472_v24, %v1471_v23  ;;  %v1456_v36 = vld [vmem:[%s2914_s3 + $0x188] sm:$0xff]  ;;  %v1474_v44 = vld [vmem:[%s2914_s3 + $0x218] sm:$0xff] }
  0x1c   : > { %409 = vst [vmem:[#allocation2 + $0x28] sm:$0x7f] %v393_v14  ;;  %377 = vst [vmem:[#allocation2 + $0x18] sm:$0xfe] %v361_v15  ;;  %v2441_v25 = vmax.f32 %v314_v16, 0.0  ;;  %v316_v32 = vadd.f32 %v2392_v59, %v301_v26  ;;  %v1455_v35 = vld [vmem:[%s2914_s3 + $0x180] sm:$0xff]  ;;  %v302_v38 = vmul.f32 %v2380_v54, %v287_v33  ;;  %v2024_v40 = vpack.c.bf16 %v1488_v28, %v1487_v27 }
  0x1d   : > { %v2460_v37 = vmax.f32 %v315_v29, 0.0  ;;  %v288_v43 = vld [vmem:[%s2362_s26 + $0x28] sm:$0xff]  ;;  %v1489_v45 = vld [vmem:[%s2914_s3 + $0x290] sm:$0xff]  ;;  %v1490_v46 = vld [vmem:[%s2914_s3 + $0x298] sm:$0xff]  ;;  %v1994_v50 = vpack.c.bf16 %v1456_v36, %v1455_v35 }
  0x1e   : > { %1951 = vmatpush3.bf16.msra.mxu0 %v1950_v62  ;;  %1983 = vmatpush3.bf16.msra.mxu1 %v1980_v55  ;;  %v362_v31 = vrot.slane %v2441_v25, 7  ;;  %v394_v39 = vrot.slane %v2441_v25, 1  ;;  %v2467_v42 = vmax.f32 %v316_v32, 0.0  ;;  %v317_v48 = vadd.f32 %v2392_v59, %v302_v38  ;;  %v289_v55 = vld [vmem:[%s2362_s26 + $0x30] sm:$0xff]  ;;  %v1458_v58 = vld [vmem:[%s2914_s3 + $0x198] sm:$0xff]  ;;  %v1476_v1 = vld [vmem:[%s2914_s3 + $0x228] sm:$0xff] }
  0x1f   : > { %1953 = vmatprep.subr.bf16.mxu0 %v1952_v0  ;;  %1985 = vmatprep.subr.bf16.mxu1 %v1984_v4  ;;  %v363_v47 = vrot.slane %v2460_v37, 7  ;;  %v395_v49 = vrot.slane %v2460_v37, 1  ;;  %v303_v52 = vmul.f32 %v2380_v54, %v288_v43  ;;  %v1457_v57 = vld [vmem:[%s2914_s3 + $0x190] sm:$0xff]  ;;  %v304_v61 = vmul.f32 %v2380_v54, %v289_v55  ;;  %v1475_v0 = vld [vmem:[%s2914_s3 + $0x220] sm:$0xff]  ;;  %v1460_v15 = vld [vmem:[%s2914_s3 + $0x1a8] sm:$0xff] }
  0x20   : > { %378 = vst [vmem:[#allocation2 + $0x30] sm:$0xfe] %v362_v31  ;;  %410 = vst [vmem:[#allocation2 + $0x40] sm:$0x7f] %v394_v39  ;;  %v364_v51 = vrot.slane %v2467_v42, 7  ;;  %v396_v53 = vrot.slane %v2467_v42, 1  ;;  %v1996_v62 = vpack.c.bf16 %v1474_v44, %v1473_v41  ;;  %v2028_v63 = vpack.c.bf16 %v1490_v46, %v1489_v45 }
  0x21   : > { %379 = vst [vmem:[#allocation2 + $0x48] sm:$0xfe] %v363_v47  ;;  %v2494_v60 = vmax.f32 %v317_v48, 0.0  ;;  %411 = vst [vmem:[#allocation2 + $0x58] sm:$0x7f] %v395_v49  ;;  %v318_v2 = vadd.f32 %v2392_v59, %v303_v52  ;;  %v1491_v3 = vld [vmem:[%s2914_s3 + $0x2a0] sm:$0xff]  ;;  %v319_v9 = vadd.f32 %v2392_v59, %v304_v61  ;;  %v1998_v11 = vpack.c.bf16 %v1458_v58, %v1457_v57 }
  0x22   : > { %1955 = vmatpush3.bf16.msra.mxu0 %v1954_v13  ;;  %1987 = vmatpush3.bf16.msra.mxu1 %v1984_v4  ;;  %380 = vst [vmem:[#allocation2 + $0x60] sm:$0xfe] %v364_v51  ;;  %412 = vst [vmem:[#allocation2 + $0x70] sm:$0x7f] %v396_v53  ;;  %v1492_v4 = vld [vmem:[%s2914_s3 + $0x2a8] sm:$0xff]  ;;  %v2000_v13 = vpack.c.bf16 %v1476_v1, %v1475_v0  ;;  %v1459_v14 = vld [vmem:[%s2914_s3 + $0x1a0] sm:$0xff] }
  0x23   : > { %1957 = vmatprep.subr.bf16.mxu0 %v1956_v17  ;;  %1989 = vmatprep.subr.bf16.mxu1 %v1988_v22  ;;  %v2486_v56 = vld [vmem:[#allocation2 + $0x28] sm:$0xff]  ;;  %v365_v5 = vrot.slane %v2494_v60, 7  ;;  %v397_v6 = vrot.slane %v2494_v60, 1  ;;  %v2515_v10 = vld [vmem:[#allocation2 + $0x18] sm:$0xff]  ;;  %v2517_v12 = vmax.f32 %v318_v2, 0.0  ;;  %v2526_v16 = vmax.f32 %v319_v9, 0.0 }
  0x24   : > { %v2032_v17 = vpack.c.bf16 %v1492_v4, %v1491_v3  ;;  %v1477_v18 = vld [vmem:[%s2914_s3 + $0x230] sm:$0xff]  ;;  %v1478_v19 = vld [vmem:[%s2914_s3 + $0x238] sm:$0xff]  ;;  %v2002_v29 = vpack.c.bf16 %v1460_v15, %v1459_v14  ;;  %v1479_v36 = vld [vmem:[%s2914_s3 + $0x240] sm:$0xff] }
  0x25   : > { %381 = vst [vmem:[#allocation2 + $0x78] sm:$0xfe] %v365_v5  ;;  %413 = vst [vmem:[#allocation2 + $0x88] sm:$0x7f] %v397_v6  ;;  %v366_v21 = vrot.slane %v2517_v12, 7  ;;  %v1493_v23 = vld [vmem:[%s2914_s3 + $0x2b0] sm:$0xff]  ;;  %v2004_v31 = vpack.c.bf16 %v1478_v19, %v1477_v18 }
  0x26   : > { %1959 = vmatpush3.bf16.msra.mxu0 %v1958_v30  ;;  %1991 = vmatpush3.bf16.msra.mxu1 %v1988_v22  ;;  %v398_v22 = vrot.slane %v2517_v12, 1  ;;  %v1494_v24 = vld [vmem:[%s2914_s3 + $0x2b8] sm:$0xff]  ;;  %v367_v26 = vrot.slane %v2526_v16, 7  ;;  %v399_v27 = vrot.slane %v2526_v16, 1  ;;  %v1461_v32 = vld [vmem:[%s2914_s3 + $0x1b0] sm:$0xff]  ;;  %v1480_v38 = vld [vmem:[%s2914_s3 + $0x248] sm:$0xff] }
  0x27   : > { %1993 = vmatprep.subr.bf16.mxu0 %v1992_v34  ;;  %2025 = vmatprep.subr.bf16.mxu1 %v2024_v40  ;;  %v2534_v20 = vld [vmem:[#allocation2 + $0x40] sm:$0xff]  ;;  %v2549_v28 = vld [vmem:[#allocation2 + $0x30] sm:$0xff]  ;;  %382 = vst [vmem:[#allocation2 + $0x90] sm:$0xfe] %v366_v21  ;;  %v1462_v33 = vld [vmem:[%s2914_s3 + $0x1b8] sm:$0xff]  ;;  %v2036_v35 = vpack.c.bf16 %v1494_v24, %v1493_v23  ;;  %v2008_v45 = vpack.c.bf16 %v1480_v38, %v1479_v36 }
  0x28   : > { %v2551_v30 = vld [vmem:[#allocation2 + $0x58] sm:$0xff]  ;;  %414 = vst [vmem:[#allocation2 + $0xa0] sm:$0x7f] %v398_v22  ;;  %383 = vst [vmem:[#allocation2 + $0xa8] sm:$0xfe] %v367_v26  ;;  %v1495_v39 = vld [vmem:[%s2914_s3 + $0x2c0] sm:$0xff]  ;;  %v2006_v43 = vpack.c.bf16 %v1462_v33, %v1461_v32 }
  0x29   : > { %562 = vmatmul.mubr.f32.vlgmr.msra.gmra.mrb[0].mxu0 %v2185_v7  ;;  %1829 = vmatmul.mubr.f32.vlgmr.msra.gmra.mrb[0].mxu1 %v2486_v56  ;;  %v2559_v34 = vld [vmem:[#allocation2 + $0x70] sm:$0xff]  ;;  %415 = vst [vmem:[#allocation2 + $0xb8] sm:$0x7f] %v399_v27  ;;  %v2577_v41 = vld [vmem:[#allocation2 + $0x48] sm:$0xff]  ;;  %v1463_v46 = vld [vmem:[%s2914_s3 + $0x1c0] sm:$0xff] }
  0x2a   : > { %1995 = vmatpush3.bf16.msra.mxu0 %v1994_v50  ;;  %2027 = vmatpush3.bf16.msra.mxu1 %v2024_v40  ;;  %v1496_v40 = vld [vmem:[%s2914_s3 + $0x2c8] sm:$0xff]  ;;  %v1481_v49 = vld [vmem:[%s2914_s3 + $0x250] sm:$0xff]  ;;  %v1482_v50 = vld [vmem:[%s2914_s3 + $0x258] sm:$0xff] }
  0x2b   : > { %566 = vmatprep.mubr.f32.mxu0 %v2414_v8  ;;  %1997 = vmatprep.subr.bf16.mxu0 %v1996_v62  ;;  %v1464_v47 = vld [vmem:[%s2914_s3 + $0x1c8] sm:$0xff]  ;;  %v2040_v48 = vpack.c.bf16 %v1496_v40, %v1495_v39  ;;  %v1497_v51 = vld [vmem:[%s2914_s3 + $0x2d0] sm:$0xff]  ;;  %v1498_v52 = vld [vmem:[%s2914_s3 + $0x2d8] sm:$0xff]  ;;  %v2012_v61 = vpack.c.bf16 %v1482_v50, %v1481_v49 }
  0x2c   : > { %2029 = vmatprep.subr.bf16.mxu1 %v2028_v63  ;;  %1831 = vmatprep.mubr.f32.mxu1 %v2534_v20  ;;  %v2579_v44 = vld [vmem:[#allocation2 + $0x88] sm:$0xff]  ;;  %v2604_v55 = vld [vmem:[#allocation2 + $0x60] sm:$0xff]  ;;  %v2010_v57 = vpack.c.bf16 %v1464_v47, %v1463_v46  ;;  %v1465_v62 = vld [vmem:[%s2914_s3 + $0x1d0] sm:$0xff]  ;;  %v2044_v0 = vpack.c.bf16 %v1498_v52, %v1497_v51 }
  0x2d   : > { %567 = vmatmul.mubr.f32.gmra.mrb[2].mxu0 %v2515_v10  ;;  %1832 = vmatmul.mubr.f32.gmra.mrb[2].mxu1 %v2551_v30  ;;  %v1483_v1 = vld [vmem:[%s2914_s3 + $0x260] sm:$0xff]  ;;  %v1484_v2 = vld [vmem:[%s2914_s3 + $0x268] sm:$0xff]  ;;  %v2630_v5 = vld [vmem:[#allocation2 + $0x78] sm:$0xff] }
  0x2e   : > { %1999 = vmatpush3.bf16.msra.mxu0 %v1998_v11  ;;  %571 = vmatprep.mubr.f32.mxu0 %v2441_v25  ;;  %v1499_v3 = vld [vmem:[%s2914_s3 + $0x2e0] sm:$0xff]  ;;  %v1500_v4 = vld [vmem:[%s2914_s3 + $0x2e8] sm:$0xff]  ;;  %v2016_v9 = vpack.c.bf16 %v1484_v2, %v1483_v1  ;;  %v290_v14 = vld [vmem:[%s2362_s26 + $0x38] sm:$0xff] }
  0x2f   : > { %2031 = vmatpush3.bf16.msra.mxu1 %v2028_v63  ;;  %2001 = vmatprep.subr.bf16.mxu0 %v2000_v13  ;;  %v2601_v53 = vld [vmem:[#allocation2 + $0xa0] sm:$0xff]  ;;  %v1466_v63 = vld [vmem:[%s2914_s3 + $0x1d8] sm:$0xff]  ;;  %v1468_v13 = vld [vmem:[%s2914_s3 + $0x1e8] sm:$0xff]  ;;  %v2048_v15 = vpack.c.bf16 %v1500_v4, %v1499_v3  ;;  %v305_v19 = vmul.f32 %v2380_v54, %v290_v14 }
  0x30   : > { %2033 = vmatprep.subr.bf16.mxu1 %v2032_v17  ;;  %1834 = vmatprep.mubr.f32.mxu1 %v2559_v34  ;;  %v2606_v58 = vld [vmem:[#allocation2 + $0xb8] sm:$0xff]  ;;  %v2014_v6 = vpack.c.bf16 %v1466_v63, %v1465_v62  ;;  %v1467_v11 = vld [vmem:[%s2914_s3 + $0x1e0] sm:$0xff]  ;;  %v1501_v21 = vld [vmem:[%s2914_s3 + $0x2f0] sm:$0xff] }
  0x31   : > { %572 = vmatmul.mubr.f32.gmra.mrb[4].mxu0 %v2549_v28  ;;  %1835 = vmatmul.mubr.f32.gmra.mrb[4].mxu1 %v2579_v44  ;;  %v1486_v18 = vld [vmem:[%s2914_s3 + $0x278] sm:$0xff]  ;;  %v2655_v23 = vld [vmem:[#allocation2 + $0x90] sm:$0xff]  ;;  %v2018_v24 = vpack.c.bf16 %v1468_v13, %v1467_v11  ;;  %v1535_v33 = vld [vmem:[%s2914_s3 + $0x400] sm:$0xff] }
  0x32   : > { %2003 = vmatpush3.bf16.msra.mxu0 %v2002_v29  ;;  %576 = vmatprep.mubr.f32.mxu0 %v2460_v37  ;;  %v1502_v22 = vld [vmem:[%s2914_s3 + $0x2f8] sm:$0xff]  ;;  %v1469_v26 = vld [vmem:[%s2914_s3 + $0x1f0] sm:$0xff]  ;;  %v2680_v36 = vld [vmem:[#allocation2 + $0xa8] sm:$0xff] }
  0x33   : > { %2035 = vmatpush3.bf16.msra.mxu1 %v2032_v17  ;;  %2005 = vmatprep.subr.bf16.mxu0 %v2004_v31  ;;  %v1485_v17 = vld [vmem:[%s2914_s3 + $0x270] sm:$0xff]  ;;  %v1470_v27 = vld [vmem:[%s2914_s3 + $0x1f8] sm:$0xff]  ;;  %v2052_v29 = vpack.c.bf16 %v1502_v22, %v1501_v21  ;;  %v1519_v31 = vld [vmem:[%s2914_s3 + $0x380] sm:$0xff] }
  0x34   : > { %2037 = vmatprep.subr.bf16.mxu1 %v2036_v35  ;;  %1837 = vmatprep.mubr.f32.mxu1 %v2601_v53  ;;  %v2020_v54 = vpack.c.bf16 %v1486_v18, %v1485_v17  ;;  %v2022_v38 = vpack.c.bf16 %v1470_v27, %v1469_v26  ;;  %v1504_v46 = vld [vmem:[%s2914_s3 + $0x308] sm:$0xff]  ;;  %v1522_v49 = vld [vmem:[%s2914_s3 + $0x398] sm:$0xff]  ;;  %v1537_v50 = vld [vmem:[%s2914_s3 + $0x410] sm:$0xff] }
  0x35   : > { %577 = vmatmul.mubr.f32.gmra.mrb[6].mxu0 %v2577_v41  ;;  %1838 = vmatmul.mubr.f32.gmra.mrb[6].mxu1 %v2606_v58  ;;  %v1538_v51 = vld [vmem:[%s2914_s3 + $0x418] sm:$0xff]  ;;  %v1539_v1 = vld [vmem:[%s2914_s3 + $0x420] sm:$0xff]  ;;  %v1540_v2 = vld [vmem:[%s2914_s3 + $0x428] sm:$0xff] }
  0x36   : > { %2007 = vmatpush3.bf16.msra.mxu0 %v2006_v43  ;;  %581 = vmatprep.mubr.f32.mxu0 %v2467_v42  ;;  %v2092_v63 = vpack.c.bf16 %v1538_v51, %v1537_v50  ;;  %v1525_v11 = vld [vmem:[%s2914_s3 + $0x3b0] sm:$0xff]  ;;  %v1526_v13 = vld [vmem:[%s2914_s3 + $0x3b8] sm:$0xff]  ;;  %v1544_v26 = vld [vmem:[%s2914_s3 + $0x448] sm:$0xff] }
  0x37   : > { %2039 = vmatpush3.bf16.msra.mxu1 %v2036_v35  ;;  %2009 = vmatprep.subr.bf16.mxu0 %v2008_v45  ;;  %v1536_v35 = vld [vmem:[%s2914_s3 + $0x408] sm:$0xff]  ;;  %v1503_v45 = vld [vmem:[%s2914_s3 + $0x300] sm:$0xff]  ;;  %v1541_v14 = vld [vmem:[%s2914_s3 + $0x430] sm:$0xff]  ;;  %v2068_v18 = vpack.c.bf16 %v1526_v13, %v1525_v11 }
  0x38   : > { %2041 = vmatprep.subr.bf16.mxu1 %v2040_v48  ;;  %1872 = vmatprep.mubr.f32.mxu1 %v2486_v56  ;;  %v320_v56 = vadd.f32 %v2392_v59, %v305_v19  ;;  %v1520_v59 = vld [vmem:[%s2914_s3 + $0x388] sm:$0xff]  ;;  %v2088_v47 = vpack.c.bf16 %v1536_v35, %v1535_v33  ;;  %v2058_v52 = vpack.c.bf16 %v1504_v46, %v1503_v45  ;;  %v1509_v19 = vld [vmem:[%s2914_s3 + $0x330] sm:$0xff]  ;;  %v1510_v21 = vld [vmem:[%s2914_s3 + $0x338] sm:$0xff] }
  0x39   : > { %582 = vmatmul.mubr.f32.gmra.mrb[8].mxu0 %v2604_v55  ;;  %v2056_v43 = vpack.c.bf16 %v1520_v59, %v1519_v31  ;;  %v2070_v27 = vpack.c.bf16 %v1510_v21, %v1509_v19  ;;  %v1511_v31 = vld [vmem:[%s2914_s3 + $0x340] sm:$0xff]  ;;  %v1512_v59 = vld [vmem:[%s2914_s3 + $0x348] sm:$0xff]  ;;  %v1529_v35 = vld [vmem:[%s2914_s3 + $0x3d0] sm:$0xff] }
  0x3a   : > { %2011 = vmatpush3.bf16.msra.mxu0 %v2010_v57  ;;  %586 = vmatprep.mubr.f32.mxu0 %v2494_v60  ;;  %v2670_v32 = vmax.f32 %v320_v56, 0.0  ;;  %v1505_v57 = vld [vmem:[%s2914_s3 + $0x310] sm:$0xff]  ;;  %v1528_v56 = vld [vmem:[%s2914_s3 + $0x3c8] sm:$0xff]  ;;  %v2074_v45 = vpack.c.bf16 %v1512_v59, %v1511_v31  ;;  %v1531_v50 = vld [vmem:[%s2914_s3 + $0x3e0] sm:$0xff] }
  0x3b   : > { %2043 = vmatpush3.bf16.msra.mxu1 %v2040_v48  ;;  %2013 = vmatprep.subr.bf16.mxu0 %v2012_v61  ;;  %v1521_v48 = vld [vmem:[%s2914_s3 + $0x390] sm:$0xff]  ;;  %v1506_v61 = vld [vmem:[%s2914_s3 + $0x318] sm:$0xff]  ;;  %v1532_v51 = vld [vmem:[%s2914_s3 + $0x3e8] sm:$0xff] }
  0x3c   : > { %2045 = vmatprep.subr.bf16.mxu1 %v2044_v0  ;;  %v368_v39 = vrot.slane %v2670_v32, 7  ;;  %v400_v40 = vrot.slane %v2670_v32, 1  ;;  %v2060_v62 = vpack.c.bf16 %v1522_v49, %v1521_v48  ;;  %v2062_v3 = vpack.c.bf16 %v1506_v61, %v1505_v57  ;;  %v1514_v48 = vld [vmem:[%s2914_s3 + $0x358] sm:$0xff]  ;;  %v1548_v57 = vld [vmem:[%s2914_s3 + $0x468] sm:$0xff] }
  0x3d   : > { %587 = vmatmul.mubr.f32.gmra.mrb[10].mxu0 %v2630_v5 }
  0x3e   : > { %2015 = vmatpush3.bf16.msra.mxu0 %v2014_v6  ;;  %591 = vmatprep.mubr.f32.mxu0 %v2517_v12  ;;  %384 = vst [vmem:[#allocation2 + $0xc0] sm:$0xfe] %v368_v39  ;;  %416 = vst [vmem:[#allocation2 + $0xd0] sm:$0x7f] %v400_v40  ;;  %v1508_v6 = vld [vmem:[%s2914_s3 + $0x328] sm:$0xff]  ;;  %v1545_v39 = vld [vmem:[%s2914_s3 + $0x450] sm:$0xff] }
  0x3f   : > { %2047 = vmatpush3.bf16.msra.mxu1 %v2044_v0  ;;  %2017 = vmatprep.subr.bf16.mxu0 %v2016_v9  ;;  %v1523_v0 = vld [vmem:[%s2914_s3 + $0x3a0] sm:$0xff]  ;;  %v2096_v9 = vpack.c.bf16 %v1540_v2, %v1539_v1  ;;  %v1546_v40 = vld [vmem:[%s2914_s3 + $0x458] sm:$0xff]  ;;  %v1549_v2 = vld [vmem:[%s2914_s3 + $0x470] sm:$0xff] }
  0x40   : > { %2049 = vmatprep.subr.bf16.mxu1 %v2048_v15  ;;  %v2108_v49 = vpack.c.bf16 %v1546_v40, %v1545_v39  ;;  %v1534_v1 = vld [vmem:[%s2914_s3 + $0x3f8] sm:$0xff] }
  0x41   : > { %592 = vmatmul.mubr.f32.gmra.mrb[12].mxu0 %v2655_v23 }
  0x42   : > { %2019 = vmatpush3.bf16.msra.mxu0 %v2018_v24  ;;  %596 = vmatprep.mubr.f32.mxu0 %v2526_v16  ;;  %v1527_v24 = vld [vmem:[%s2914_s3 + $0x3c0] sm:$0xff] }
  0x43   : > { %2051 = vmatpush3.bf16.msra.mxu1 %v2048_v15  ;;  %2021 = vmatprep.subr.bf16.mxu0 %v2020_v54  ;;  %v1542_v15 = vld [vmem:[%s2914_s3 + $0x438] sm:$0xff]  ;;  %v1543_v54 = vld [vmem:[%s2914_s3 + $0x440] sm:$0xff] }
  0x44   : > { %2053 = vmatprep.subr.bf16.mxu1 %v2052_v29  ;;  %v2100_v22 = vpack.c.bf16 %v1542_v15, %v1541_v14  ;;  %v2104_v33 = vpack.c.bf16 %v1544_v26, %v1543_v54 }
  0x45   : > { %597 = vmatmul.mubr.f32.gmra.mrb[14].mxu0 %v2680_v36  ;;  %v736_v13 = vld [vmem:[#allocation2 + $0xc0] sm:$0xff] }
  0x46   : > { %2023 = vmatpush3.bf16.msra.mxu0 %v2022_v38  ;;  %852 = vmatprep.mubr.f32.mxu0 %v2414_v8  ;;  %v1524_v8 = vld [vmem:[%s2914_s3 + $0x3a8] sm:$0xff]  ;;  %v1530_v38 = vld [vmem:[%s2914_s3 + $0x3d8] sm:$0xff] }
  0x47   : > { %2055 = vmatpush3.bf16.msra.mxu1 %v2052_v29  ;;  %2057 = vmatprep.subr.bf16.mxu0 %v2056_v43  ;;  %v2064_v4 = vpack.c.bf16 %v1524_v8, %v1523_v0  ;;  %v2072_v29 = vpack.c.bf16 %v1528_v56, %v1527_v24  ;;  %v2789_v43 = vld [vmem:[#allocation2 + $0xd0] sm:$0xff]  ;;  %v2076_v46 = vpack.c.bf16 %v1530_v38, %v1529_v35  ;;  %v1516_v0 = vld [vmem:[%s2914_s3 + $0x368] sm:$0xff] }
  0x48   : > { %2089 = vmatprep.subr.bf16.mxu1 %v2088_v47  ;;  %v331_v38 = vld [vmem:[%s2868_s7 + $0x10] sm:$0xff] }
  0x49   : > { %853 = vmatmul.mubr.f32.vlgmr.msra.gmra.mrb[16].mxu0 %v2515_v10  ;;  %v1507_v10 = vld [vmem:[%s2914_s3 + $0x320] sm:$0xff] }
  0x4a   : > { %1873 = vmatmul.mubr.f32.vlgmr.msra.gmra.mrb[0].mxu1 %v2534_v20  ;;  %2059 = vmatpush3.bf16.msra.mxu0 %v2058_v52  ;;  %v2066_v17 = vpack.c.bf16 %v1508_v6, %v1507_v10  ;;  %v1547_v52 = vld [vmem:[%s2914_s3 + $0x460] sm:$0xff]  ;;  %v1517_v6 = vld [vmem:[%s2914_s3 + $0x370] sm:$0xff] }
  0x4b   : > { %2091 = vmatpush3.bf16.msra.mxu1 %v2088_v47  ;;  %857 = vmatprep.mubr.f32.mxu0 %v2441_v25  ;;  %v1513_v47 = vld [vmem:[%s2914_s3 + $0x350] sm:$0xff]  ;;  %v2112_v8 = vpack.c.bf16 %v1548_v57, %v1547_v52  ;;  %v333_v57 = vld [vmem:[%s2868_s7 + $0x20] sm:$0xff] }
  0x4c   : > { %2061 = vmatprep.subr.bf16.mxu0 %v2060_v62  ;;  %2093 = vmatprep.subr.bf16.mxu1 %v2092_v63  ;;  %v2078_v61 = vpack.c.bf16 %v1514_v48, %v1513_v47  ;;  %v2080_v62 = vpack.c.bf16 %v1532_v51, %v1531_v50  ;;  %v332_v47 = vld [vmem:[%s2868_s7 + $0x18] sm:$0xff] }
  0x4d   : > { %858 = vmatmul.mubr.f32.gmra.mrb[18].mxu0 %v2549_v28  ;;  %1875 = vmatprep.mubr.f32.mxu1 %v2551_v30 }
  0x4e   : > { %2063 = vmatpush3.bf16.msra.mxu0 %v2062_v3  ;;  %862 = vmatprep.mubr.f32.mxu0 %v2460_v37  ;;  %v1550_v3 = vld [vmem:[%s2914_s3 + $0x478] sm:$0xff] }
  0x4f   : > { %2095 = vmatpush3.bf16.msra.mxu1 %v2092_v63  ;;  %2065 = vmatprep.subr.bf16.mxu0 %v2064_v4  ;;  %v1515_v63 = vld [vmem:[%s2914_s3 + $0x360] sm:$0xff]  ;;  %v2116_v11 = vpack.c.bf16 %v1550_v3, %v1549_v2 }
  0x50   : > { %2097 = vmatprep.subr.bf16.mxu1 %v2096_v9  ;;  %1876 = vmatmul.mubr.f32.gmra.mrb[2].mxu1 %v2559_v34  ;;  %v2082_v4 = vpack.c.bf16 %v1516_v0, %v1515_v63 }
  0x51   : > { %863 = vmatmul.mubr.f32.gmra.mrb[20].mxu0 %v2577_v41  ;;  %1878 = vmatprep.mubr.f32.mxu1 %v2579_v44 }
  0x52   : > { %2067 = vmatpush3.bf16.msra.mxu0 %v2066_v17  ;;  %867 = vmatprep.mubr.f32.mxu0 %v2467_v42 }
  0x53   : > { %2099 = vmatpush3.bf16.msra.mxu1 %v2096_v9  ;;  %2069 = vmatprep.subr.bf16.mxu0 %v2068_v18  ;;  %v1518_v9 = vld [vmem:[%s2914_s3 + $0x378] sm:$0xff] }
  0x54   : > { %2101 = vmatprep.subr.bf16.mxu1 %v2100_v22  ;;  %1879 = vmatmul.mubr.f32.gmra.mrb[4].mxu1 %v2601_v53  ;;  %v2086_v14 = vpack.c.bf16 %v1518_v9, %v1517_v6  ;;  %v335_v6 = vld [vmem:[%s2868_s7 + $0x30] sm:$0xff] }
  0x55   : > { %868 = vmatmul.mubr.f32.gmra.mrb[22].mxu0 %v2604_v55  ;;  %1881 = vmatprep.mubr.f32.mxu1 %v2606_v58 }
  0x56   : > { %2071 = vmatpush3.bf16.msra.mxu0 %v2070_v27  ;;  %872 = vmatprep.mubr.f32.mxu0 %v2494_v60  ;;  %v330_v27 = vld [vmem:[%s2868_s7 + $0x8] sm:$0xff] }
  0x57   : > { %2103 = vmatpush3.bf16.msra.mxu1 %v2100_v22  ;;  %2073 = vmatprep.subr.bf16.mxu0 %v2072_v29  ;;  %v329_v22 = vld [vmem:[%s2868_s7] sm:$0xff] }
  0x58   : > { %2105 = vmatprep.subr.bf16.mxu1 %v2104_v33  ;;  %1882 = vmatmul.mubr.f32.gmra.mrb[6].mxu1 %v2789_v43 }
  0x59   : > { %873 = vmatmul.mubr.f32.gmra.mrb[24].mxu0 %v2630_v5  ;;  %1916 = vmatprep.mubr.f32.mxu1 %v2534_v20  ;;  %v1533_v20 = vld [vmem:[%s2914_s3 + $0x3f0] sm:$0xff] }
  0x5a   : > { %2075 = vmatpush3.bf16.msra.mxu0 %v2074_v45  ;;  %877 = vmatprep.mubr.f32.mxu0 %v2517_v12  ;;  %v2084_v10 = vpack.c.bf16 %v1534_v1, %v1533_v20  ;;  %v334_v20 = vld [vmem:[%s2868_s7 + $0x28] sm:$0xff] }
  0x5b   : > { %2107 = vmatpush3.bf16.msra.mxu1 %v2104_v33  ;;  %2077 = vmatprep.subr.bf16.mxu0 %v2076_v46 }
  0x5c   : > { %2109 = vmatprep.subr.bf16.mxu1 %v2108_v49 }
  0x5d   : > { %878 = vmatmul.mubr.f32.gmra.mrb[26].mxu0 %v2655_v23 }
  0x5e   : > { %2079 = vmatpush3.bf16.msra.mxu0 %v2078_v61  ;;  %882 = vmatprep.mubr.f32.mxu0 %v2526_v16 }
  0x5f   : > { %2111 = vmatpush3.bf16.msra.mxu1 %v2108_v49  ;;  %2081 = vmatprep.subr.bf16.mxu0 %v2080_v62 }
  0x60   : > { %2113 = vmatprep.subr.bf16.mxu1 %v2112_v8 }
  0x61   : > { %883 = vmatmul.mubr.f32.gmra.mrb[28].mxu0 %v2680_v36 }
  0x62   : > { %2083 = vmatpush3.bf16.msra.mxu0 %v2082_v4  ;;  %887 = vmatprep.mubr.f32.mxu0 %v2670_v32 }
  0x63   : > { %2115 = vmatpush3.bf16.msra.mxu1 %v2112_v8  ;;  %2085 = vmatprep.subr.bf16.mxu0 %v2084_v10 }
  0x64   : > { %2117 = vmatprep.subr.bf16.mxu1 %v2116_v11 }
  0x65   : > { %888 = vmatmul.mubr.f32.gmra.mrb[30].mxu0 %v736_v13 }
  0x66   : > { %2087 = vmatpush3.bf16.msra.mxu0 %v2086_v14  ;;  %1144 = vmatprep.mubr.f32.mxu0 %v2441_v25 }
  0x67   : > { %2119 = vmatpush3.bf16.msra.mxu1 %v2116_v11 }
  0x69   : > { %1145 = vmatmul.mubr.f32.vlgmr.msra.gmra.mrb[32].mxu0 %v2549_v28 }
  0x6a   : > { %1917 = vmatmul.mubr.f32.vlgmr.msra.gmra.mrb[0].mxu1 %v2551_v30  ;;  %1149 = vmatprep.mubr.f32.mxu0 %v2460_v37 }
  0x6b   : > { %1919 = vmatprep.mubr.f32.mxu1 %v2559_v34 }
  0x6d   : > { %1150 = vmatmul.mubr.f32.gmra.mrb[34].mxu0 %v2577_v41 }
  0x6e   : > { %1920 = vmatmul.mubr.f32.gmra.mrb[2].mxu1 %v2579_v44  ;;  %1154 = vmatprep.mubr.f32.mxu0 %v2467_v42 }
  0x6f   : > { %1922 = vmatprep.mubr.f32.mxu1 %v2601_v53 }
  0x71   : > { %1155 = vmatmul.mubr.f32.gmra.mrb[36].mxu0 %v2604_v55 }
  0x72   : > { %1923 = vmatmul.mubr.f32.gmra.mrb[4].mxu1 %v2606_v58  ;;  %1159 = vmatprep.mubr.f32.mxu0 %v2494_v60 }
  0x73   : > { %1925 = vmatprep.mubr.f32.mxu1 %v2789_v43 }
  0x75   : > { %1160 = vmatmul.mubr.f32.gmra.mrb[38].mxu0 %v2630_v5 }
  0x76   : > { %1926 = vmatmul.mubr.f32.gmra.mrb[6].mxu1 %v2185_v7  ;;  %1164 = vmatprep.mubr.f32.mxu0 %v2517_v12 }
  0x79   : > { %1165 = vmatmul.mubr.f32.gmra.mrb[40].mxu0 %v2655_v23 }
  0x7a   : > { %1169 = vmatprep.mubr.f32.mxu0 %v2526_v16 }
  0x7d   : > { %1170 = vmatmul.mubr.f32.gmra.mrb[42].mxu0 %v2680_v36 }
  0x7e   : > { %1174 = vmatprep.mubr.f32.mxu0 %v2670_v32 }
  0x81   : > { %1175 = vmatmul.mubr.f32.gmra.mrb[44].mxu0 %v736_v13 }
  0x82   : > { %1179 = vmatprep.mubr.f32.mxu0 %v2185_v7 }
  0x85   : > { %1180 = vmatmul.mubr.f32.gmra.mrb[46].mxu0 %v2185_v7 }
  0xfc   : > { %v1588_v25 = vpop.f32.mrb[0].mxu0 }
  0xfd   : > { %v1589_v37 = vpop.f32.mrb[1].mxu0 }
  0xfe   : > { %v1590_v42 = vadd.f32 %v1589_v37, %v1588_v25  ;;  %v336_v37 = vld [vmem:[%s2868_s7 + $0x38] sm:$0xff] }
 0x100   : > { %v1591_v60 = vpop.f32.mrb[2].mxu0  ;;  %v2124_v54 = vadd.f32 %v1590_v42, %v329_v22 }
 0x101   : > { %v1592_v28 = vpop.f32.mrb[3].mxu0 }
 0x102   : > { %v1593_v30 = vadd.f32 %v1592_v28, %v1591_v60 }
 0x104   : > { %v1594_v12 = vpop.f32.mrb[4].mxu0  ;;  %v2120_v33 = vadd.f32 %v1593_v30, %v330_v27 }
 0x105   : > { %v1595_v34 = vpop.f32.mrb[5].mxu0 }
 0x106   : > { %v1596_v41 = vadd.f32 %v1595_v34, %v1594_v12 }
 0x108   : > { %v1597_v16 = vpop.f32.mrb[6].mxu0  ;;  %v2132_v45 = vadd.f32 %v1596_v41, %v331_v38 }
 0x109   : > { %v1598_v44 = vpop.f32.mrb[7].mxu0 }
 0x10a   : > { %v1599_v53 = vadd.f32 %v1598_v44, %v1597_v16 }
 0x10c   : > { %v1600_v55 = vpop.f32.mrb[8].mxu0  ;;  %v2128_v51 = vadd.f32 %v1599_v53, %v332_v47 }
 0x10d   : > { %v1601_v58 = vpop.f32.mrb[9].mxu0 }
 0x10e   : > { %v1602_v5 = vadd.f32 %v1601_v58, %v1600_v55 }
 0x110   : > { %v1603_v23 = vpop.f32.mrb[10].mxu0  ;;  %v2140_v0 = vadd.f32 %v1602_v5, %v333_v57 }
 0x111   : > { %v1604_v32 = vpop.f32.mrb[11].mxu0 }
 0x112   : > { %v1605_v36 = vadd.f32 %v1604_v32, %v1603_v23 }
 0x114   : > { %v1606_v7 = vpop.f32.mrb[12].mxu0  ;;  %v2136_v4 = vadd.f32 %v1605_v36, %v334_v20 }
 0x115   : > { %v1607_v15 = vpop.f32.mrb[13].mxu0 }
 0x116   : > { %v1608_v17 = vadd.f32 %v1607_v15, %v1606_v7 }
 0x118   : > { %v1609_v18 = vpop.f32.mrb[14].mxu0  ;;  %v2148_v14 = vadd.f32 %v1608_v17, %v335_v6 }
 0x119   : > { %v1610_v19 = vpop.f32.mrb[15].mxu0 }
 0x11a   : > { %v1611_v21 = vadd.f32 %v1610_v19, %v1609_v18 }
 0x11c   : > { %v1668_v24 = vpop.f32.mrb[16].mxu0  ;;  %v2144_v30 = vadd.f32 %v1611_v21, %v336_v37 }
 0x11d   : > { %v1669_v56 = vpop.f32.mrb[17].mxu0 }
 0x11e   : > { %v1670_v26 = vadd.f32 %v1669_v56, %v1668_v24 }
 0x120   : > { %v2125_v29 = vadd.f32 %v2124_v54, %v1670_v26  ;;  %v1671_v31 = vpop.f32.mrb[18].mxu0 }
 0x121   : > { %v1672_v59 = vpop.f32.mrb[19].mxu0 }
 0x122   : > { %v1673_v35 = vadd.f32 %v1672_v59, %v1671_v31 }
 0x124   : > { %v2121_v39 = vadd.f32 %v2120_v33, %v1673_v35  ;;  %v1674_v40 = vpop.f32.mrb[20].mxu0 }
 0x125   : > { %v1675_v43 = vpop.f32.mrb[21].mxu0 }
 0x126   : > { %v1676_v46 = vadd.f32 %v1675_v43, %v1674_v40 }
 0x128   : > { %v2133_v48 = vadd.f32 %v2132_v45, %v1676_v46  ;;  %v1677_v49 = vpop.f32.mrb[22].mxu0 }
 0x129   : > { %v1678_v50 = vpop.f32.mrb[23].mxu0 }
 0x12a   : > { %v1679_v52 = vadd.f32 %v1678_v50, %v1677_v49 }
 0x12c   : > { %v2129_v61 = vadd.f32 %v2128_v51, %v1679_v52  ;;  %v1680_v62 = vpop.f32.mrb[24].mxu0 }
 0x12d   : > { %v1681_v63 = vpop.f32.mrb[25].mxu0 }
 0x12e   : > { %v1682_v8 = vadd.f32 %v1681_v63, %v1680_v62 }
 0x130   : > { %v2876_v1 = vadd.f32 %v2140_v0, %v1682_v8  ;;  %v1683_v2 = vpop.f32.mrb[26].mxu0 }
 0x131   : > { %v1684_v3 = vpop.f32.mrb[27].mxu0 }
 0x132   : > { %v1685_v10 = vadd.f32 %v1684_v3, %v1683_v2 }
 0x134   : > { %v2879_v9 = vadd.f32 %v2136_v4, %v1685_v10  ;;  %v1686_v11 = vpop.f32.mrb[28].mxu0 }
 0x135   : > { %v1687_v13 = vpop.f32.mrb[29].mxu0 }
 0x136   : > { %v1688_v25 = vadd.f32 %v1687_v13, %v1686_v11 }
 0x138   : > { %v2882_v42 = vadd.f32 %v2148_v14, %v1688_v25  ;;  %v1689_v60 = vpop.f32.mrb[30].mxu0 }
 0x139   : > { %v1690_v28 = vpop.f32.mrb[31].mxu0 }
 0x13a   : > { %v1691_v12 = vadd.f32 %v1690_v28, %v1689_v60 }
 0x13c   : > { %v2884_v34 = vadd.f32 %v2144_v30, %v1691_v12  ;;  %v1748_v41 = vpop.f32.mrb[32].mxu0 }
 0x13d   : > { %v1918_v16 = vpop.f32.mrb[0].mxu1  ;;  %v1749_v44 = vpop.f32.mrb[33].mxu0 }
 0x13e   : > { %v1750_v53 = vadd.f32 %v1749_v44, %v1748_v41  ;;  %v1251_v55 = vpop.f32.mrb[1].mxu1 }
 0x140   : > { %v2126_v58 = vadd.f32 %v2125_v29, %v1750_v53  ;;  %v1751_v5 = vpop.f32.mrb[34].mxu0 }
 0x141   : > { %v1921_v23 = vpop.f32.mrb[2].mxu1  ;;  %v1752_v32 = vpop.f32.mrb[35].mxu0 }
 0x142   : > { %v2127_v36 = vadd.f32 %v2126_v58, %v1251_v55  ;;  %v1753_v7 = vadd.f32 %v1752_v32, %v1751_v5  ;;  %v1261_v15 = vpop.f32.mrb[3].mxu1 }
 0x144   : > { %1298 = vst [vmem:[%s2890_s9] sm:$0xff] %v2127_v36  ;;  %v2122_v17 = vadd.f32 %v2121_v39, %v1753_v7  ;;  %v1754_v18 = vpop.f32.mrb[36].mxu0  ;;  %v1319_v54 = vmul.f32 %v2127_v36, %v2127_v36 }
 0x145   : > { %v1924_v19 = vpop.f32.mrb[4].mxu1  ;;  %v1755_v21 = vpop.f32.mrb[37].mxu0 }
 0x146   : > { %v2123_v22 = vadd.f32 %v2122_v17, %v1918_v16  ;;  %v1756_v24 = vadd.f32 %v1755_v21, %v1754_v18  ;;  %v1271_v56 = vpop.f32.mrb[5].mxu1 }
 0x148   : > { %1299 = vst [vmem:[%s2890_s9 + $0x8] sm:$0xff] %v2123_v22  ;;  %v1306_v26 = vadd.f32 %v2127_v36, %v2123_v22  ;;  %v1320_v27 = vmul.f32 %v2123_v22, %v2123_v22  ;;  %v2134_v29 = vadd.f32 %v2133_v48, %v1756_v24  ;;  %v1757_v31 = vpop.f32.mrb[38].mxu0 }
 0x149   : > { %v1927_v59 = vpop.f32.mrb[6].mxu1  ;;  %v1758_v33 = vpop.f32.mrb[39].mxu0 }
 0x14a   : > { %v1327_v35 = vadd.f32 %v1320_v27, %v1319_v54  ;;  %v2135_v38 = vadd.f32 %v2134_v29, %v1261_v15  ;;  %v1759_v40 = vadd.f32 %v1758_v33, %v1757_v31  ;;  %v1281_v39 = vpop.f32.mrb[7].mxu1 }
 0x14c   : > { %1300 = vst [vmem:[%s2890_s9 + $0x10] sm:$0xff] %v2135_v38  ;;  %v1307_v43 = vadd.f32 %v2135_v38, %v1306_v26  ;;  %v1321_v45 = vmul.f32 %v2135_v38, %v2135_v38  ;;  %v2130_v46 = vadd.f32 %v2129_v61, %v1759_v40  ;;  %v1760_v47 = vpop.f32.mrb[40].mxu0 }
 0x14d   : > { %v1761_v49 = vpop.f32.mrb[41].mxu0 }
 0x14e   : > { %v1328_v50 = vadd.f32 %v1327_v35, %v1321_v45  ;;  %v2131_v51 = vadd.f32 %v2130_v46, %v1921_v23  ;;  %v1762_v52 = vadd.f32 %v1761_v49, %v1760_v47 }
 0x150   : > { %1301 = vst [vmem:[%s2890_s9 + $0x18] sm:$0xff] %v2131_v51  ;;  %v1308_v48 = vadd.f32 %v2131_v51, %v1307_v43  ;;  %v1322_v57 = vmul.f32 %v2131_v51, %v2131_v51  ;;  %v2142_v62 = vadd.f32 %v2876_v1, %v1762_v52  ;;  %v1763_v63 = vpop.f32.mrb[42].mxu0 }
 0x151   : > { %v1764_v0 = vpop.f32.mrb[43].mxu0 }
 0x152   : > { %v1329_v8 = vadd.f32 %v1328_v50, %v1322_v57  ;;  %v2143_v20 = vadd.f32 %v2142_v62, %v1271_v56  ;;  %v1765_v2 = vadd.f32 %v1764_v0, %v1763_v63 }
 0x154   : > { %1302 = vst [vmem:[%s2890_s9 + $0x20] sm:$0xff] %v2143_v20  ;;  %v1309_v3 = vadd.f32 %v2143_v20, %v1308_v48  ;;  %v1323_v4 = vmul.f32 %v2143_v20, %v2143_v20  ;;  %v2138_v61 = vadd.f32 %v2879_v9, %v1765_v2  ;;  %v1766_v10 = vpop.f32.mrb[44].mxu0 }
 0x155   : > { %v1767_v6 = vpop.f32.mrb[45].mxu0 }
 0x156   : > { %v1330_v11 = vadd.f32 %v1329_v8, %v1323_v4  ;;  %v2139_v13 = vadd.f32 %v2138_v61, %v1924_v19  ;;  %v1768_v14 = vadd.f32 %v1767_v6, %v1766_v10 }
 0x158   : > { %1303 = vst [vmem:[%s2890_s9 + $0x28] sm:$0xff] %v2139_v13  ;;  %v1310_v25 = vadd.f32 %v2139_v13, %v1309_v3  ;;  %v1324_v1 = vmul.f32 %v2139_v13, %v2139_v13  ;;  %v2150_v37 = vadd.f32 %v2882_v42, %v1768_v14  ;;  %v1769_v60 = vpop.f32.mrb[46].mxu0 }
 0x159   : > { %v1770_v28 = vpop.f32.mrb[47].mxu0 }
 0x15a   : > { %v1331_v30 = vadd.f32 %v1330_v11, %v1324_v1  ;;  %v2151_v12 = vadd.f32 %v2150_v37, %v1281_v39  ;;  %v1771_v41 = vadd.f32 %v1770_v28, %v1769_v60 }
 0x15c   : > { %1304 = vst [vmem:[%s2890_s9 + $0x30] sm:$0xff] %v2151_v12  ;;  %v1311_v16 = vadd.f32 %v2151_v12, %v1310_v25  ;;  %v1325_v44 = vmul.f32 %v2151_v12, %v2151_v12  ;;  %v2146_v9 = vadd.f32 %v2884_v34, %v1771_v41 }
 0x15e   : > { %v1332_v53 = vadd.f32 %v1331_v30, %v1325_v44  ;;  %v2147_v55 = vadd.f32 %v2146_v9, %v1927_v59 }
 0x160   : > { %1305 = vst [vmem:[%s2890_s9 + $0x38] sm:$0xff] %v2147_v55  ;;  %v1312_v58 = vadd.f32 %v2147_v55, %v1311_v16  ;;  %v1326_v5 = vmul.f32 %v2147_v55, %v2147_v55 }
 0x162   : > { %v1313_v23 = vrot.slane %v1312_v58, 4  ;;  %v1333_v32 = vadd.f32 %v1332_v53, %v1326_v5 }
 0x164   : > { %v1314_v36 = vadd.f32 %v1313_v23, %v1312_v58  ;;  %v1334_v42 = vrot.slane %v1333_v32, 4 }
 0x166   : > { %v1315_v7 = vrot.slane %v1314_v36, 2  ;;  %v1335_v15 = vadd.f32 %v1334_v42, %v1333_v32 }
 0x168   : > { %v1316_v17 = vadd.f32 %v1315_v7, %v1314_v36  ;;  %v1336_v18 = vrot.slane %v1335_v15, 2 }
 0x16a   : > { %v1317_v19 = vrot.slane %v1316_v17, 1  ;;  %v1337_v21 = vadd.f32 %v1336_v18, %v1335_v15 }
 0x16c   : > { %v1338_v22 = vrot.slane %v1337_v21, 1  ;;  %v1318_v34 = vadd.f32 %v1317_v19, %v1316_v17 }
 0x16e   : > { %v1339_v24 = vadd.f32 %v1338_v22, %v1337_v21 }
 0x170   : > { %v1341_v56 = vsel %vm1340_vm0, %v1318_v34, %v1339_v24 }
 0x171   : > { %1342 = vst [vmem:[%s282_s13] sm:$0x3] %v1341_v56 }
 0x172 PF: > { %s17_s21 = sadd.s32 1, %s2183_s21  }
 0x173   : > { %p14_p4 = scmp.ge.s32.totalorder %s17_s21, 4  }
 0x175   :  { %16 = sbr.rel (!%p14_p4) target bundleno = 1 (0x1), region = 90 }

// kernel: network_block_forward.8
= control target key start
LH: loop header
LB: loop body
LE: loop exit
PB: predicated region body
PF: predicated region fallthrough
CT: control target
= control target key end

     0   :  { %s2122_s18 = smov 0   ;;  %s2799_s0 = inlined_call_operand.vmem [shape: f32[2,8,8,128], index: 0, kind: input, shape index: {}]   ;;  %s2800_s1 = inlined_call_operand.vmem [shape: f32[1,128], index: 1, kind: input, shape index: {}]   ;;  %s2801_s2 = inlined_call_operand.vmem [shape: f32[1,128], index: 2, kind: input, shape index: {}]   ;;  %s2802_s3 = inlined_call_operand.vmem [shape: f32[3,384,128], index: 3, kind: input, shape index: {}]   ;;  %s2803_s4 = inlined_call_operand.vmem [shape: f32[2,8,8,128], index: 4, kind: output, shape index: {0}]   ;;  %s2804_s5 = inlined_call_operand.vmem [shape: f32[2,2,128], index: 5, kind: output, shape index: {1}]  }
   0x1 LB: > { %s1358_s19 = sadd.s32 4294967295, %s2089_s18   ;;  %p1362_p0 = scmp.ge.s32.totalorder %s2089_s18, 1  ;;  %s2089_s18 = sphi %s2122_s18, %s16_s18  }
   0x2   : > { %p190_p1 = scmp.lt.s32.totalorder %s2089_s18, 3 }
   0x4   : > { %p191_p2 = pnand %p1362_p0, %p190_p1 }
   0x5   : > { %v1386_v0 = vld [vmem:[%s2802_s3 + $0x200] sm:$0xff] (!%p191_p2)  ;;  %v1387_v1 = vld [vmem:[%s2802_s3 + $0x208] sm:$0xff] (!%p191_p2)  ;;  %v2091_v7 = vmov (!%p191_p2), 0.0   ;;  %v1388_v10 = vld [vmem:[%s2802_s3 + $0x210] sm:$0xff] (!%p191_p2)  ;;  %p2175_p3 = scmp.lt.s32.totalorder (!%p191_p2), %s1358_s19, 1  ;;  %vm1269_vm0 = vcmask (!%p191_p2), 1040384  }
   0x6   : > { %194 = sbr.rel (%p191_p2) target bundleno = 370 (0x172), region = 36  ;;  %v1402_v2 = vld [vmem:[%s2802_s3 + $0x280] sm:$0xff] (!%p191_p2)  ;;  %v1842_v3 = vpack.c.bf16 (!%p191_p2), %v1387_v1, %v1386_v0  ;;  %v1403_v4 = vld [vmem:[%s2802_s3 + $0x288] sm:$0xff] (!%p191_p2)  ;;  %330 = vst [vmem:[#allocation2 + $0x18] sm:$0x1] (!%p191_p2), %v2091_v7  ;;  %v1389_v11 = vld [vmem:[%s2802_s3 + $0x218] sm:$0xff] (!%p191_p2) }
   0x7   : > { %v1370_v5 = vld [vmem:[%s2802_s3 + $0x180] sm:$0xff] (!%p191_p2)  ;;  %v1371_v6 = vld [vmem:[%s2802_s3 + $0x188] sm:$0xff] (!%p191_p2)  ;;  %331 = vst [vmem:[#allocation2 + $0x30] sm:$0x1] (!%p191_p2), %v2091_v7  ;;  %332 = vst [vmem:[#allocation2 + $0x48] sm:$0x1] (!%p191_p2), %v2091_v7  ;;  %v1874_v8 = vpack.c.bf16 (!%p191_p2), %v1403_v4, %v1402_v2  ;;  %v1846_v13 = vpack.c.bf16 (!%p191_p2), %v1389_v11, %v1388_v10 }
   0x8   : > { %333 = vst [vmem:[#allocation2 + $0x60] sm:$0x1] (!%p191_p2), %v2091_v7  ;;  %334 = vst [vmem:[#allocation2 + $0x78] sm:$0x1] (!%p191_p2), %v2091_v7  ;;  %v1844_v9 = vpack.c.bf16 (!%p191_p2), %v1371_v6, %v1370_v5  ;;  %v1404_v12 = vld [vmem:[%s2802_s3 + $0x290] sm:$0xff] (!%p191_p2)  ;;  %1843 = vmatprep.subr.bf16.mxu0 (!%p191_p2), %v1842_v3  ;;  %v1405_v14 = vld [vmem:[%s2802_s3 + $0x298] sm:$0xff] (!%p191_p2) }
   0x9   : > { %335 = vst [vmem:[#allocation2 + $0x90] sm:$0x1] (!%p191_p2), %v2091_v7  ;;  %336 = vst [vmem:[#allocation2 + $0xa8] sm:$0x1] (!%p191_p2), %v2091_v7  ;;  %v1372_v15 = vld [vmem:[%s2802_s3 + $0x190] sm:$0xff] (!%p191_p2)  ;;  %v1373_v16 = vld [vmem:[%s2802_s3 + $0x198] sm:$0xff] (!%p191_p2)  ;;  %1875 = vmatprep.subr.bf16.mxu1 (!%p191_p2), %v1874_v8  ;;  %v1878_v17 = vpack.c.bf16 (!%p191_p2), %v1405_v14, %v1404_v12 }
   0xa   : > { %337 = vst [vmem:[#allocation2 + $0xc0] sm:$0x1] (!%p191_p2), %v2091_v7  ;;  %362 = vst [vmem:[#allocation2 + $0x2f] sm:$0x1] (!%p191_p2), %v2091_v7  ;;  %1845 = vmatpush3.bf16.msra.mxu0 (!%p191_p2), %v1844_v9  ;;  %v1848_v18 = vpack.c.bf16 (!%p191_p2), %v1373_v16, %v1372_v15  ;;  %v1390_v19 = vld [vmem:[%s2802_s3 + $0x220] sm:$0xff] (!%p191_p2)  ;;  %v1391_v20 = vld [vmem:[%s2802_s3 + $0x228] sm:$0xff] (!%p191_p2)  ;;  %1877 = vmatpush3.bf16.msra.mxu1 (!%p191_p2), %v1874_v8 }
   0xb   : > { %363 = vst [vmem:[#allocation2 + $0x47] sm:$0x1] (!%p191_p2), %v2091_v7  ;;  %364 = vst [vmem:[#allocation2 + $0x5f] sm:$0x1] (!%p191_p2), %v2091_v7  ;;  %v1406_v21 = vld [vmem:[%s2802_s3 + $0x2a0] sm:$0xff] (!%p191_p2)  ;;  %1847 = vmatprep.subr.bf16.mxu0 (!%p191_p2), %v1846_v13  ;;  %v1850_v22 = vpack.c.bf16 (!%p191_p2), %v1391_v20, %v1390_v19  ;;  %v1407_v23 = vld [vmem:[%s2802_s3 + $0x2a8] sm:$0xff] (!%p191_p2)  ;;  %1879 = vmatprep.subr.bf16.mxu1 (!%p191_p2), %v1878_v17 }
   0xc   : > { %365 = vst [vmem:[#allocation2 + $0x77] sm:$0x1] (!%p191_p2), %v2091_v7  ;;  %366 = vst [vmem:[#allocation2 + $0x8f] sm:$0x1] (!%p191_p2), %v2091_v7  ;;  %v1374_v24 = vld [vmem:[%s2802_s3 + $0x1a0] sm:$0xff] (!%p191_p2)  ;;  %v1375_v25 = vld [vmem:[%s2802_s3 + $0x1a8] sm:$0xff] (!%p191_p2)  ;;  %v1882_v26 = vpack.c.bf16 (!%p191_p2), %v1407_v23, %v1406_v21 }
   0xd   : > { %367 = vst [vmem:[#allocation2 + $0xa7] sm:$0x1] %v2091_v7  ;;  %368 = vst [vmem:[#allocation2 + $0xbf] sm:$0x1] %v2091_v7  ;;  %v1392_v27 = vld [vmem:[%s2802_s3 + $0x230] sm:$0xff]  ;;  %v1393_v28 = vld [vmem:[%s2802_s3 + $0x238] sm:$0xff]  ;;  %v1852_v31 = vpack.c.bf16 %v1375_v25, %v1374_v24 }
   0xe   : > { %369 = vst [vmem:[#allocation2 + $0xd7] sm:$0x1] %v2091_v7  ;;  %s2807_s19 = smov (!%p2175_p3, %s1358_s19), 1  ;;  %v1408_v29 = vld [vmem:[%s2802_s3 + $0x2b0] sm:$0xff]  ;;  %v1409_v30 = vld [vmem:[%s2802_s3 + $0x2b8] sm:$0xff]  ;;  %1849 = vmatpush3.bf16.msra.mxu0 %v1848_v18  ;;  %1881 = vmatpush3.bf16.msra.mxu1 %v1878_v17  ;;  %v1854_v32 = vpack.c.bf16 %v1393_v28, %v1392_v27  ;;  %v1394_v36 = vld [vmem:[%s2802_s3 + $0x240] sm:$0xff] }
   0xf   : > { %1851 = vmatprep.subr.bf16.mxu0 %v1850_v22  ;;  %v1376_v33 = vld [vmem:[%s2802_s3 + $0x1b0] sm:$0xff]  ;;  %v1377_v34 = vld [vmem:[%s2802_s3 + $0x1b8] sm:$0xff]  ;;  %1883 = vmatprep.subr.bf16.mxu1 %v1882_v26  ;;  %v1886_v35 = vpack.c.bf16 %v1409_v30, %v1408_v29  ;;  %v1395_v37 = vld [vmem:[%s2802_s3 + $0x248] sm:$0xff]  ;;  %s1468_s27 = sshll.u32 %s2807_s19, 6 }
  0x10   : > { %v1410_v38 = vld [vmem:[%s2802_s3 + $0x2c0] sm:$0xff]  ;;  %v1411_v39 = vld [vmem:[%s2802_s3 + $0x2c8] sm:$0xff]  ;;  %v1856_v40 = vpack.c.bf16 %v1377_v34, %v1376_v33  ;;  %v1858_v41 = vpack.c.bf16 %v1395_v37, %v1394_v36  ;;  %s2254_s14 = scalar_lea.vmem %s2799_s0, %s1468_s27  ;;  %v1396_v45 = vld [vmem:[%s2802_s3 + $0x250] sm:$0xff]  ;;  %s2779_s8 = scalar_lea.vmem %s2803_s4, %s1468_s27 }
  0x11   : > { %v1378_v42 = vld [vmem:[%s2802_s3 + $0x1c0] sm:$0xff]  ;;  %v1379_v43 = vld [vmem:[%s2802_s3 + $0x1c8] sm:$0xff]  ;;  %v1890_v44 = vpack.c.bf16 %v1411_v39, %v1410_v38  ;;  %v1397_v46 = vld [vmem:[%s2802_s3 + $0x258] sm:$0xff]  ;;  %s1367_s27 = sshll.u32 %s2807_s19, 1 }
  0x12   : > { %1853 = vmatpush3.bf16.msra.mxu0 %v1852_v31  ;;  %1885 = vmatpush3.bf16.msra.mxu1 %v1882_v26  ;;  %v1412_v47 = vld [vmem:[%s2802_s3 + $0x2d0] sm:$0xff]  ;;  %v1413_v48 = vld [vmem:[%s2802_s3 + $0x2d8] sm:$0xff]  ;;  %v1860_v49 = vpack.c.bf16 %v1379_v43, %v1378_v42  ;;  %v236_v50 = vld [vmem:[%s2254_s14] sm:$0xff]  ;;  %v1862_v53 = vpack.c.bf16 %v1397_v46, %v1396_v45  ;;  %s235_s11 = scalar_lea.vmem %s2804_s5, %s1367_s27 }
  0x13   : > { %1855 = vmatprep.subr.bf16.mxu0 %v1854_v32  ;;  %1887 = vmatprep.subr.bf16.mxu1 %v1886_v35  ;;  %v2272_v51 = vld [vmem:[%s2800_s1] ss:$0 sm:$0xff]  ;;  %v1380_v54 = vld [vmem:[%s2802_s3 + $0x1d0] sm:$0xff]  ;;  %v1381_v55 = vld [vmem:[%s2802_s3 + $0x1d8] sm:$0xff]  ;;  %v1894_v57 = vpack.c.bf16 %v1413_v48, %v1412_v47 }
  0x14   : > { %v2277_v52 = vld [vmem:[%s2801_s2] ss:$0 sm:$0xff]  ;;  %v251_v56 = vmul.f32 %v2272_v51, %v236_v50  ;;  %v1399_v59 = vld [vmem:[%s2802_s3 + $0x268] sm:$0xff]  ;;  %v1864_v1 = vpack.c.bf16 %v1381_v55, %v1380_v54  ;;  %v238_v8 = vld [vmem:[%s2254_s14 + $0x10] sm:$0xff] }
  0x15   : > { %v1398_v58 = vld [vmem:[%s2802_s3 + $0x260] sm:$0xff]  ;;  %v237_v60 = vld [vmem:[%s2254_s14 + $0x8] sm:$0xff]  ;;  %v1400_v10 = vld [vmem:[%s2802_s3 + $0x270] sm:$0xff]  ;;  %v253_v12 = vmul.f32 %v2272_v51, %v238_v8 }
  0x16   : > { %1857 = vmatpush3.bf16.msra.mxu0 %v1856_v40  ;;  %1889 = vmatpush3.bf16.msra.mxu1 %v1886_v35  ;;  %v1414_v61 = vld [vmem:[%s2802_s3 + $0x2e0] sm:$0xff]  ;;  %v1415_v62 = vld [vmem:[%s2802_s3 + $0x2e8] sm:$0xff]  ;;  %v266_v63 = vadd.f32 %v2277_v52, %v251_v56  ;;  %v252_v0 = vmul.f32 %v2272_v51, %v237_v60  ;;  %v1866_v2 = vpack.c.bf16 %v1399_v59, %v1398_v58  ;;  %v1401_v11 = vld [vmem:[%s2802_s3 + $0x278] sm:$0xff] }
  0x17   : > { %1859 = vmatprep.subr.bf16.mxu0 %v1858_v41  ;;  %1891 = vmatprep.subr.bf16.mxu1 %v1890_v44  ;;  %v1382_v3 = vld [vmem:[%s2802_s3 + $0x1e0] sm:$0xff]  ;;  %v1383_v4 = vld [vmem:[%s2802_s3 + $0x1e8] sm:$0xff]  ;;  %v1898_v9 = vpack.c.bf16 %v1415_v62, %v1414_v61  ;;  %v1416_v13 = vld [vmem:[%s2802_s3 + $0x2f0] sm:$0xff]  ;;  %v268_v20 = vadd.f32 %v2277_v52, %v253_v12  ;;  %v1870_v22 = vpack.c.bf16 %v1401_v11, %v1400_v10 }
  0x18   : > { %v2307_v5 = vmax.f32 %v266_v63, 0.0  ;;  %v267_v6 = vadd.f32 %v2277_v52, %v252_v0  ;;  %v1417_v14 = vld [vmem:[%s2802_s3 + $0x2f8] sm:$0xff]  ;;  %v1868_v19 = vpack.c.bf16 %v1383_v4, %v1382_v3  ;;  %v1384_v23 = vld [vmem:[%s2802_s3 + $0x1f0] sm:$0xff]  ;;  %v410_v28 = vld [vmem:[%s2802_s3 + $0x80] sm:$0xff] }
  0x19   : > { %v239_v18 = vld [vmem:[%s2254_s14 + $0x18] sm:$0xff]  ;;  %v1902_v27 = vpack.c.bf16 %v1417_v14, %v1416_v13  ;;  %v2343_v29 = vmax.f32 %v268_v20, 0.0  ;;  %v240_v31 = vld [vmem:[%s2254_s14 + $0x20] sm:$0xff]  ;;  %v411_v32 = vld [vmem:[%s2802_s3 + $0x88] sm:$0xff] }
  0x1a   : > { %1861 = vmatpush3.bf16.msra.mxu0 %v1860_v49  ;;  %1893 = vmatpush3.bf16.msra.mxu1 %v1890_v44  ;;  %v306_v15 = vrot.slane %v2307_v5, 7  ;;  %v338_v16 = vrot.slane %v2307_v5, 1  ;;  %v2327_v17 = vmax.f32 %v267_v6, 0.0  ;;  %v254_v21 = vmul.f32 %v2272_v51, %v239_v18  ;;  %v1385_v24 = vld [vmem:[%s2802_s3 + $0x1f8] sm:$0xff]  ;;  %v426_v33 = vld [vmem:[%s2802_s3 + $0x100] sm:$0xff]  ;;  %v427_v34 = vld [vmem:[%s2802_s3 + $0x108] sm:$0xff] }
  0x1b   : > { %1863 = vmatprep.subr.bf16.mxu0 %v1862_v53  ;;  %1895 = vmatprep.subr.bf16.mxu1 %v1894_v57  ;;  %v255_v35 = vmul.f32 %v2272_v51, %v240_v31  ;;  %v1872_v36 = vpack.c.bf16 %v1385_v24, %v1384_v23  ;;  %v308_v37 = vrot.slane %v2343_v29, 7  ;;  %v241_v39 = vld [vmem:[%s2254_s14 + $0x28] sm:$0xff]  ;;  %v340_v40 = vrot.slane %v2343_v29, 1  ;;  %v394_v41 = vld [vmem:[%s2802_s3] sm:$0xff]  ;;  %v412_v47 = vld [vmem:[%s2802_s3 + $0x90] sm:$0xff] }
  0x1c   : > { %579 = vmatprep.mubr.f32.mxu0 %v2307_v5  ;;  %322 = vst [vmem:[#allocation2 + $0x18] sm:$0xfe] %v306_v15  ;;  %354 = vst [vmem:[#allocation2 + $0x28] sm:$0x7f] %v338_v16  ;;  %v339_v25 = vrot.slane %v2327_v17, 1  ;;  %v307_v26 = vrot.slane %v2327_v17, 7  ;;  %v269_v30 = vadd.f32 %v2277_v52, %v254_v21  ;;  %v256_v44 = vmul.f32 %v2272_v51, %v241_v39 }
  0x1d   : > { %v395_v42 = vld [vmem:[%s2802_s3 + $0x8] sm:$0xff]  ;;  %v270_v43 = vadd.f32 %v2277_v52, %v255_v35  ;;  %v1906_v45 = vpack.c.bf16 %v411_v32, %v410_v28  ;;  %v1938_v46 = vpack.c.bf16 %v427_v34, %v426_v33  ;;  %324 = vst [vmem:[#allocation2 + $0x48] sm:$0xfe] %v308_v37  ;;  %356 = vst [vmem:[#allocation2 + $0x58] sm:$0x7f] %v340_v40  ;;  %v242_v50 = vld [vmem:[%s2254_s14 + $0x30] sm:$0xff] }
  0x1e   : > { %1865 = vmatpush3.bf16.msra.mxu0 %v1864_v1  ;;  %1897 = vmatpush3.bf16.msra.mxu1 %v1894_v57  ;;  %355 = vst [vmem:[#allocation2 + $0x40] sm:$0x7f] %v339_v25  ;;  %323 = vst [vmem:[#allocation2 + $0x30] sm:$0xfe] %v307_v26  ;;  %v2358_v38 = vmax.f32 %v269_v30, 0.0  ;;  %v413_v53 = vld [vmem:[%s2802_s3 + $0x98] sm:$0xff]  ;;  %v271_v57 = vadd.f32 %v2277_v52, %v256_v44  ;;  %v257_v58 = vmul.f32 %v2272_v51, %v242_v50 }
  0x1f   : > { %1867 = vmatprep.subr.bf16.mxu0 %v1866_v2  ;;  %1899 = vmatprep.subr.bf16.mxu1 %v1898_v9  ;;  %v428_v54 = vld [vmem:[%s2802_s3 + $0x110] sm:$0xff]  ;;  %v429_v55 = vld [vmem:[%s2802_s3 + $0x118] sm:$0xff]  ;;  %v2385_v56 = vmax.f32 %v270_v43, 0.0  ;;  %v1908_v61 = vpack.c.bf16 %v395_v42, %v394_v41  ;;  %v1910_v8 = vpack.c.bf16 %v413_v53, %v412_v47  ;;  %v414_v10 = vld [vmem:[%s2802_s3 + $0xa0] sm:$0xff] }
  0x20   : > { %v309_v48 = vrot.slane %v2358_v38, 7  ;;  %v341_v49 = vrot.slane %v2358_v38, 1  ;;  %v396_v62 = vld [vmem:[%s2802_s3 + $0x10] sm:$0xff]  ;;  %v397_v63 = vld [vmem:[%s2802_s3 + $0x18] sm:$0xff]  ;;  %v2401_v1 = vmax.f32 %v271_v57, 0.0  ;;  %v272_v2 = vadd.f32 %v2277_v52, %v257_v58  ;;  %v415_v11 = vld [vmem:[%s2802_s3 + $0xa8] sm:$0xff] }
  0x21   : > { %v310_v0 = vrot.slane %v2385_v56, 7  ;;  %v342_v3 = vrot.slane %v2385_v56, 1  ;;  %v243_v4 = vld [vmem:[%s2254_s14 + $0x38] sm:$0xff]  ;;  %v430_v13 = vld [vmem:[%s2802_s3 + $0x120] sm:$0xff]  ;;  %v431_v14 = vld [vmem:[%s2802_s3 + $0x128] sm:$0xff]  ;;  %v1914_v21 = vpack.c.bf16 %v415_v11, %v414_v10 }
  0x22   : > { %1869 = vmatpush3.bf16.msra.mxu0 %v1868_v19  ;;  %1901 = vmatpush3.bf16.msra.mxu1 %v1898_v9  ;;  %325 = vst [vmem:[#allocation2 + $0x60] sm:$0xfe] %v309_v48  ;;  %357 = vst [vmem:[#allocation2 + $0x70] sm:$0x7f] %v341_v49  ;;  %v1942_v9 = vpack.c.bf16 %v429_v55, %v428_v54  ;;  %v258_v12 = vmul.f32 %v2272_v51, %v243_v4  ;;  %v311_v15 = vrot.slane %v2401_v1, 7  ;;  %v399_v23 = vld [vmem:[%s2802_s3 + $0x28] sm:$0xff] }
  0x23   : > { %1871 = vmatprep.subr.bf16.mxu0 %v1870_v22  ;;  %1903 = vmatprep.subr.bf16.mxu1 %v1902_v27  ;;  %v2389_v59 = vld [vmem:[#allocation2 + $0x18] sm:$0xff]  ;;  %v2391_v60 = vld [vmem:[#allocation2 + $0x28] sm:$0xff]  ;;  %326 = vst [vmem:[#allocation2 + $0x78] sm:$0xfe] %v310_v0  ;;  %v2423_v16 = vmax.f32 %v272_v2, 0.0  ;;  %v343_v18 = vrot.slane %v2401_v1, 1  ;;  %v1912_v19 = vpack.c.bf16 %v397_v63, %v396_v62  ;;  %v1946_v26 = vpack.c.bf16 %v431_v14, %v430_v13 }
  0x24   : > { %1742 = vmatprep.mubr.f32.mxu1 %v2391_v60  ;;  %358 = vst [vmem:[#allocation2 + $0x88] sm:$0x7f] %v342_v3  ;;  %v273_v20 = vadd.f32 %v2277_v52, %v258_v12  ;;  %v398_v22 = vld [vmem:[%s2802_s3 + $0x20] sm:$0xff]  ;;  %327 = vst [vmem:[#allocation2 + $0x90] sm:$0xfe] %v311_v15  ;;  %v2437_v24 = vld [vmem:[#allocation2 + $0x58] sm:$0xff] }
  0x25   : > { %v2406_v6 = vld [vmem:[#allocation2 + $0x40] sm:$0xff]  ;;  %v2427_v51 = vld [vmem:[#allocation2 + $0x30] sm:$0xff]  ;;  %v312_v25 = vrot.slane %v2423_v16, 7  ;;  %359 = vst [vmem:[#allocation2 + $0xa0] sm:$0x7f] %v343_v18  ;;  %v344_v52 = vrot.slane %v2423_v16, 1  ;;  %v1916_v35 = vpack.c.bf16 %v399_v23, %v398_v22 }
  0x26   : > { %1873 = vmatpush3.bf16.msra.mxu0 %v1872_v36  ;;  %1905 = vmatpush3.bf16.msra.mxu1 %v1902_v27  ;;  %v416_v27 = vld [vmem:[%s2802_s3 + $0xb0] sm:$0xff]  ;;  %v417_v28 = vld [vmem:[%s2802_s3 + $0xb8] sm:$0xff]  ;;  %v2447_v30 = vmax.f32 %v273_v20, 0.0  ;;  %v2460_v34 = vld [vmem:[#allocation2 + $0x48] sm:$0xff] }
  0x27   : > { %1907 = vmatprep.subr.bf16.mxu0 %v1906_v45  ;;  %1939 = vmatprep.subr.bf16.mxu1 %v1938_v46  ;;  %v432_v31 = vld [vmem:[%s2802_s3 + $0x130] sm:$0xff]  ;;  %v433_v32 = vld [vmem:[%s2802_s3 + $0x138] sm:$0xff]  ;;  %328 = vst [vmem:[#allocation2 + $0xa8] sm:$0xfe] %v312_v25  ;;  %360 = vst [vmem:[#allocation2 + $0xb8] sm:$0x7f] %v344_v52  ;;  %v1918_v39 = vpack.c.bf16 %v417_v28, %v416_v27 }
  0x28   : > { %v313_v36 = vrot.slane %v2447_v30, 7  ;;  %v345_v37 = vrot.slane %v2447_v30, 1  ;;  %v400_v40 = vld [vmem:[%s2802_s3 + $0x30] sm:$0xff]  ;;  %v401_v41 = vld [vmem:[%s2802_s3 + $0x38] sm:$0xff]  ;;  %v1950_v42 = vpack.c.bf16 %v433_v32, %v432_v31  ;;  %v418_v43 = vld [vmem:[%s2802_s3 + $0xc0] sm:$0xff] }
  0x29   : > { %580 = vmatmul.mubr.f32.vlgmr.msra.gmra.mrb[0].mxu0 %v2389_v59  ;;  %1743 = vmatmul.mubr.f32.vlgmr.msra.gmra.mrb[0].mxu1 %v2406_v6  ;;  %v2457_v33 = vld [vmem:[#allocation2 + $0x70] sm:$0xff]  ;;  %v419_v44 = vld [vmem:[%s2802_s3 + $0xc8] sm:$0xff]  ;;  %v2488_v48 = vld [vmem:[#allocation2 + $0x60] sm:$0xff]  ;;  %v1920_v49 = vpack.c.bf16 %v401_v41, %v400_v40 }
  0x2a   : > { %1909 = vmatpush3.bf16.msra.mxu0 %v1908_v61  ;;  %1941 = vmatpush3.bf16.msra.mxu1 %v1938_v46  ;;  %329 = vst [vmem:[#allocation2 + $0xc0] sm:$0xfe] %v313_v36  ;;  %361 = vst [vmem:[#allocation2 + $0xd0] sm:$0x7f] %v345_v37  ;;  %v434_v46 = vld [vmem:[%s2802_s3 + $0x140] sm:$0xff]  ;;  %v435_v47 = vld [vmem:[%s2802_s3 + $0x148] sm:$0xff]  ;;  %v1922_v53 = vpack.c.bf16 %v419_v44, %v418_v43 }
  0x2b   : > { %584 = vmatprep.mubr.f32.mxu0 %v2327_v17  ;;  %1911 = vmatprep.subr.bf16.mxu0 %v1910_v8  ;;  %v2477_v45 = vld [vmem:[#allocation2 + $0x88] sm:$0xff]  ;;  %v402_v54 = vld [vmem:[%s2802_s3 + $0x40] sm:$0xff]  ;;  %v1954_v57 = vpack.c.bf16 %v435_v47, %v434_v46  ;;  %v420_v58 = vld [vmem:[%s2802_s3 + $0xd0] sm:$0xff] }
  0x2c   : > { %1943 = vmatprep.subr.bf16.mxu1 %v1942_v9  ;;  %1745 = vmatprep.mubr.f32.mxu1 %v2437_v24  ;;  %v2490_v50 = vld [vmem:[#allocation2 + $0xa0] sm:$0xff]  ;;  %v403_v55 = vld [vmem:[%s2802_s3 + $0x48] sm:$0xff]  ;;  %v421_v61 = vld [vmem:[%s2802_s3 + $0xd8] sm:$0xff] }
  0x2d   : > { %585 = vmatmul.mubr.f32.gmra.mrb[2].mxu0 %v2427_v51  ;;  %1746 = vmatmul.mubr.f32.gmra.mrb[2].mxu1 %v2457_v33  ;;  %v436_v63 = vld [vmem:[%s2802_s3 + $0x150] sm:$0xff]  ;;  %v437_v0 = vld [vmem:[%s2802_s3 + $0x158] sm:$0xff]  ;;  %v1924_v3 = vpack.c.bf16 %v403_v55, %v402_v54  ;;  %v1926_v4 = vpack.c.bf16 %v421_v61, %v420_v58  ;;  %v422_v12 = vld [vmem:[%s2802_s3 + $0xe0] sm:$0xff] }
  0x2e   : > { %1913 = vmatpush3.bf16.msra.mxu0 %v1912_v19  ;;  %589 = vmatprep.mubr.f32.mxu0 %v2343_v29  ;;  %v2505_v62 = vld [vmem:[#allocation2 + $0xb8] sm:$0xff]  ;;  %v404_v8 = vld [vmem:[%s2802_s3 + $0x50] sm:$0xff]  ;;  %v1958_v11 = vpack.c.bf16 %v437_v0, %v436_v63  ;;  %v423_v13 = vld [vmem:[%s2802_s3 + $0xe8] sm:$0xff] }
  0x2f   : > { %1945 = vmatpush3.bf16.msra.mxu1 %v1942_v9  ;;  %1915 = vmatprep.subr.bf16.mxu0 %v1914_v21  ;;  %v2516_v2 = vld [vmem:[#allocation2 + $0x78] sm:$0xff]  ;;  %v438_v14 = vld [vmem:[%s2802_s3 + $0x160] sm:$0xff]  ;;  %v439_v15 = vld [vmem:[%s2802_s3 + $0x168] sm:$0xff]  ;;  %v1930_v20 = vpack.c.bf16 %v423_v13, %v422_v12 }
  0x30   : > { %1947 = vmatprep.subr.bf16.mxu1 %v1946_v26  ;;  %1748 = vmatprep.mubr.f32.mxu1 %v2477_v45  ;;  %v405_v9 = vld [vmem:[%s2802_s3 + $0x58] sm:$0xff]  ;;  %v2542_v18 = vld [vmem:[#allocation2 + $0x90] sm:$0xff]  ;;  %v406_v21 = vld [vmem:[%s2802_s3 + $0x60] sm:$0xff]  ;;  %v1962_v23 = vpack.c.bf16 %v439_v15, %v438_v14 }
  0x31   : > { %590 = vmatmul.mubr.f32.gmra.mrb[4].mxu0 %v2460_v34  ;;  %1749 = vmatmul.mubr.f32.gmra.mrb[4].mxu1 %v2490_v50  ;;  %v2524_v10 = vld [vmem:[#allocation2 + $0xd0] sm:$0xff]  ;;  %v1928_v19 = vpack.c.bf16 %v405_v9, %v404_v8  ;;  %v407_v22 = vld [vmem:[%s2802_s3 + $0x68] sm:$0xff]  ;;  %v425_v52 = vld [vmem:[%s2802_s3 + $0xf8] sm:$0xff] }
  0x32   : > { %1917 = vmatpush3.bf16.msra.mxu0 %v1916_v35  ;;  %594 = vmatprep.mubr.f32.mxu0 %v2358_v38  ;;  %v424_v25 = vld [vmem:[%s2802_s3 + $0xf0] sm:$0xff]  ;;  %v441_v27 = vld [vmem:[%s2802_s3 + $0x178] sm:$0xff]  ;;  %v2564_v28 = vld [vmem:[#allocation2 + $0xa8] sm:$0xff]  ;;  %v1932_v31 = vpack.c.bf16 %v407_v22, %v406_v21 }
  0x33   : > { %1949 = vmatpush3.bf16.msra.mxu1 %v1946_v26  ;;  %1919 = vmatprep.subr.bf16.mxu0 %v1918_v39  ;;  %v440_v26 = vld [vmem:[%s2802_s3 + $0x170] sm:$0xff]  ;;  %v1934_v32 = vpack.c.bf16 %v425_v52, %v424_v25  ;;  %v409_v36 = vld [vmem:[%s2802_s3 + $0x78] sm:$0xff]  ;;  %v1434_v39 = vld [vmem:[%s2802_s3 + $0x380] sm:$0xff] }
  0x34   : > { %1951 = vmatprep.subr.bf16.mxu1 %v1950_v42  ;;  %1751 = vmatprep.mubr.f32.mxu1 %v2505_v62  ;;  %v408_v35 = vld [vmem:[%s2802_s3 + $0x70] sm:$0xff]  ;;  %v1966_v37 = vpack.c.bf16 %v441_v27, %v440_v26  ;;  %v1435_v40 = vld [vmem:[%s2802_s3 + $0x388] sm:$0xff]  ;;  %v1450_v41 = vld [vmem:[%s2802_s3 + $0x400] sm:$0xff] }
  0x35   : > { %595 = vmatmul.mubr.f32.gmra.mrb[6].mxu0 %v2488_v48  ;;  %1752 = vmatmul.mubr.f32.gmra.mrb[6].mxu1 %v2524_v10  ;;  %v2586_v43 = vld [vmem:[#allocation2 + $0xc0] sm:$0xff]  ;;  %v1936_v44 = vpack.c.bf16 %v409_v36, %v408_v35  ;;  %v1970_v46 = vpack.c.bf16 %v1435_v40, %v1434_v39  ;;  %v1436_v54 = vld [vmem:[%s2802_s3 + $0x390] sm:$0xff]  ;;  %v1437_v55 = vld [vmem:[%s2802_s3 + $0x398] sm:$0xff] }
  0x36   : > { %1921 = vmatpush3.bf16.msra.mxu0 %v1920_v49  ;;  %599 = vmatprep.mubr.f32.mxu0 %v2385_v56  ;;  %v1418_v47 = vld [vmem:[%s2802_s3 + $0x300] sm:$0xff]  ;;  %v1419_v49 = vld [vmem:[%s2802_s3 + $0x308] sm:$0xff]  ;;  %v1453_v58 = vld [vmem:[%s2802_s3 + $0x418] sm:$0xff] }
  0x37   : > { %1953 = vmatpush3.bf16.msra.mxu1 %v1950_v42  ;;  %1923 = vmatprep.subr.bf16.mxu0 %v1922_v53  ;;  %v1451_v42 = vld [vmem:[%s2802_s3 + $0x408] sm:$0xff]  ;;  %v1972_v61 = vpack.c.bf16 %v1419_v49, %v1418_v47  ;;  %v1420_v63 = vld [vmem:[%s2802_s3 + $0x310] sm:$0xff]  ;;  %v1421_v0 = vld [vmem:[%s2802_s3 + $0x318] sm:$0xff] }
  0x38   : > { %1955 = vmatprep.subr.bf16.mxu1 %v1954_v57  ;;  %1786 = vmatprep.mubr.f32.mxu1 %v2091_v7  ;;  %v2002_v53 = vpack.c.bf16 %v1451_v42, %v1450_v41  ;;  %v1438_v8 = vld [vmem:[%s2802_s3 + $0x3a0] sm:$0xff]  ;;  %v1439_v9 = vld [vmem:[%s2802_s3 + $0x3a8] sm:$0xff]  ;;  %v1976_v13 = vpack.c.bf16 %v1421_v0, %v1420_v63  ;;  %v1456_v21 = vld [vmem:[%s2802_s3 + $0x430] sm:$0xff] }
  0x39   : > { %600 = vmatmul.mubr.f32.gmra.mrb[8].mxu0 %v2516_v2  ;;  %v1455_v12 = vld [vmem:[%s2802_s3 + $0x428] sm:$0xff]  ;;  %v1978_v14 = vpack.c.bf16 %v1439_v9, %v1438_v8  ;;  %v1422_v15 = vld [vmem:[%s2802_s3 + $0x320] sm:$0xff]  ;;  %v1457_v22 = vld [vmem:[%s2802_s3 + $0x438] sm:$0xff] }
  0x3a   : > { %1925 = vmatpush3.bf16.msra.mxu0 %v1924_v3  ;;  %604 = vmatprep.mubr.f32.mxu0 %v2401_v1  ;;  %v1974_v3 = vpack.c.bf16 %v1437_v55, %v1436_v54  ;;  %v1425_v52 = vld [vmem:[%s2802_s3 + $0x338] sm:$0xff]  ;;  %v2014_v26 = vpack.c.bf16 %v1457_v22, %v1456_v21  ;;  %v1442_v27 = vld [vmem:[%s2802_s3 + $0x3c0] sm:$0xff]  ;;  %v1459_v35 = vld [vmem:[%s2802_s3 + $0x448] sm:$0xff] }
  0x3b   : > { %1957 = vmatpush3.bf16.msra.mxu1 %v1954_v57  ;;  %1927 = vmatprep.subr.bf16.mxu0 %v1926_v4  ;;  %v1452_v57 = vld [vmem:[%s2802_s3 + $0x410] sm:$0xff]  ;;  %v1426_v39 = vld [vmem:[%s2802_s3 + $0x340] sm:$0xff]  ;;  %v1427_v40 = vld [vmem:[%s2802_s3 + $0x348] sm:$0xff] }
  0x3c   : > { %1959 = vmatprep.subr.bf16.mxu1 %v1958_v11  ;;  %v2006_v4 = vpack.c.bf16 %v1453_v58, %v1452_v57  ;;  %v1444_v42 = vld [vmem:[%s2802_s3 + $0x3d0] sm:$0xff]  ;;  %v1461_v47 = vld [vmem:[%s2802_s3 + $0x458] sm:$0xff]  ;;  %v1988_v49 = vpack.c.bf16 %v1427_v40, %v1426_v39  ;;  %v1446_v58 = vld [vmem:[%s2802_s3 + $0x3e0] sm:$0xff] }
  0x3d   : > { %605 = vmatmul.mubr.f32.gmra.mrb[10].mxu0 %v2542_v18  ;;  %v1428_v54 = vld [vmem:[%s2802_s3 + $0x350] sm:$0xff]  ;;  %v1429_v55 = vld [vmem:[%s2802_s3 + $0x358] sm:$0xff]  ;;  %v1462_v63 = vld [vmem:[%s2802_s3 + $0x460] sm:$0xff] }
  0x3e   : > { %1929 = vmatpush3.bf16.msra.mxu0 %v1928_v19  ;;  %609 = vmatprep.mubr.f32.mxu0 %v2423_v16  ;;  %v1423_v19 = vld [vmem:[%s2802_s3 + $0x328] sm:$0xff]  ;;  %v1430_v8 = vld [vmem:[%s2802_s3 + $0x360] sm:$0xff] }
  0x3f   : > { %1961 = vmatpush3.bf16.msra.mxu1 %v1958_v11  ;;  %1931 = vmatprep.subr.bf16.mxu0 %v1930_v20  ;;  %v1454_v11 = vld [vmem:[%s2802_s3 + $0x420] sm:$0xff]  ;;  %v1463_v0 = vld [vmem:[%s2802_s3 + $0x468] sm:$0xff] }
  0x40   : > { %1963 = vmatprep.subr.bf16.mxu1 %v1962_v23  ;;  %v2010_v20 = vpack.c.bf16 %v1455_v12, %v1454_v11  ;;  %v1431_v9 = vld [vmem:[%s2802_s3 + $0x368] sm:$0xff]  ;;  %v2026_v11 = vpack.c.bf16 %v1463_v0, %v1462_v63  ;;  %v1449_v12 = vld [vmem:[%s2802_s3 + $0x3f8] sm:$0xff] }
  0x41   : > { %610 = vmatmul.mubr.f32.gmra.mrb[12].mxu0 %v2564_v28 }
  0x42   : > { %1933 = vmatpush3.bf16.msra.mxu0 %v1932_v31  ;;  %614 = vmatprep.mubr.f32.mxu0 %v2447_v30  ;;  %v1443_v31 = vld [vmem:[%s2802_s3 + $0x3c8] sm:$0xff] }
  0x43   : > { %1965 = vmatpush3.bf16.msra.mxu1 %v1962_v23  ;;  %1935 = vmatprep.subr.bf16.mxu0 %v1934_v32  ;;  %v1980_v23 = vpack.c.bf16 %v1423_v19, %v1422_v15  ;;  %v1458_v32 = vld [vmem:[%s2802_s3 + $0x440] sm:$0xff]  ;;  %v1996_v15 = vpack.c.bf16 %v1431_v9, %v1430_v8 }
  0x44   : > { %1967 = vmatprep.subr.bf16.mxu1 %v1966_v37  ;;  %v2018_v41 = vpack.c.bf16 %v1459_v35, %v1458_v32 }
  0x45   : > { %615 = vmatmul.mubr.f32.gmra.mrb[14].mxu0 %v2586_v43 }
  0x46   : > { %1937 = vmatpush3.bf16.msra.mxu0 %v1936_v44  ;;  %789 = vmatprep.mubr.f32.mxu0 %v2091_v7  ;;  %v1445_v44 = vld [vmem:[%s2802_s3 + $0x3d8] sm:$0xff] }
  0x47   : > { %1969 = vmatpush3.bf16.msra.mxu1 %v1966_v37  ;;  %1971 = vmatprep.subr.bf16.mxu0 %v1970_v46  ;;  %v1986_v37 = vpack.c.bf16 %v1443_v31, %v1442_v27  ;;  %v1460_v46 = vld [vmem:[%s2802_s3 + $0x450] sm:$0xff] }
  0x48   : > { %2003 = vmatprep.subr.bf16.mxu1 %v2002_v53  ;;  %v2022_v57 = vpack.c.bf16 %v1461_v47, %v1460_v46 }
  0x49   : > { %790 = vmatmul.mubr.f32.vlgmr.msra.gmra.mrb[16].mxu0 %v2091_v7 }
  0x4a   : > { %1787 = vmatmul.mubr.f32.vlgmr.msra.gmra.mrb[0].mxu1 %v2391_v60  ;;  %1973 = vmatpush3.bf16.msra.mxu0 %v1972_v61  ;;  %v1440_v60 = vld [vmem:[%s2802_s3 + $0x3b0] sm:$0xff]  ;;  %v1447_v61 = vld [vmem:[%s2802_s3 + $0x3e8] sm:$0xff] }
  0x4b   : > { %2005 = vmatpush3.bf16.msra.mxu1 %v2002_v53  ;;  %794 = vmatprep.mubr.f32.mxu0 %v2307_v5  ;;  %v1441_v5 = vld [vmem:[%s2802_s3 + $0x3b8] sm:$0xff]  ;;  %v1990_v53 = vpack.c.bf16 %v1445_v44, %v1444_v42 }
  0x4c   : > { %1975 = vmatprep.subr.bf16.mxu0 %v1974_v3  ;;  %2007 = vmatprep.subr.bf16.mxu1 %v2006_v4  ;;  %v1982_v25 = vpack.c.bf16 %v1441_v5, %v1440_v60  ;;  %v1992_v3 = vpack.c.bf16 %v1429_v55, %v1428_v54  ;;  %v1433_v60 = vld [vmem:[%s2802_s3 + $0x378] sm:$0xff] }
  0x4d   : > { %795 = vmatmul.mubr.f32.gmra.mrb[18].mxu0 %v2389_v59  ;;  %1789 = vmatprep.mubr.f32.mxu1 %v2406_v6  ;;  %v1424_v59 = vld [vmem:[%s2802_s3 + $0x330] sm:$0xff] }
  0x4e   : > { %1977 = vmatpush3.bf16.msra.mxu0 %v1976_v13  ;;  %799 = vmatprep.mubr.f32.mxu0 %v2327_v17  ;;  %v1984_v36 = vpack.c.bf16 %v1425_v52, %v1424_v59  ;;  %v1464_v13 = vld [vmem:[%s2802_s3 + $0x470] sm:$0xff] }
  0x4f   : > { %2009 = vmatpush3.bf16.msra.mxu1 %v2006_v4  ;;  %1979 = vmatprep.subr.bf16.mxu0 %v1978_v14  ;;  %v1994_v4 = vpack.c.bf16 %v1447_v61, %v1446_v58  ;;  %v1465_v14 = vld [vmem:[%s2802_s3 + $0x478] sm:$0xff] }
  0x50   : > { %2011 = vmatprep.subr.bf16.mxu1 %v2010_v20  ;;  %1790 = vmatmul.mubr.f32.gmra.mrb[2].mxu1 %v2437_v24  ;;  %v2030_v5 = vpack.c.bf16 %v1465_v14, %v1464_v13 }
  0x51   : > { %800 = vmatmul.mubr.f32.gmra.mrb[20].mxu0 %v2427_v51  ;;  %1792 = vmatprep.mubr.f32.mxu1 %v2457_v33 }
  0x52   : > { %1981 = vmatpush3.bf16.msra.mxu0 %v1980_v23  ;;  %804 = vmatprep.mubr.f32.mxu0 %v2343_v29 }
  0x53   : > { %2013 = vmatpush3.bf16.msra.mxu1 %v2010_v20  ;;  %1983 = vmatprep.subr.bf16.mxu0 %v1982_v25  ;;  %v1432_v20 = vld [vmem:[%s2802_s3 + $0x370] sm:$0xff] }
  0x54   : > { %2015 = vmatprep.subr.bf16.mxu1 %v2014_v26  ;;  %1793 = vmatmul.mubr.f32.gmra.mrb[4].mxu1 %v2477_v45  ;;  %v2000_v21 = vpack.c.bf16 %v1433_v60, %v1432_v20 }
  0x55   : > { %805 = vmatmul.mubr.f32.gmra.mrb[22].mxu0 %v2460_v34  ;;  %1795 = vmatprep.mubr.f32.mxu1 %v2490_v50 }
  0x56   : > { %1985 = vmatpush3.bf16.msra.mxu0 %v1984_v36  ;;  %809 = vmatprep.mubr.f32.mxu0 %v2358_v38 }
  0x57   : > { %2017 = vmatpush3.bf16.msra.mxu1 %v2014_v26  ;;  %1987 = vmatprep.subr.bf16.mxu0 %v1986_v37 }
  0x58   : > { %2019 = vmatprep.subr.bf16.mxu1 %v2018_v41  ;;  %1796 = vmatmul.mubr.f32.gmra.mrb[6].mxu1 %v2505_v62 }
  0x59   : > { %810 = vmatmul.mubr.f32.gmra.mrb[24].mxu0 %v2488_v48  ;;  %1830 = vmatprep.mubr.f32.mxu1 %v2406_v6  ;;  %v1448_v6 = vld [vmem:[%s2802_s3 + $0x3f0] sm:$0xff] }
  0x5a   : > { %1989 = vmatpush3.bf16.msra.mxu0 %v1988_v49  ;;  %814 = vmatprep.mubr.f32.mxu0 %v2385_v56  ;;  %v1998_v19 = vpack.c.bf16 %v1449_v12, %v1448_v6 }
  0x5b   : > { %2021 = vmatpush3.bf16.msra.mxu1 %v2018_v41  ;;  %1991 = vmatprep.subr.bf16.mxu0 %v1990_v53 }
  0x5c   : > { %2023 = vmatprep.subr.bf16.mxu1 %v2022_v57 }
  0x5d   : > { %815 = vmatmul.mubr.f32.gmra.mrb[26].mxu0 %v2516_v2 }
  0x5e   : > { %1993 = vmatpush3.bf16.msra.mxu0 %v1992_v3  ;;  %819 = vmatprep.mubr.f32.mxu0 %v2401_v1 }
  0x5f   : > { %2025 = vmatpush3.bf16.msra.mxu1 %v2022_v57  ;;  %1995 = vmatprep.subr.bf16.mxu0 %v1994_v4 }
  0x60   : > { %2027 = vmatprep.subr.bf16.mxu1 %v2026_v11 }
  0x61   : > { %820 = vmatmul.mubr.f32.gmra.mrb[28].mxu0 %v2542_v18 }
  0x62   : > { %1997 = vmatpush3.bf16.msra.mxu0 %v1996_v15  ;;  %824 = vmatprep.mubr.f32.mxu0 %v2423_v16 }
  0x63   : > { %2029 = vmatpush3.bf16.msra.mxu1 %v2026_v11  ;;  %1999 = vmatprep.subr.bf16.mxu0 %v1998_v19 }
  0x64   : > { %2031 = vmatprep.subr.bf16.mxu1 %v2030_v5 }
  0x65   : > { %825 = vmatmul.mubr.f32.gmra.mrb[30].mxu0 %v2564_v28 }
  0x66   : > { %2001 = vmatpush3.bf16.msra.mxu0 %v2000_v21  ;;  %1073 = vmatprep.mubr.f32.mxu0 %v2327_v17 }
  0x67   : > { %2033 = vmatpush3.bf16.msra.mxu1 %v2030_v5 }
  0x69   : > { %1074 = vmatmul.mubr.f32.vlgmr.msra.gmra.mrb[32].mxu0 %v2427_v51 }
  0x6a   : > { %1831 = vmatmul.mubr.f32.vlgmr.msra.gmra.mrb[0].mxu1 %v2437_v24  ;;  %1078 = vmatprep.mubr.f32.mxu0 %v2343_v29 }
  0x6b   : > { %1833 = vmatprep.mubr.f32.mxu1 %v2457_v33 }
  0x6d   : > { %1079 = vmatmul.mubr.f32.gmra.mrb[34].mxu0 %v2460_v34 }
  0x6e   : > { %1834 = vmatmul.mubr.f32.gmra.mrb[2].mxu1 %v2477_v45  ;;  %1083 = vmatprep.mubr.f32.mxu0 %v2358_v38 }
  0x6f   : > { %1836 = vmatprep.mubr.f32.mxu1 %v2490_v50 }
  0x71   : > { %1084 = vmatmul.mubr.f32.gmra.mrb[36].mxu0 %v2488_v48 }
  0x72   : > { %1837 = vmatmul.mubr.f32.gmra.mrb[4].mxu1 %v2505_v62  ;;  %1088 = vmatprep.mubr.f32.mxu0 %v2385_v56 }
  0x73   : > { %1839 = vmatprep.mubr.f32.mxu1 %v2524_v10 }
  0x75   : > { %1089 = vmatmul.mubr.f32.gmra.mrb[38].mxu0 %v2516_v2 }
  0x76   : > { %1840 = vmatmul.mubr.f32.gmra.mrb[6].mxu1 %v2091_v7  ;;  %1093 = vmatprep.mubr.f32.mxu0 %v2401_v1 }
  0x79   : > { %1094 = vmatmul.mubr.f32.gmra.mrb[40].mxu0 %v2542_v18 }
  0x7a   : > { %1098 = vmatprep.mubr.f32.mxu0 %v2423_v16 }
  0x7d   : > { %1099 = vmatmul.mubr.f32.gmra.mrb[42].mxu0 %v2564_v28 }
  0x7e   : > { %1103 = vmatprep.mubr.f32.mxu0 %v2447_v30 }
  0x81   : > { %1104 = vmatmul.mubr.f32.gmra.mrb[44].mxu0 %v2586_v43 }
  0x82   : > { %1108 = vmatprep.mubr.f32.mxu0 %v2091_v7 }
  0x85   : > { %1109 = vmatmul.mubr.f32.gmra.mrb[46].mxu0 %v2091_v7 }
  0xfc   : > { %v1502_v17 = vpop.f32.mrb[0].mxu0 }
  0xfd   : > { %v1503_v29 = vpop.f32.mrb[1].mxu0 }
  0xfe   : > { %v1504_v38 = vadd.f32 %v1503_v29, %v1502_v17 }
 0x100   : > { %v1505_v56 = vpop.f32.mrb[2].mxu0 }
 0x101   : > { %v1506_v51 = vpop.f32.mrb[3].mxu0 }
 0x102   : > { %v1507_v1 = vadd.f32 %v1506_v51, %v1505_v56 }
 0x104   : > { %v1508_v24 = vpop.f32.mrb[4].mxu0 }
 0x105   : > { %v1509_v33 = vpop.f32.mrb[5].mxu0 }
 0x106   : > { %v1510_v34 = vadd.f32 %v1509_v33, %v1508_v24 }
 0x108   : > { %v1511_v16 = vpop.f32.mrb[6].mxu0 }
 0x109   : > { %v1512_v45 = vpop.f32.mrb[7].mxu0 }
 0x10a   : > { %v1513_v48 = vadd.f32 %v1512_v45, %v1511_v16 }
 0x10c   : > { %v1514_v50 = vpop.f32.mrb[8].mxu0 }
 0x10d   : > { %v1515_v30 = vpop.f32.mrb[9].mxu0 }
 0x10e   : > { %v1516_v62 = vadd.f32 %v1515_v30, %v1514_v50 }
 0x110   : > { %v1517_v2 = vpop.f32.mrb[10].mxu0 }
 0x111   : > { %v1518_v10 = vpop.f32.mrb[11].mxu0 }
 0x112   : > { %v1519_v18 = vadd.f32 %v1518_v10, %v1517_v2 }
 0x114   : > { %v1520_v28 = vpop.f32.mrb[12].mxu0 }
 0x115   : > { %v1521_v7 = vpop.f32.mrb[13].mxu0 }
 0x116   : > { %v1522_v43 = vadd.f32 %v1521_v7, %v1520_v28 }
 0x118   : > { %v1523_v22 = vpop.f32.mrb[14].mxu0 }
 0x119   : > { %v1524_v23 = vpop.f32.mrb[15].mxu0 }
 0x11a   : > { %v1525_v25 = vadd.f32 %v1524_v23, %v1523_v22 }
 0x11c   : > { %v1582_v59 = vpop.f32.mrb[16].mxu0 }
 0x11d   : > { %v1583_v52 = vpop.f32.mrb[17].mxu0 }
 0x11e   : > { %v1584_v26 = vadd.f32 %v1583_v52, %v1582_v59 }
 0x120   : > { %v2037_v27 = vadd.f32 %v1584_v26, %v1504_v38  ;;  %v1585_v31 = vpop.f32.mrb[18].mxu0 }
 0x121   : > { %v1586_v32 = vpop.f32.mrb[19].mxu0 }
 0x122   : > { %v1587_v35 = vadd.f32 %v1586_v32, %v1585_v31 }
 0x124   : > { %v2034_v36 = vadd.f32 %v1587_v35, %v1507_v1  ;;  %v1588_v37 = vpop.f32.mrb[20].mxu0 }
 0x125   : > { %v1589_v39 = vpop.f32.mrb[21].mxu0 }
 0x126   : > { %v1590_v40 = vadd.f32 %v1589_v39, %v1588_v37 }
 0x128   : > { %v2043_v41 = vadd.f32 %v1590_v40, %v1510_v34  ;;  %v1591_v42 = vpop.f32.mrb[22].mxu0 }
 0x129   : > { %v1592_v44 = vpop.f32.mrb[23].mxu0 }
 0x12a   : > { %v1593_v46 = vadd.f32 %v1592_v44, %v1591_v42 }
 0x12c   : > { %v2040_v47 = vadd.f32 %v1593_v46, %v1513_v48  ;;  %v1594_v49 = vpop.f32.mrb[24].mxu0 }
 0x12d   : > { %v1595_v53 = vpop.f32.mrb[25].mxu0 }
 0x12e   : > { %v1596_v54 = vadd.f32 %v1595_v53, %v1594_v49 }
 0x130   : > { %v2049_v55 = vadd.f32 %v1596_v54, %v1516_v62  ;;  %v1597_v57 = vpop.f32.mrb[26].mxu0 }
 0x131   : > { %v1598_v58 = vpop.f32.mrb[27].mxu0 }
 0x132   : > { %v1599_v61 = vadd.f32 %v1598_v58, %v1597_v57 }
 0x134   : > { %v2768_v63 = vadd.f32 %v1599_v61, %v1519_v18  ;;  %v1600_v0 = vpop.f32.mrb[28].mxu0 }
 0x135   : > { %v1601_v3 = vpop.f32.mrb[29].mxu0 }
 0x136   : > { %v1602_v4 = vadd.f32 %v1601_v3, %v1600_v0 }
 0x138   : > { %v2770_v8 = vadd.f32 %v1602_v4, %v1522_v43  ;;  %v1603_v9 = vpop.f32.mrb[30].mxu0 }
 0x139   : > { %v1604_v11 = vpop.f32.mrb[31].mxu0 }
 0x13a   : > { %v1605_v6 = vadd.f32 %v1604_v11, %v1603_v9 }
 0x13c   : > { %v2772_v12 = vadd.f32 %v1605_v6, %v1525_v25  ;;  %v1662_v13 = vpop.f32.mrb[32].mxu0 }
 0x13d   : > { %v1832_v14 = vpop.f32.mrb[0].mxu1  ;;  %v1663_v15 = vpop.f32.mrb[33].mxu0 }
 0x13e   : > { %v1664_v19 = vadd.f32 %v1663_v15, %v1662_v13  ;;  %v1180_v20 = vpop.f32.mrb[1].mxu1 }
 0x140   : > { %v2038_v60 = vadd.f32 %v2037_v27, %v1664_v19  ;;  %v1665_v5 = vpop.f32.mrb[34].mxu0 }
 0x141   : > { %v1835_v21 = vpop.f32.mrb[2].mxu1  ;;  %v1666_v17 = vpop.f32.mrb[35].mxu0 }
 0x142   : > { %v2039_v29 = vadd.f32 %v2038_v60, %v1180_v20  ;;  %v1667_v38 = vadd.f32 %v1666_v17, %v1665_v5  ;;  %v1190_v56 = vpop.f32.mrb[3].mxu1 }
 0x144   : > { %1227 = vst [vmem:[%s2779_s8] sm:$0xff] %v2039_v29  ;;  %v2035_v51 = vadd.f32 %v2034_v36, %v1667_v38  ;;  %v1668_v1 = vpop.f32.mrb[36].mxu0  ;;  %v1248_v48 = vmul.f32 %v2039_v29, %v2039_v29 }
 0x145   : > { %v1838_v24 = vpop.f32.mrb[4].mxu1  ;;  %v1669_v33 = vpop.f32.mrb[37].mxu0 }
 0x146   : > { %v2036_v34 = vadd.f32 %v2035_v51, %v1832_v14  ;;  %v1670_v16 = vadd.f32 %v1669_v33, %v1668_v1  ;;  %v1200_v45 = vpop.f32.mrb[5].mxu1 }
 0x148   : > { %1228 = vst [vmem:[%s2779_s8 + $0x8] sm:$0xff] %v2036_v34  ;;  %v1235_v50 = vadd.f32 %v2039_v29, %v2036_v34  ;;  %v1249_v30 = vmul.f32 %v2036_v34, %v2036_v34  ;;  %v2044_v62 = vadd.f32 %v2043_v41, %v1670_v16  ;;  %v1671_v2 = vpop.f32.mrb[38].mxu0 }
 0x149   : > { %v1841_v10 = vpop.f32.mrb[6].mxu1  ;;  %v1672_v18 = vpop.f32.mrb[39].mxu0 }
 0x14a   : > { %v1256_v28 = vadd.f32 %v1249_v30, %v1248_v48  ;;  %v2045_v7 = vadd.f32 %v2044_v62, %v1190_v56  ;;  %v1673_v43 = vadd.f32 %v1672_v18, %v1671_v2  ;;  %v1210_v22 = vpop.f32.mrb[7].mxu1 }
 0x14c   : > { %1229 = vst [vmem:[%s2779_s8 + $0x10] sm:$0xff] %v2045_v7  ;;  %v1236_v23 = vadd.f32 %v2045_v7, %v1235_v50  ;;  %v1250_v25 = vmul.f32 %v2045_v7, %v2045_v7  ;;  %v2041_v59 = vadd.f32 %v2040_v47, %v1673_v43  ;;  %v1674_v52 = vpop.f32.mrb[40].mxu0 }
 0x14d   : > { %v1675_v26 = vpop.f32.mrb[41].mxu0 }
 0x14e   : > { %v1257_v27 = vadd.f32 %v1256_v28, %v1250_v25  ;;  %v2042_v31 = vadd.f32 %v2041_v59, %v1835_v21  ;;  %v1676_v32 = vadd.f32 %v1675_v26, %v1674_v52 }
 0x150   : > { %1230 = vst [vmem:[%s2779_s8 + $0x18] sm:$0xff] %v2042_v31  ;;  %v1237_v35 = vadd.f32 %v2042_v31, %v1236_v23  ;;  %v1251_v36 = vmul.f32 %v2042_v31, %v2042_v31  ;;  %v2050_v37 = vadd.f32 %v2049_v55, %v1676_v32  ;;  %v1677_v39 = vpop.f32.mrb[42].mxu0 }
 0x151   : > { %v1678_v40 = vpop.f32.mrb[43].mxu0 }
 0x152   : > { %v1258_v41 = vadd.f32 %v1257_v27, %v1251_v36  ;;  %v2051_v42 = vadd.f32 %v2050_v37, %v1200_v45  ;;  %v1679_v44 = vadd.f32 %v1678_v40, %v1677_v39 }
 0x154   : > { %1231 = vst [vmem:[%s2779_s8 + $0x20] sm:$0xff] %v2051_v42  ;;  %v1238_v46 = vadd.f32 %v2051_v42, %v1237_v35  ;;  %v1252_v49 = vmul.f32 %v2051_v42, %v2051_v42  ;;  %v2047_v47 = vadd.f32 %v2768_v63, %v1679_v44  ;;  %v1680_v53 = vpop.f32.mrb[44].mxu0 }
 0x155   : > { %v1681_v54 = vpop.f32.mrb[45].mxu0 }
 0x156   : > { %v1259_v57 = vadd.f32 %v1258_v41, %v1252_v49  ;;  %v2048_v58 = vadd.f32 %v2047_v47, %v1838_v24  ;;  %v1682_v61 = vadd.f32 %v1681_v54, %v1680_v53 }
 0x158   : > { %1232 = vst [vmem:[%s2779_s8 + $0x28] sm:$0xff] %v2048_v58  ;;  %v1239_v0 = vadd.f32 %v2048_v58, %v1238_v46  ;;  %v1253_v55 = vmul.f32 %v2048_v58, %v2048_v58  ;;  %v2056_v3 = vadd.f32 %v2770_v8, %v1682_v61  ;;  %v1683_v4 = vpop.f32.mrb[46].mxu0 }
 0x159   : > { %v1684_v9 = vpop.f32.mrb[47].mxu0 }
 0x15a   : > { %v1260_v11 = vadd.f32 %v1259_v57, %v1253_v55  ;;  %v2057_v6 = vadd.f32 %v2056_v3, %v1210_v22  ;;  %v1685_v13 = vadd.f32 %v1684_v9, %v1683_v4 }
 0x15c   : > { %1233 = vst [vmem:[%s2779_s8 + $0x30] sm:$0xff] %v2057_v6  ;;  %v1240_v14 = vadd.f32 %v2057_v6, %v1239_v0  ;;  %v1254_v15 = vmul.f32 %v2057_v6, %v2057_v6  ;;  %v2053_v63 = vadd.f32 %v2772_v12, %v1685_v13 }
 0x15e   : > { %v1261_v19 = vadd.f32 %v1260_v11, %v1254_v15  ;;  %v2054_v20 = vadd.f32 %v2053_v63, %v1841_v10 }
 0x160   : > { %1234 = vst [vmem:[%s2779_s8 + $0x38] sm:$0xff] %v2054_v20  ;;  %v1241_v60 = vadd.f32 %v2054_v20, %v1240_v14  ;;  %v1255_v5 = vmul.f32 %v2054_v20, %v2054_v20 }
 0x162   : > { %v1242_v21 = vrot.slane %v1241_v60, 4  ;;  %v1262_v17 = vadd.f32 %v1261_v19, %v1255_v5 }
 0x164   : > { %v1243_v29 = vadd.f32 %v1242_v21, %v1241_v60  ;;  %v1263_v8 = vrot.slane %v1262_v17, 4 }
 0x166   : > { %v1244_v38 = vrot.slane %v1243_v29, 2  ;;  %v1264_v56 = vadd.f32 %v1263_v8, %v1262_v17 }
 0x168   : > { %v1245_v51 = vadd.f32 %v1244_v38, %v1243_v29  ;;  %v1265_v1 = vrot.slane %v1264_v56, 2 }
 0x16a   : > { %v1246_v24 = vrot.slane %v1245_v51, 1  ;;  %v1266_v33 = vadd.f32 %v1265_v1, %v1264_v56 }
 0x16c   : > { %v1267_v34 = vrot.slane %v1266_v33, 1  ;;  %v1247_v12 = vadd.f32 %v1246_v24, %v1245_v51 }
 0x16e   : > { %v1268_v16 = vadd.f32 %v1267_v34, %v1266_v33 }
 0x170   : > { %v1270_v45 = vsel %vm1269_vm0, %v1247_v12, %v1268_v16 }
 0x171   : > { %1271 = vst [vmem:[%s235_s11] sm:$0x3] %v1270_v45 }
 0x172 PF: > { %s16_s18 = sadd.s32 1, %s2089_s18  }
 0x173   : > { %p13_p4 = scmp.ge.s32.totalorder %s16_s18, 4  }
 0x175   :  { %15 = sbr.rel (!%p13_p4) target bundleno = 1 (0x1), region = 83 }

// kernel: network_block_forward.9
= control target key start
LH: loop header
LB: loop body
LE: loop exit
PB: predicated region body
PF: predicated region fallthrough
CT: control target
= control target key end

     0   :  { %12 = vsyncpa [#allocation4], 0  ;;  %s3091_s0 = inlined_call_operand.vmem [shape: f32[2,8,8,128], index: 0, kind: input, shape index: {}]   ;;  %s3092_s1 = inlined_call_operand.vmem [shape: f32[1,128], index: 1, kind: input, shape index: {}]   ;;  %s3093_s2 = inlined_call_operand.vmem [shape: f32[1,128], index: 2, kind: input, shape index: {}]   ;;  %s3094_s3 = inlined_call_operand.vmem [shape: f32[3,384,128], index: 3, kind: input, shape index: {}]   ;;  %s3095_s4 = inlined_call_operand.vmem [shape: f32[2,8,8,128], index: 4, kind: input, shape index: {}]   ;;  %s3096_s5 = inlined_call_operand.vmem [shape: f32[2,8,8,128], index: 5, kind: output, shape index: {0}]   ;;  %s3097_s6 = inlined_call_operand.hbm [shape: f32[2,2,128], index: 6, kind: output, shape index: {1}]  }
   0x1   :  { %14 = vsyncpa [#allocation4 + $0x1], 0  ;;  %s2330_s21 = smov 0   ;;  %s2332_s22 = smov 0  }
   0x2   :  { %s2334_s23 = smov 0   ;;  %s2336_s24 = smov 0  }
   0x3 LB: > { %s2351_s25 = sadd.s32 4294967295, %s2291_s24   ;;  %s1461_s26 = sadd.s32 4294967294, %s2291_s24   ;;  %s2291_s24 = sphi %s2336_s24, %s3103_s24   ;;  %s2287_s23 = sphi %s2334_s23, %s3102_s23   ;;  %s2283_s22 = sphi %s2332_s22, %s3101_s22   ;;  %s2279_s21 = sphi %s2330_s21, %s3100_s21  }
   0x4   : > { %s2355_s27 = sadd.s32 1, %s2291_s24   ;;  %s168_s28 = sadd.s32 1, %s2287_s23 }
   0x5   : > { %s165_s29 = ssub.s32 %s2291_s24, %s2355_s27  ;;  %p178_p0 = scmp.ne.s32.totalorder %s2287_s23, %s2283_s22 }
   0x6   : > { %p166_p1 = scmp.eq.s32.totalorder %s165_s29, 0  ;;  %p179_p2 = scmp.eq.s32.totalorder %s2351_s25, 1 }
   0x7   : > { %p184_p3 = scmp.ne.s32.totalorder %s2283_s22, %s2279_s21  ;;  %p185_p4 = scmp.eq.s32.totalorder %s1461_s26, 1 }
   0x8   : > { %s2366_s30 = scalar_select %p166_p1, %s2287_s23, %s168_s28  }
   0x9   : > { %p2368_p5 = por %p179_p2, %p178_p0  ;;  %p2372_p6 = por %p185_p4, %p184_p3 }
   0xa   : > { %p1464_p7 = scmp.ge.s32.totalorder %s2291_s24, 1  ;;  %p228_p8 = scmp.lt.s32.totalorder %s2291_s24, 3 }
   0xc   : > { %p229_p9 = pnand %p1464_p7, %p228_p8 }
   0xd   : > { %v465_v0 = vld [vmem:[%s3094_s3 + $0x80] sm:$0xff] (!%p229_p9)  ;;  %v466_v1 = vld [vmem:[%s3094_s3 + $0x88] sm:$0xff] (!%p229_p9)  ;;  %v2293_v7 = vmov (!%p229_p9), 0.0   ;;  %v467_v10 = vld [vmem:[%s3094_s3 + $0x90] sm:$0xff] (!%p229_p9)  ;;  %p268_p10 = scmp.lt.s32.totalorder (!%p229_p9), %s2351_s25, 1  ;;  %s1571_s11 = sshll.u32 (!%p229_p9), %s2351_s25, 5 }
   0xe   : > { %232 = sbr.rel (%p229_p9) target bundleno = 391 (0x187), region = 40  ;;  %v481_v2 = vld [vmem:[%s3094_s3 + $0x100] sm:$0xff] (!%p229_p9)  ;;  %v1949_v3 = vpack.c.bf16 (!%p229_p9), %v466_v1, %v465_v0  ;;  %v482_v4 = vld [vmem:[%s3094_s3 + $0x108] sm:$0xff] (!%p229_p9)  ;;  %561 = vmatprep.mubr.f32.mxu0 (!%p229_p9), %v2293_v7  ;;  %385 = vst [vmem:[#allocation2 + $0x18] sm:$0x1] (!%p229_p9), %v2293_v7  ;;  %1849 = vmatprep.mubr.f32.mxu1 (!%p229_p9), %v2293_v7  ;;  %v468_v11 = vld [vmem:[%s3094_s3 + $0x98] sm:$0xff] (!%p229_p9)  ;;  %s3049_s14 = scalar_lea.hbm (!%p229_p9), %s3097_s6, %s1571_s11 }
   0xf   : > { %v449_v5 = vld [vmem:[%s3094_s3] sm:$0xff] (!%p229_p9)  ;;  %v450_v6 = vld [vmem:[%s3094_s3 + $0x8] sm:$0xff] (!%p229_p9)  ;;  %386 = vst [vmem:[#allocation2 + $0x30] sm:$0x1] (!%p229_p9), %v2293_v7  ;;  %387 = vst [vmem:[#allocation2 + $0x48] sm:$0x1] (!%p229_p9), %v2293_v7  ;;  %v1981_v8 = vpack.c.bf16 (!%p229_p9), %v482_v4, %v481_v2  ;;  %v1953_v13 = vpack.c.bf16 (!%p229_p9), %v468_v11, %v467_v10 }
  0x10   : > { %388 = vst [vmem:[#allocation2 + $0x60] sm:$0x1] (!%p229_p9), %v2293_v7  ;;  %389 = vst [vmem:[#allocation2 + $0x78] sm:$0x1] (!%p229_p9), %v2293_v7  ;;  %v1951_v9 = vpack.c.bf16 (!%p229_p9), %v450_v6, %v449_v5  ;;  %v483_v12 = vld [vmem:[%s3094_s3 + $0x110] sm:$0xff] (!%p229_p9)  ;;  %1950 = vmatprep.subr.bf16.mxu0 (!%p229_p9), %v1949_v3  ;;  %v484_v14 = vld [vmem:[%s3094_s3 + $0x118] sm:$0xff] (!%p229_p9) }
  0x11   : > { %390 = vst [vmem:[#allocation2 + $0x90] sm:$0x1] (!%p229_p9), %v2293_v7  ;;  %391 = vst [vmem:[#allocation2 + $0xa8] sm:$0x1] (!%p229_p9), %v2293_v7  ;;  %v451_v15 = vld [vmem:[%s3094_s3 + $0x10] sm:$0xff] (!%p229_p9)  ;;  %v452_v16 = vld [vmem:[%s3094_s3 + $0x18] sm:$0xff] (!%p229_p9)  ;;  %1982 = vmatprep.subr.bf16.mxu1 (!%p229_p9), %v1981_v8  ;;  %v1985_v17 = vpack.c.bf16 (!%p229_p9), %v484_v14, %v483_v12 }
  0x12   : > { %392 = vst [vmem:[#allocation2 + $0xc0] sm:$0x1] (!%p229_p9), %v2293_v7  ;;  %417 = vst [vmem:[#allocation2 + $0x2f] sm:$0x1] (!%p229_p9), %v2293_v7  ;;  %1952 = vmatpush3.bf16.msra.mxu0 (!%p229_p9), %v1951_v9  ;;  %v1955_v18 = vpack.c.bf16 (!%p229_p9), %v452_v16, %v451_v15  ;;  %v469_v19 = vld [vmem:[%s3094_s3 + $0xa0] sm:$0xff] (!%p229_p9)  ;;  %v470_v20 = vld [vmem:[%s3094_s3 + $0xa8] sm:$0xff] (!%p229_p9)  ;;  %1984 = vmatpush3.bf16.msra.mxu1 (!%p229_p9), %v1981_v8 }
  0x13   : > { %418 = vst [vmem:[#allocation2 + $0x47] sm:$0x1] (!%p229_p9), %v2293_v7  ;;  %419 = vst [vmem:[#allocation2 + $0x5f] sm:$0x1] (!%p229_p9), %v2293_v7  ;;  %v485_v21 = vld [vmem:[%s3094_s3 + $0x120] sm:$0xff] (!%p229_p9)  ;;  %1954 = vmatprep.subr.bf16.mxu0 (!%p229_p9), %v1953_v13  ;;  %v1957_v22 = vpack.c.bf16 (!%p229_p9), %v470_v20, %v469_v19  ;;  %v486_v23 = vld [vmem:[%s3094_s3 + $0x128] sm:$0xff] (!%p229_p9)  ;;  %1986 = vmatprep.subr.bf16.mxu1 (!%p229_p9), %v1985_v17 }
  0x14   : > { %420 = vst [vmem:[#allocation2 + $0x77] sm:$0x1] (!%p229_p9), %v2293_v7  ;;  %421 = vst [vmem:[#allocation2 + $0x8f] sm:$0x1] (!%p229_p9), %v2293_v7  ;;  %v453_v24 = vld [vmem:[%s3094_s3 + $0x20] sm:$0xff] (!%p229_p9)  ;;  %v454_v25 = vld [vmem:[%s3094_s3 + $0x28] sm:$0xff] (!%p229_p9)  ;;  %v1989_v26 = vpack.c.bf16 (!%p229_p9), %v486_v23, %v485_v21 }
  0x15   : > { %422 = vst [vmem:[#allocation2 + $0xa7] sm:$0x1] %v2293_v7  ;;  %423 = vst [vmem:[#allocation2 + $0xbf] sm:$0x1] %v2293_v7  ;;  %v471_v27 = vld [vmem:[%s3094_s3 + $0xb0] sm:$0xff]  ;;  %v472_v28 = vld [vmem:[%s3094_s3 + $0xb8] sm:$0xff]  ;;  %v1959_v31 = vpack.c.bf16 %v454_v25, %v453_v24 }
  0x16   : > { %424 = vst [vmem:[#allocation2 + $0xd7] sm:$0x1] %v2293_v7  ;;  %v487_v29 = vld [vmem:[%s3094_s3 + $0x130] sm:$0xff]  ;;  %v488_v30 = vld [vmem:[%s3094_s3 + $0x138] sm:$0xff]  ;;  %s269_s29 = scalar_select %p268_p10, %s2351_s25, 1  ;;  %1956 = vmatpush3.bf16.msra.mxu0 %v1955_v18  ;;  %1988 = vmatpush3.bf16.msra.mxu1 %v1985_v17  ;;  %v1961_v32 = vpack.c.bf16 %v472_v28, %v471_v27  ;;  %v473_v36 = vld [vmem:[%s3094_s3 + $0xc0] sm:$0xff] }
  0x17   : > { %1958 = vmatprep.subr.bf16.mxu0 %v1957_v22  ;;  %v455_v33 = vld [vmem:[%s3094_s3 + $0x30] sm:$0xff]  ;;  %v456_v34 = vld [vmem:[%s3094_s3 + $0x38] sm:$0xff]  ;;  %1990 = vmatprep.subr.bf16.mxu1 %v1989_v26  ;;  %v1993_v35 = vpack.c.bf16 %v488_v30, %v487_v29  ;;  %v474_v37 = vld [vmem:[%s3094_s3 + $0xc8] sm:$0xff]  ;;  %vm1340_vm0 = vcmask 1040384   ;;  %s2294_s25 = smov [#allocation3]  }
  0x18   : > { %v489_v38 = vld [vmem:[%s3094_s3 + $0x140] sm:$0xff]  ;;  %v490_v39 = vld [vmem:[%s3094_s3 + $0x148] sm:$0xff]  ;;  %s2484_s26 = sshll.u32 %s269_s29, 6  ;;  %v1963_v40 = vpack.c.bf16 %v456_v34, %v455_v33  ;;  %v1965_v41 = vpack.c.bf16 %v474_v37, %v473_v36  ;;  %v475_v45 = vld [vmem:[%s3094_s3 + $0xd0] sm:$0xff]  ;;  %s2233_s18 = sshll.u32 %s2294_s25, 4  ;;  %s2234_s18 = int_to_ptr.vmem [resolvable:$false] %s2233_s18 }
  0x19   : > { %v457_v42 = vld [vmem:[%s3094_s3 + $0x40] sm:$0xff]  ;;  %v458_v43 = vld [vmem:[%s3094_s3 + $0x48] sm:$0xff]  ;;  %v1997_v44 = vpack.c.bf16 %v490_v39, %v489_v38  ;;  %v476_v46 = vld [vmem:[%s3094_s3 + $0xd8] sm:$0xff]  ;;  %s2502_s17 = scalar_lea.vmem %s3091_s0, %s2484_s26  ;;  %s3008_s19 = scalar_lea.vmem %s3095_s4, %s2484_s26 }
  0x1a   : > { %1960 = vmatpush3.bf16.msra.mxu0 %v1959_v31  ;;  %1992 = vmatpush3.bf16.msra.mxu1 %v1989_v26  ;;  %v491_v47 = vld [vmem:[%s3094_s3 + $0x150] sm:$0xff]  ;;  %v492_v48 = vld [vmem:[%s3094_s3 + $0x158] sm:$0xff]  ;;  %v1967_v49 = vpack.c.bf16 %v458_v43, %v457_v42  ;;  %v1969_v51 = vpack.c.bf16 %v476_v46, %v475_v45  ;;  %v283_v53 = vld [vmem:[%s2502_s17] sm:$0xff]  ;;  %s3030_s9 = scalar_lea.vmem %s3096_s5, %s2484_s26  ;;  %s265_s26 = sand.u32 1, %s2283_s22  }
  0x1b   : > { %1962 = vmatprep.subr.bf16.mxu0 %v1961_v32  ;;  %1994 = vmatprep.subr.bf16.mxu1 %v1993_v35  ;;  %v459_v50 = vld [vmem:[%s3094_s3 + $0x50] sm:$0xff]  ;;  %v460_v52 = vld [vmem:[%s3094_s3 + $0x58] sm:$0xff]  ;;  %v2520_v54 = vld [vmem:[%s3092_s1] ss:$0 sm:$0xff]  ;;  %v2001_v55 = vpack.c.bf16 %v492_v48, %v491_v47  ;;  %s1465_s10 = sshll.u32 %s265_s26, 1  ;;  %s1349_s15 = scalar_lea.sflag [#allocation4], %s265_s26 }
  0x1c   : > { %v477_v56 = vld [vmem:[%s3094_s3 + $0xe0] sm:$0xff]  ;;  %v478_v57 = vld [vmem:[%s3094_s3 + $0xe8] sm:$0xff]  ;;  %v298_v58 = vmul.f32 %v2520_v54, %v283_v53  ;;  %v1971_v62 = vpack.c.bf16 %v460_v52, %v459_v50  ;;  %v479_v5 = vld [vmem:[%s3094_s3 + $0xf0] sm:$0xff]  ;;  %s267_s12 = scalar_lea.vmem [#allocation3], %s1465_s10 }
  0x1d   : > { %v2532_v59 = vld [vmem:[%s3093_s2] ss:$0 sm:$0xff]  ;;  %v494_v61 = vld [vmem:[%s3094_s3 + $0x168] sm:$0xff]  ;;  %v1973_v0 = vpack.c.bf16 %v478_v57, %v477_v56  ;;  %v480_v6 = vld [vmem:[%s3094_s3 + $0xf8] sm:$0xff]  ;;  %s1365_s13 = sshll.u32 %s267_s12, 4  ;;  %s3051_s13 = int_to_ptr.vmem [resolvable:$true] %s1365_s13 }
  0x1e   : > { %1964 = vmatpush3.bf16.msra.mxu0 %v1963_v40  ;;  %1996 = vmatpush3.bf16.msra.mxu1 %v1993_v35  ;;  %v493_v60 = vld [vmem:[%s3094_s3 + $0x160] sm:$0xff]  ;;  %v313_v63 = vadd.f32 %v2532_v59, %v298_v58  ;;  %v462_v2 = vld [vmem:[%s3094_s3 + $0x68] sm:$0xff]  ;;  %v495_v10 = vld [vmem:[%s3094_s3 + $0x170] sm:$0xff]  ;;  %v1977_v17 = vpack.c.bf16 %v480_v6, %v479_v5  ;;  %s2229_s16 = scalar_lea.vmem %s3051_s13, 32  ;;  %p2236_p0 = scmp.lt.s32.totalorder %s3051_s13, %s2234_s18 }
  0x1f   : > { %1966 = vmatprep.subr.bf16.mxu0 %v1965_v41  ;;  %1998 = vmatprep.subr.bf16.mxu1 %v1997_v44  ;;  %v461_v1 = vld [vmem:[%s3094_s3 + $0x60] sm:$0xff]  ;;  %v284_v3 = vld [vmem:[%s2502_s17 + $0x8] sm:$0xff]  ;;  %v2005_v4 = vpack.c.bf16 %v494_v61, %v493_v60  ;;  %v496_v11 = vld [vmem:[%s3094_s3 + $0x178] sm:$0xff]  ;;  %p2230_p11 = scmp.ne.s32.totalorder %s3051_s13, %s2229_s16 }
  0x20   : > { %v2554_v8 = vmax.f32 %v313_v63, 0.0  ;;  %v299_v9 = vmul.f32 %v2520_v54, %v284_v3  ;;  %v285_v12 = vld [vmem:[%s2502_s17 + $0x10] sm:$0xff]  ;;  %v1975_v13 = vpack.c.bf16 %v462_v2, %v461_v1  ;;  %v464_v19 = vld [vmem:[%s3094_s3 + $0x78] sm:$0xff]  ;;  %v2009_v22 = vpack.c.bf16 %v496_v11, %v495_v10  ;;  %v1490_v23 = vld [vmem:[%s3094_s3 + $0x200] sm:$0xff] }
  0x21   : > { %v463_v18 = vld [vmem:[%s3094_s3 + $0x70] sm:$0xff]  ;;  %v300_v20 = vmul.f32 %v2520_v54, %v285_v12  ;;  %v286_v21 = vld [vmem:[%s2502_s17 + $0x18] sm:$0xff]  ;;  %v1491_v24 = vld [vmem:[%s3094_s3 + $0x208] sm:$0xff]  ;;  %p2231_p12 = pnand %p2230_p11, %p2368_p5 }
  0x22   : > { %1968 = vmatpush3.bf16.msra.mxu0 %v1967_v49  ;;  %2000 = vmatpush3.bf16.msra.mxu1 %v1997_v44  ;;  %v393_v14 = vrot.slane %v2554_v8, 1  ;;  %v361_v15 = vrot.slane %v2554_v8, 7  ;;  %v314_v16 = vadd.f32 %v2532_v59, %v299_v9  ;;  %v301_v26 = vmul.f32 %v2520_v54, %v286_v21  ;;  %v1506_v27 = vld [vmem:[%s3094_s3 + $0x280] sm:$0xff]  ;;  %v1507_v28 = vld [vmem:[%s3094_s3 + $0x288] sm:$0xff]  ;;  %v1492_v41 = vld [vmem:[%s3094_s3 + $0x210] sm:$0xff] }
  0x23   : > { %1970 = vmatprep.subr.bf16.mxu0 %v1969_v51  ;;  %2002 = vmatprep.subr.bf16.mxu1 %v2001_v55  ;;  %v315_v29 = vadd.f32 %v2532_v59, %v300_v20  ;;  %v1979_v30 = vpack.c.bf16 %v464_v19, %v463_v18  ;;  %v287_v33 = vld [vmem:[%s2502_s17 + $0x20] sm:$0xff]  ;;  %v2013_v34 = vpack.c.bf16 %v1491_v24, %v1490_v23  ;;  %v1475_v36 = vld [vmem:[%s3094_s3 + $0x188] sm:$0xff]  ;;  %v1493_v44 = vld [vmem:[%s3094_s3 + $0x218] sm:$0xff]  ;;  %p2232_p13 = pneg %p2231_p12 }
  0x24   : > { %409 = vst [vmem:[#allocation2 + $0x28] sm:$0x7f] %v393_v14  ;;  %377 = vst [vmem:[#allocation2 + $0x18] sm:$0xfe] %v361_v15  ;;  %v2581_v25 = vmax.f32 %v314_v16, 0.0  ;;  %v316_v32 = vadd.f32 %v2532_v59, %v301_v26  ;;  %v1474_v35 = vld [vmem:[%s3094_s3 + $0x180] sm:$0xff]  ;;  %v302_v38 = vmul.f32 %v2520_v54, %v287_v33  ;;  %v2045_v40 = vpack.c.bf16 %v1507_v28, %v1506_v27 }
  0x25   : > { %v2600_v37 = vmax.f32 %v315_v29, 0.0  ;;  %v288_v43 = vld [vmem:[%s2502_s17 + $0x28] sm:$0xff]  ;;  %v1508_v45 = vld [vmem:[%s3094_s3 + $0x290] sm:$0xff]  ;;  %v1509_v46 = vld [vmem:[%s3094_s3 + $0x298] sm:$0xff]  ;;  %v2015_v50 = vpack.c.bf16 %v1475_v36, %v1474_v35 }
  0x26   : > { %1972 = vmatpush3.bf16.msra.mxu0 %v1971_v62  ;;  %2004 = vmatpush3.bf16.msra.mxu1 %v2001_v55  ;;  %v362_v31 = vrot.slane %v2581_v25, 7  ;;  %v394_v39 = vrot.slane %v2581_v25, 1  ;;  %v2607_v42 = vmax.f32 %v316_v32, 0.0  ;;  %v317_v48 = vadd.f32 %v2532_v59, %v302_v38  ;;  %v289_v55 = vld [vmem:[%s2502_s17 + $0x30] sm:$0xff]  ;;  %v1477_v58 = vld [vmem:[%s3094_s3 + $0x198] sm:$0xff]  ;;  %v1495_v1 = vld [vmem:[%s3094_s3 + $0x228] sm:$0xff] }
  0x27   : > { %1974 = vmatprep.subr.bf16.mxu0 %v1973_v0  ;;  %2006 = vmatprep.subr.bf16.mxu1 %v2005_v4  ;;  %v363_v47 = vrot.slane %v2600_v37, 7  ;;  %v395_v49 = vrot.slane %v2600_v37, 1  ;;  %v303_v52 = vmul.f32 %v2520_v54, %v288_v43  ;;  %v1476_v57 = vld [vmem:[%s3094_s3 + $0x190] sm:$0xff]  ;;  %v304_v61 = vmul.f32 %v2520_v54, %v289_v55  ;;  %v1494_v0 = vld [vmem:[%s3094_s3 + $0x220] sm:$0xff]  ;;  %v1479_v15 = vld [vmem:[%s3094_s3 + $0x1a8] sm:$0xff] }
  0x28   : > { %378 = vst [vmem:[#allocation2 + $0x30] sm:$0xfe] %v362_v31  ;;  %410 = vst [vmem:[#allocation2 + $0x40] sm:$0x7f] %v394_v39  ;;  %v364_v51 = vrot.slane %v2607_v42, 7  ;;  %v396_v53 = vrot.slane %v2607_v42, 1  ;;  %v2017_v62 = vpack.c.bf16 %v1493_v44, %v1492_v41  ;;  %v2049_v63 = vpack.c.bf16 %v1509_v46, %v1508_v45 }
  0x29   : > { %379 = vst [vmem:[#allocation2 + $0x48] sm:$0xfe] %v363_v47  ;;  %v2634_v60 = vmax.f32 %v317_v48, 0.0  ;;  %411 = vst [vmem:[#allocation2 + $0x58] sm:$0x7f] %v395_v49  ;;  %v318_v2 = vadd.f32 %v2532_v59, %v303_v52  ;;  %v1510_v3 = vld [vmem:[%s3094_s3 + $0x2a0] sm:$0xff]  ;;  %v319_v9 = vadd.f32 %v2532_v59, %v304_v61  ;;  %v2019_v11 = vpack.c.bf16 %v1477_v58, %v1476_v57 }
  0x2a   : > { %1976 = vmatpush3.bf16.msra.mxu0 %v1975_v13  ;;  %2008 = vmatpush3.bf16.msra.mxu1 %v2005_v4  ;;  %380 = vst [vmem:[#allocation2 + $0x60] sm:$0xfe] %v364_v51  ;;  %412 = vst [vmem:[#allocation2 + $0x70] sm:$0x7f] %v396_v53  ;;  %v1511_v4 = vld [vmem:[%s3094_s3 + $0x2a8] sm:$0xff]  ;;  %v2021_v13 = vpack.c.bf16 %v1495_v1, %v1494_v0  ;;  %v1478_v14 = vld [vmem:[%s3094_s3 + $0x1a0] sm:$0xff] }
  0x2b   : > { %1978 = vmatprep.subr.bf16.mxu0 %v1977_v17  ;;  %2010 = vmatprep.subr.bf16.mxu1 %v2009_v22  ;;  %v2626_v56 = vld [vmem:[#allocation2 + $0x28] sm:$0xff]  ;;  %v365_v5 = vrot.slane %v2634_v60, 7  ;;  %v397_v6 = vrot.slane %v2634_v60, 1  ;;  %v2655_v10 = vld [vmem:[#allocation2 + $0x18] sm:$0xff]  ;;  %v2657_v12 = vmax.f32 %v318_v2, 0.0  ;;  %v2666_v16 = vmax.f32 %v319_v9, 0.0 }
  0x2c   : > { %v2053_v17 = vpack.c.bf16 %v1511_v4, %v1510_v3  ;;  %v1496_v18 = vld [vmem:[%s3094_s3 + $0x230] sm:$0xff]  ;;  %v1497_v19 = vld [vmem:[%s3094_s3 + $0x238] sm:$0xff]  ;;  %v2023_v29 = vpack.c.bf16 %v1479_v15, %v1478_v14  ;;  %v1498_v36 = vld [vmem:[%s3094_s3 + $0x240] sm:$0xff] }
  0x2d   : > { %381 = vst [vmem:[#allocation2 + $0x78] sm:$0xfe] %v365_v5  ;;  %413 = vst [vmem:[#allocation2 + $0x88] sm:$0x7f] %v397_v6  ;;  %v366_v21 = vrot.slane %v2657_v12, 7  ;;  %v1512_v23 = vld [vmem:[%s3094_s3 + $0x2b0] sm:$0xff]  ;;  %v2025_v31 = vpack.c.bf16 %v1497_v19, %v1496_v18 }
  0x2e   : > { %1980 = vmatpush3.bf16.msra.mxu0 %v1979_v30  ;;  %2012 = vmatpush3.bf16.msra.mxu1 %v2009_v22  ;;  %v398_v22 = vrot.slane %v2657_v12, 1  ;;  %v1513_v24 = vld [vmem:[%s3094_s3 + $0x2b8] sm:$0xff]  ;;  %v367_v26 = vrot.slane %v2666_v16, 7  ;;  %v399_v27 = vrot.slane %v2666_v16, 1  ;;  %v1480_v32 = vld [vmem:[%s3094_s3 + $0x1b0] sm:$0xff]  ;;  %v1499_v38 = vld [vmem:[%s3094_s3 + $0x248] sm:$0xff] }
  0x2f   : > { %2014 = vmatprep.subr.bf16.mxu0 %v2013_v34  ;;  %2046 = vmatprep.subr.bf16.mxu1 %v2045_v40  ;;  %v2674_v20 = vld [vmem:[#allocation2 + $0x40] sm:$0xff]  ;;  %v2689_v28 = vld [vmem:[#allocation2 + $0x30] sm:$0xff]  ;;  %382 = vst [vmem:[#allocation2 + $0x90] sm:$0xfe] %v366_v21  ;;  %v1481_v33 = vld [vmem:[%s3094_s3 + $0x1b8] sm:$0xff]  ;;  %v2057_v35 = vpack.c.bf16 %v1513_v24, %v1512_v23  ;;  %v2029_v45 = vpack.c.bf16 %v1499_v38, %v1498_v36 }
  0x30   : > { %v2691_v30 = vld [vmem:[#allocation2 + $0x58] sm:$0xff]  ;;  %414 = vst [vmem:[#allocation2 + $0xa0] sm:$0x7f] %v398_v22  ;;  %383 = vst [vmem:[#allocation2 + $0xa8] sm:$0xfe] %v367_v26  ;;  %v1514_v39 = vld [vmem:[%s3094_s3 + $0x2c0] sm:$0xff]  ;;  %v2027_v43 = vpack.c.bf16 %v1481_v33, %v1480_v32 }
  0x31   : > { %562 = vmatmul.mubr.f32.vlgmr.msra.gmra.mrb[0].mxu0 %v2293_v7  ;;  %1850 = vmatmul.mubr.f32.vlgmr.msra.gmra.mrb[0].mxu1 %v2626_v56  ;;  %v2699_v34 = vld [vmem:[#allocation2 + $0x70] sm:$0xff]  ;;  %415 = vst [vmem:[#allocation2 + $0xb8] sm:$0x7f] %v399_v27  ;;  %v2717_v41 = vld [vmem:[#allocation2 + $0x48] sm:$0xff]  ;;  %v1482_v46 = vld [vmem:[%s3094_s3 + $0x1c0] sm:$0xff] }
  0x32   : > { %2016 = vmatpush3.bf16.msra.mxu0 %v2015_v50  ;;  %2048 = vmatpush3.bf16.msra.mxu1 %v2045_v40  ;;  %v1515_v40 = vld [vmem:[%s3094_s3 + $0x2c8] sm:$0xff]  ;;  %v1500_v49 = vld [vmem:[%s3094_s3 + $0x250] sm:$0xff]  ;;  %v1501_v50 = vld [vmem:[%s3094_s3 + $0x258] sm:$0xff] }
  0x33   : > { %566 = vmatprep.mubr.f32.mxu0 %v2554_v8  ;;  %2018 = vmatprep.subr.bf16.mxu0 %v2017_v62  ;;  %v1483_v47 = vld [vmem:[%s3094_s3 + $0x1c8] sm:$0xff]  ;;  %v2061_v48 = vpack.c.bf16 %v1515_v40, %v1514_v39  ;;  %v1516_v51 = vld [vmem:[%s3094_s3 + $0x2d0] sm:$0xff]  ;;  %v1517_v52 = vld [vmem:[%s3094_s3 + $0x2d8] sm:$0xff]  ;;  %v2033_v61 = vpack.c.bf16 %v1501_v50, %v1500_v49 }
  0x34   : > { %2050 = vmatprep.subr.bf16.mxu1 %v2049_v63  ;;  %1852 = vmatprep.mubr.f32.mxu1 %v2674_v20  ;;  %v2719_v44 = vld [vmem:[#allocation2 + $0x88] sm:$0xff]  ;;  %v2744_v55 = vld [vmem:[#allocation2 + $0x60] sm:$0xff]  ;;  %v2031_v57 = vpack.c.bf16 %v1483_v47, %v1482_v46  ;;  %v1484_v62 = vld [vmem:[%s3094_s3 + $0x1d0] sm:$0xff]  ;;  %v2065_v0 = vpack.c.bf16 %v1517_v52, %v1516_v51 }
  0x35   : > { %567 = vmatmul.mubr.f32.gmra.mrb[2].mxu0 %v2655_v10  ;;  %1853 = vmatmul.mubr.f32.gmra.mrb[2].mxu1 %v2691_v30  ;;  %v1502_v1 = vld [vmem:[%s3094_s3 + $0x260] sm:$0xff]  ;;  %v1503_v2 = vld [vmem:[%s3094_s3 + $0x268] sm:$0xff]  ;;  %v2770_v5 = vld [vmem:[#allocation2 + $0x78] sm:$0xff] }
  0x36   : > { %2020 = vmatpush3.bf16.msra.mxu0 %v2019_v11  ;;  %571 = vmatprep.mubr.f32.mxu0 %v2581_v25  ;;  %v1518_v3 = vld [vmem:[%s3094_s3 + $0x2e0] sm:$0xff]  ;;  %v1519_v4 = vld [vmem:[%s3094_s3 + $0x2e8] sm:$0xff]  ;;  %v2037_v9 = vpack.c.bf16 %v1503_v2, %v1502_v1  ;;  %v290_v14 = vld [vmem:[%s2502_s17 + $0x38] sm:$0xff] }
  0x37   : > { %2052 = vmatpush3.bf16.msra.mxu1 %v2049_v63  ;;  %2022 = vmatprep.subr.bf16.mxu0 %v2021_v13  ;;  %v2741_v53 = vld [vmem:[#allocation2 + $0xa0] sm:$0xff]  ;;  %v1485_v63 = vld [vmem:[%s3094_s3 + $0x1d8] sm:$0xff]  ;;  %v1487_v13 = vld [vmem:[%s3094_s3 + $0x1e8] sm:$0xff]  ;;  %v2069_v15 = vpack.c.bf16 %v1519_v4, %v1518_v3  ;;  %v305_v19 = vmul.f32 %v2520_v54, %v290_v14 }
  0x38   : > { %2054 = vmatprep.subr.bf16.mxu1 %v2053_v17  ;;  %1855 = vmatprep.mubr.f32.mxu1 %v2699_v34  ;;  %v2746_v58 = vld [vmem:[#allocation2 + $0xb8] sm:$0xff]  ;;  %v2035_v6 = vpack.c.bf16 %v1485_v63, %v1484_v62  ;;  %v1486_v11 = vld [vmem:[%s3094_s3 + $0x1e0] sm:$0xff]  ;;  %v1520_v21 = vld [vmem:[%s3094_s3 + $0x2f0] sm:$0xff] }
  0x39   : > { %572 = vmatmul.mubr.f32.gmra.mrb[4].mxu0 %v2689_v28  ;;  %1856 = vmatmul.mubr.f32.gmra.mrb[4].mxu1 %v2719_v44  ;;  %v1505_v18 = vld [vmem:[%s3094_s3 + $0x278] sm:$0xff]  ;;  %v2795_v23 = vld [vmem:[#allocation2 + $0x90] sm:$0xff]  ;;  %v2039_v24 = vpack.c.bf16 %v1487_v13, %v1486_v11  ;;  %v1554_v33 = vld [vmem:[%s3094_s3 + $0x400] sm:$0xff] }
  0x3a   : > { %2024 = vmatpush3.bf16.msra.mxu0 %v2023_v29  ;;  %576 = vmatprep.mubr.f32.mxu0 %v2600_v37  ;;  %v1521_v22 = vld [vmem:[%s3094_s3 + $0x2f8] sm:$0xff]  ;;  %v1488_v26 = vld [vmem:[%s3094_s3 + $0x1f0] sm:$0xff]  ;;  %v2820_v36 = vld [vmem:[#allocation2 + $0xa8] sm:$0xff] }
  0x3b   : > { %2056 = vmatpush3.bf16.msra.mxu1 %v2053_v17  ;;  %2026 = vmatprep.subr.bf16.mxu0 %v2025_v31  ;;  %v1504_v17 = vld [vmem:[%s3094_s3 + $0x270] sm:$0xff]  ;;  %v1489_v27 = vld [vmem:[%s3094_s3 + $0x1f8] sm:$0xff]  ;;  %v2073_v29 = vpack.c.bf16 %v1521_v22, %v1520_v21  ;;  %v1538_v31 = vld [vmem:[%s3094_s3 + $0x380] sm:$0xff] }
  0x3c   : > { %2058 = vmatprep.subr.bf16.mxu1 %v2057_v35  ;;  %1858 = vmatprep.mubr.f32.mxu1 %v2741_v53  ;;  %v2041_v54 = vpack.c.bf16 %v1505_v18, %v1504_v17  ;;  %v2043_v38 = vpack.c.bf16 %v1489_v27, %v1488_v26  ;;  %v1523_v46 = vld [vmem:[%s3094_s3 + $0x308] sm:$0xff]  ;;  %v1541_v49 = vld [vmem:[%s3094_s3 + $0x398] sm:$0xff]  ;;  %v1556_v50 = vld [vmem:[%s3094_s3 + $0x410] sm:$0xff] }
  0x3d   : > { %577 = vmatmul.mubr.f32.gmra.mrb[6].mxu0 %v2717_v41  ;;  %1859 = vmatmul.mubr.f32.gmra.mrb[6].mxu1 %v2746_v58  ;;  %v1557_v51 = vld [vmem:[%s3094_s3 + $0x418] sm:$0xff]  ;;  %v1558_v1 = vld [vmem:[%s3094_s3 + $0x420] sm:$0xff]  ;;  %v1559_v2 = vld [vmem:[%s3094_s3 + $0x428] sm:$0xff] }
  0x3e   : > { %2028 = vmatpush3.bf16.msra.mxu0 %v2027_v43  ;;  %581 = vmatprep.mubr.f32.mxu0 %v2607_v42  ;;  %v2113_v63 = vpack.c.bf16 %v1557_v51, %v1556_v50  ;;  %v1544_v11 = vld [vmem:[%s3094_s3 + $0x3b0] sm:$0xff]  ;;  %v1545_v13 = vld [vmem:[%s3094_s3 + $0x3b8] sm:$0xff]  ;;  %v1563_v26 = vld [vmem:[%s3094_s3 + $0x448] sm:$0xff] }
  0x3f   : > { %2060 = vmatpush3.bf16.msra.mxu1 %v2057_v35  ;;  %2030 = vmatprep.subr.bf16.mxu0 %v2029_v45  ;;  %v1555_v35 = vld [vmem:[%s3094_s3 + $0x408] sm:$0xff]  ;;  %v1522_v45 = vld [vmem:[%s3094_s3 + $0x300] sm:$0xff]  ;;  %v1560_v14 = vld [vmem:[%s3094_s3 + $0x430] sm:$0xff]  ;;  %v2089_v18 = vpack.c.bf16 %v1545_v13, %v1544_v11 }
  0x40   : > { %2062 = vmatprep.subr.bf16.mxu1 %v2061_v48  ;;  %1893 = vmatprep.mubr.f32.mxu1 %v2626_v56  ;;  %v320_v56 = vadd.f32 %v2532_v59, %v305_v19  ;;  %v1539_v59 = vld [vmem:[%s3094_s3 + $0x388] sm:$0xff]  ;;  %v2109_v47 = vpack.c.bf16 %v1555_v35, %v1554_v33  ;;  %v2079_v52 = vpack.c.bf16 %v1523_v46, %v1522_v45  ;;  %v1528_v19 = vld [vmem:[%s3094_s3 + $0x330] sm:$0xff]  ;;  %v1529_v21 = vld [vmem:[%s3094_s3 + $0x338] sm:$0xff] }
  0x41   : > { %582 = vmatmul.mubr.f32.gmra.mrb[8].mxu0 %v2744_v55  ;;  %v2077_v43 = vpack.c.bf16 %v1539_v59, %v1538_v31  ;;  %v2091_v27 = vpack.c.bf16 %v1529_v21, %v1528_v19  ;;  %v1530_v31 = vld [vmem:[%s3094_s3 + $0x340] sm:$0xff]  ;;  %v1531_v59 = vld [vmem:[%s3094_s3 + $0x348] sm:$0xff]  ;;  %v1548_v35 = vld [vmem:[%s3094_s3 + $0x3d0] sm:$0xff] }
  0x42   : > { %2032 = vmatpush3.bf16.msra.mxu0 %v2031_v57  ;;  %586 = vmatprep.mubr.f32.mxu0 %v2634_v60  ;;  %v2810_v32 = vmax.f32 %v320_v56, 0.0  ;;  %v1524_v57 = vld [vmem:[%s3094_s3 + $0x310] sm:$0xff]  ;;  %v1547_v56 = vld [vmem:[%s3094_s3 + $0x3c8] sm:$0xff]  ;;  %v2095_v45 = vpack.c.bf16 %v1531_v59, %v1530_v31  ;;  %v1550_v50 = vld [vmem:[%s3094_s3 + $0x3e0] sm:$0xff] }
  0x43   : > { %2064 = vmatpush3.bf16.msra.mxu1 %v2061_v48  ;;  %2034 = vmatprep.subr.bf16.mxu0 %v2033_v61  ;;  %v1540_v48 = vld [vmem:[%s3094_s3 + $0x390] sm:$0xff]  ;;  %v1525_v61 = vld [vmem:[%s3094_s3 + $0x318] sm:$0xff]  ;;  %v1551_v51 = vld [vmem:[%s3094_s3 + $0x3e8] sm:$0xff] }
  0x44   : > { %2066 = vmatprep.subr.bf16.mxu1 %v2065_v0  ;;  %v368_v39 = vrot.slane %v2810_v32, 7  ;;  %v400_v40 = vrot.slane %v2810_v32, 1  ;;  %v2081_v62 = vpack.c.bf16 %v1541_v49, %v1540_v48  ;;  %v2083_v3 = vpack.c.bf16 %v1525_v61, %v1524_v57  ;;  %v1533_v48 = vld [vmem:[%s3094_s3 + $0x358] sm:$0xff]  ;;  %v1567_v57 = vld [vmem:[%s3094_s3 + $0x468] sm:$0xff] }
  0x45   : > { %587 = vmatmul.mubr.f32.gmra.mrb[10].mxu0 %v2770_v5 }
  0x46   : > { %2036 = vmatpush3.bf16.msra.mxu0 %v2035_v6  ;;  %591 = vmatprep.mubr.f32.mxu0 %v2657_v12  ;;  %384 = vst [vmem:[#allocation2 + $0xc0] sm:$0xfe] %v368_v39  ;;  %416 = vst [vmem:[#allocation2 + $0xd0] sm:$0x7f] %v400_v40  ;;  %v1527_v6 = vld [vmem:[%s3094_s3 + $0x328] sm:$0xff]  ;;  %v1564_v39 = vld [vmem:[%s3094_s3 + $0x450] sm:$0xff] }
  0x47   : > { %2068 = vmatpush3.bf16.msra.mxu1 %v2065_v0  ;;  %2038 = vmatprep.subr.bf16.mxu0 %v2037_v9  ;;  %v1542_v0 = vld [vmem:[%s3094_s3 + $0x3a0] sm:$0xff]  ;;  %v2117_v9 = vpack.c.bf16 %v1559_v2, %v1558_v1  ;;  %v1565_v40 = vld [vmem:[%s3094_s3 + $0x458] sm:$0xff]  ;;  %v1568_v2 = vld [vmem:[%s3094_s3 + $0x470] sm:$0xff] }
  0x48   : > { %2070 = vmatprep.subr.bf16.mxu1 %v2069_v15  ;;  %v2129_v49 = vpack.c.bf16 %v1565_v40, %v1564_v39  ;;  %v1553_v1 = vld [vmem:[%s3094_s3 + $0x3f8] sm:$0xff] }
  0x49   : > { %592 = vmatmul.mubr.f32.gmra.mrb[12].mxu0 %v2795_v23 }
  0x4a   : > { %2040 = vmatpush3.bf16.msra.mxu0 %v2039_v24  ;;  %596 = vmatprep.mubr.f32.mxu0 %v2666_v16  ;;  %v1546_v24 = vld [vmem:[%s3094_s3 + $0x3c0] sm:$0xff] }
  0x4b   : > { %2072 = vmatpush3.bf16.msra.mxu1 %v2069_v15  ;;  %2042 = vmatprep.subr.bf16.mxu0 %v2041_v54  ;;  %v1561_v15 = vld [vmem:[%s3094_s3 + $0x438] sm:$0xff]  ;;  %v1562_v54 = vld [vmem:[%s3094_s3 + $0x440] sm:$0xff] }
  0x4c   : > { %2074 = vmatprep.subr.bf16.mxu1 %v2073_v29  ;;  %v2121_v22 = vpack.c.bf16 %v1561_v15, %v1560_v14  ;;  %v2125_v33 = vpack.c.bf16 %v1563_v26, %v1562_v54 }
  0x4d   : > { %597 = vmatmul.mubr.f32.gmra.mrb[14].mxu0 %v2820_v36  ;;  %v736_v13 = vld [vmem:[#allocation2 + $0xc0] sm:$0xff] }
  0x4e   : > { %2044 = vmatpush3.bf16.msra.mxu0 %v2043_v38  ;;  %852 = vmatprep.mubr.f32.mxu0 %v2554_v8  ;;  %v1543_v8 = vld [vmem:[%s3094_s3 + $0x3a8] sm:$0xff]  ;;  %v1549_v38 = vld [vmem:[%s3094_s3 + $0x3d8] sm:$0xff] }
  0x4f   : > { %2076 = vmatpush3.bf16.msra.mxu1 %v2073_v29  ;;  %2078 = vmatprep.subr.bf16.mxu0 %v2077_v43  ;;  %v2085_v4 = vpack.c.bf16 %v1543_v8, %v1542_v0  ;;  %v2093_v29 = vpack.c.bf16 %v1547_v56, %v1546_v24  ;;  %v2929_v43 = vld [vmem:[#allocation2 + $0xd0] sm:$0xff]  ;;  %v2097_v46 = vpack.c.bf16 %v1549_v38, %v1548_v35  ;;  %v1535_v0 = vld [vmem:[%s3094_s3 + $0x368] sm:$0xff] }
  0x50   : > { %2110 = vmatprep.subr.bf16.mxu1 %v2109_v47  ;;  %v331_v38 = vld [vmem:[%s3008_s19 + $0x10] sm:$0xff] }
  0x51   : > { %853 = vmatmul.mubr.f32.vlgmr.msra.gmra.mrb[16].mxu0 %v2655_v10  ;;  %v1526_v10 = vld [vmem:[%s3094_s3 + $0x320] sm:$0xff] }
  0x52   : > { %1894 = vmatmul.mubr.f32.vlgmr.msra.gmra.mrb[0].mxu1 %v2674_v20  ;;  %2080 = vmatpush3.bf16.msra.mxu0 %v2079_v52  ;;  %v2087_v17 = vpack.c.bf16 %v1527_v6, %v1526_v10  ;;  %v1566_v52 = vld [vmem:[%s3094_s3 + $0x460] sm:$0xff]  ;;  %v1536_v6 = vld [vmem:[%s3094_s3 + $0x370] sm:$0xff] }
  0x53   : > { %2112 = vmatpush3.bf16.msra.mxu1 %v2109_v47  ;;  %857 = vmatprep.mubr.f32.mxu0 %v2581_v25  ;;  %v1532_v47 = vld [vmem:[%s3094_s3 + $0x350] sm:$0xff]  ;;  %v2133_v8 = vpack.c.bf16 %v1567_v57, %v1566_v52  ;;  %v333_v57 = vld [vmem:[%s3008_s19 + $0x20] sm:$0xff] }
  0x54   : > { %2082 = vmatprep.subr.bf16.mxu0 %v2081_v62  ;;  %2114 = vmatprep.subr.bf16.mxu1 %v2113_v63  ;;  %v2099_v61 = vpack.c.bf16 %v1533_v48, %v1532_v47  ;;  %v2101_v62 = vpack.c.bf16 %v1551_v51, %v1550_v50  ;;  %v332_v47 = vld [vmem:[%s3008_s19 + $0x18] sm:$0xff] }
  0x55   : > { %858 = vmatmul.mubr.f32.gmra.mrb[18].mxu0 %v2689_v28  ;;  %1896 = vmatprep.mubr.f32.mxu1 %v2691_v30 }
  0x56   : > { %2084 = vmatpush3.bf16.msra.mxu0 %v2083_v3  ;;  %862 = vmatprep.mubr.f32.mxu0 %v2600_v37  ;;  %v1569_v3 = vld [vmem:[%s3094_s3 + $0x478] sm:$0xff] }
  0x57   : > { %2116 = vmatpush3.bf16.msra.mxu1 %v2113_v63  ;;  %2086 = vmatprep.subr.bf16.mxu0 %v2085_v4  ;;  %v1534_v63 = vld [vmem:[%s3094_s3 + $0x360] sm:$0xff]  ;;  %v2137_v11 = vpack.c.bf16 %v1569_v3, %v1568_v2 }
  0x58   : > { %2118 = vmatprep.subr.bf16.mxu1 %v2117_v9  ;;  %1897 = vmatmul.mubr.f32.gmra.mrb[2].mxu1 %v2699_v34  ;;  %v2103_v4 = vpack.c.bf16 %v1535_v0, %v1534_v63 }
  0x59   : > { %863 = vmatmul.mubr.f32.gmra.mrb[20].mxu0 %v2717_v41  ;;  %1899 = vmatprep.mubr.f32.mxu1 %v2719_v44 }
  0x5a   : > { %2088 = vmatpush3.bf16.msra.mxu0 %v2087_v17  ;;  %867 = vmatprep.mubr.f32.mxu0 %v2607_v42 }
  0x5b   : > { %2120 = vmatpush3.bf16.msra.mxu1 %v2117_v9  ;;  %2090 = vmatprep.subr.bf16.mxu0 %v2089_v18  ;;  %v1537_v9 = vld [vmem:[%s3094_s3 + $0x378] sm:$0xff] }
  0x5c   : > { %2122 = vmatprep.subr.bf16.mxu1 %v2121_v22  ;;  %1900 = vmatmul.mubr.f32.gmra.mrb[4].mxu1 %v2741_v53  ;;  %v2107_v14 = vpack.c.bf16 %v1537_v9, %v1536_v6  ;;  %v335_v6 = vld [vmem:[%s3008_s19 + $0x30] sm:$0xff] }
  0x5d   : > { %868 = vmatmul.mubr.f32.gmra.mrb[22].mxu0 %v2744_v55  ;;  %1902 = vmatprep.mubr.f32.mxu1 %v2746_v58 }
  0x5e   : > { %2092 = vmatpush3.bf16.msra.mxu0 %v2091_v27  ;;  %872 = vmatprep.mubr.f32.mxu0 %v2634_v60  ;;  %v330_v27 = vld [vmem:[%s3008_s19 + $0x8] sm:$0xff] }
  0x5f   : > { %2124 = vmatpush3.bf16.msra.mxu1 %v2121_v22  ;;  %2094 = vmatprep.subr.bf16.mxu0 %v2093_v29  ;;  %v329_v22 = vld [vmem:[%s3008_s19] sm:$0xff] }
  0x60   : > { %2126 = vmatprep.subr.bf16.mxu1 %v2125_v33  ;;  %1903 = vmatmul.mubr.f32.gmra.mrb[6].mxu1 %v2929_v43 }
  0x61   : > { %873 = vmatmul.mubr.f32.gmra.mrb[24].mxu0 %v2770_v5  ;;  %1937 = vmatprep.mubr.f32.mxu1 %v2674_v20  ;;  %v1552_v20 = vld [vmem:[%s3094_s3 + $0x3f0] sm:$0xff] }
  0x62   : > { %2096 = vmatpush3.bf16.msra.mxu0 %v2095_v45  ;;  %877 = vmatprep.mubr.f32.mxu0 %v2657_v12  ;;  %v2105_v10 = vpack.c.bf16 %v1553_v1, %v1552_v20  ;;  %v334_v20 = vld [vmem:[%s3008_s19 + $0x28] sm:$0xff] }
  0x63   : > { %2128 = vmatpush3.bf16.msra.mxu1 %v2125_v33  ;;  %2098 = vmatprep.subr.bf16.mxu0 %v2097_v46 }
  0x64   : > { %2130 = vmatprep.subr.bf16.mxu1 %v2129_v49 }
  0x65   : > { %878 = vmatmul.mubr.f32.gmra.mrb[26].mxu0 %v2795_v23 }
  0x66   : > { %2100 = vmatpush3.bf16.msra.mxu0 %v2099_v61  ;;  %882 = vmatprep.mubr.f32.mxu0 %v2666_v16 }
  0x67   : > { %2132 = vmatpush3.bf16.msra.mxu1 %v2129_v49  ;;  %2102 = vmatprep.subr.bf16.mxu0 %v2101_v62 }
  0x68   : > { %2134 = vmatprep.subr.bf16.mxu1 %v2133_v8 }
  0x69   : > { %883 = vmatmul.mubr.f32.gmra.mrb[28].mxu0 %v2820_v36 }
  0x6a   : > { %2104 = vmatpush3.bf16.msra.mxu0 %v2103_v4  ;;  %887 = vmatprep.mubr.f32.mxu0 %v2810_v32 }
  0x6b   : > { %2136 = vmatpush3.bf16.msra.mxu1 %v2133_v8  ;;  %2106 = vmatprep.subr.bf16.mxu0 %v2105_v10 }
  0x6c   : > { %2138 = vmatprep.subr.bf16.mxu1 %v2137_v11 }
  0x6d   : > { %888 = vmatmul.mubr.f32.gmra.mrb[30].mxu0 %v736_v13 }
  0x6e   : > { %2108 = vmatpush3.bf16.msra.mxu0 %v2107_v14  ;;  %1144 = vmatprep.mubr.f32.mxu0 %v2581_v25 }
  0x6f   : > { %2140 = vmatpush3.bf16.msra.mxu1 %v2137_v11 }
  0x71   : > { %1145 = vmatmul.mubr.f32.vlgmr.msra.gmra.mrb[32].mxu0 %v2689_v28 }
  0x72   : > { %1938 = vmatmul.mubr.f32.vlgmr.msra.gmra.mrb[0].mxu1 %v2691_v30  ;;  %1149 = vmatprep.mubr.f32.mxu0 %v2600_v37 }
  0x73   : > { %1940 = vmatprep.mubr.f32.mxu1 %v2699_v34 }
  0x75   : > { %1150 = vmatmul.mubr.f32.gmra.mrb[34].mxu0 %v2717_v41 }
  0x76   : > { %1941 = vmatmul.mubr.f32.gmra.mrb[2].mxu1 %v2719_v44  ;;  %1154 = vmatprep.mubr.f32.mxu0 %v2607_v42 }
  0x77   : > { %1943 = vmatprep.mubr.f32.mxu1 %v2741_v53 }
  0x79   : > { %1155 = vmatmul.mubr.f32.gmra.mrb[36].mxu0 %v2744_v55 }
  0x7a   : > { %1944 = vmatmul.mubr.f32.gmra.mrb[4].mxu1 %v2746_v58  ;;  %1159 = vmatprep.mubr.f32.mxu0 %v2634_v60 }
  0x7b   : > { %1946 = vmatprep.mubr.f32.mxu1 %v2929_v43 }
  0x7d   : > { %1160 = vmatmul.mubr.f32.gmra.mrb[38].mxu0 %v2770_v5 }
  0x7e   : > { %1947 = vmatmul.mubr.f32.gmra.mrb[6].mxu1 %v2293_v7  ;;  %1164 = vmatprep.mubr.f32.mxu0 %v2657_v12 }
  0x81   : > { %1165 = vmatmul.mubr.f32.gmra.mrb[40].mxu0 %v2795_v23 }
  0x82   : > { %1169 = vmatprep.mubr.f32.mxu0 %v2666_v16 }
  0x85   : > { %1170 = vmatmul.mubr.f32.gmra.mrb[42].mxu0 %v2820_v36 }
  0x86   : > { %1174 = vmatprep.mubr.f32.mxu0 %v2810_v32 }
  0x89   : > { %1175 = vmatmul.mubr.f32.gmra.mrb[44].mxu0 %v736_v13 }
  0x8a   : > { %1179 = vmatprep.mubr.f32.mxu0 %v2293_v7 }
  0x8d   : > { %1180 = vmatmul.mubr.f32.gmra.mrb[46].mxu0 %v2293_v7 }
 0x104   : > { %v1609_v25 = vpop.f32.mrb[0].mxu0 }
 0x105   : > { %v1610_v37 = vpop.f32.mrb[1].mxu0 }
 0x106   : > { %v1611_v42 = vadd.f32 %v1610_v37, %v1609_v25  ;;  %v336_v37 = vld [vmem:[%s3008_s19 + $0x38] sm:$0xff]  ;;  %s2235_s19 = scalar_lea.vmem %s2234_s18, 64 }
 0x107   : > { %p2237_p1 = scmp.lt.s32.totalorder %s2235_s19, %s2229_s16 }
 0x108   : > { %v1612_v60 = vpop.f32.mrb[2].mxu0  ;;  %v2145_v54 = vadd.f32 %v1611_v42, %v329_v22 }
 0x109   : > { %v1613_v28 = vpop.f32.mrb[3].mxu0  ;;  %p2238_p2 = por %p2237_p1, %p2236_p0 }
 0x10a   : > { %v1614_v30 = vadd.f32 %v1613_v28, %v1612_v60 }
 0x10b   : > { %p2239_p3 = pnand %p2238_p2, %p2232_p13 }
 0x10c   : > { %v1615_v12 = vpop.f32.mrb[4].mxu0  ;;  %v2141_v33 = vadd.f32 %v1614_v30, %v330_v27 }
 0x10d   : > { %v1616_v34 = vpop.f32.mrb[5].mxu0 }
 0x10e   : > { %v1617_v41 = vadd.f32 %v1616_v34, %v1615_v12 }
 0x110   : > { %v1618_v16 = vpop.f32.mrb[6].mxu0  ;;  %v2153_v45 = vadd.f32 %v1617_v41, %v331_v38 }
 0x111   : > { %v1619_v44 = vpop.f32.mrb[7].mxu0 }
 0x112   : > { %v1620_v53 = vadd.f32 %v1619_v44, %v1618_v16 }
 0x114   : > { %v1621_v55 = vpop.f32.mrb[8].mxu0  ;;  %v2149_v51 = vadd.f32 %v1620_v53, %v332_v47 }
 0x115   : > { %v1622_v58 = vpop.f32.mrb[9].mxu0 }
 0x116   : > { %v1623_v5 = vadd.f32 %v1622_v58, %v1621_v55 }
 0x118   : > { %v1624_v23 = vpop.f32.mrb[10].mxu0  ;;  %v2161_v0 = vadd.f32 %v1623_v5, %v333_v57 }
 0x119   : > { %v1625_v32 = vpop.f32.mrb[11].mxu0 }
 0x11a   : > { %v1626_v36 = vadd.f32 %v1625_v32, %v1624_v23 }
 0x11c   : > { %v1627_v7 = vpop.f32.mrb[12].mxu0  ;;  %v2157_v4 = vadd.f32 %v1626_v36, %v334_v20 }
 0x11d   : > { %v1628_v15 = vpop.f32.mrb[13].mxu0 }
 0x11e   : > { %v1629_v17 = vadd.f32 %v1628_v15, %v1627_v7 }
 0x120   : > { %v1630_v18 = vpop.f32.mrb[14].mxu0  ;;  %v2169_v14 = vadd.f32 %v1629_v17, %v335_v6 }
 0x121   : > { %v1631_v19 = vpop.f32.mrb[15].mxu0 }
 0x122   : > { %v1632_v21 = vadd.f32 %v1631_v19, %v1630_v18 }
 0x124   : > { %v1689_v24 = vpop.f32.mrb[16].mxu0  ;;  %v2165_v30 = vadd.f32 %v1632_v21, %v336_v37 }
 0x125   : > { %v1690_v56 = vpop.f32.mrb[17].mxu0 }
 0x126   : > { %v1691_v26 = vadd.f32 %v1690_v56, %v1689_v24 }
 0x128   : > { %v2146_v29 = vadd.f32 %v2145_v54, %v1691_v26  ;;  %v1692_v31 = vpop.f32.mrb[18].mxu0 }
 0x129   : > { %v1693_v59 = vpop.f32.mrb[19].mxu0 }
 0x12a   : > { %v1694_v35 = vadd.f32 %v1693_v59, %v1692_v31 }
 0x12c   : > { %v2142_v39 = vadd.f32 %v2141_v33, %v1694_v35  ;;  %v1695_v40 = vpop.f32.mrb[20].mxu0 }
 0x12d   : > { %v1696_v43 = vpop.f32.mrb[21].mxu0 }
 0x12e   : > { %v1697_v46 = vadd.f32 %v1696_v43, %v1695_v40 }
 0x130   : > { %v2154_v48 = vadd.f32 %v2153_v45, %v1697_v46  ;;  %v1698_v49 = vpop.f32.mrb[22].mxu0 }
 0x131   : > { %v1699_v50 = vpop.f32.mrb[23].mxu0 }
 0x132   : > { %v1700_v52 = vadd.f32 %v1699_v50, %v1698_v49 }
 0x134   : > { %v2150_v61 = vadd.f32 %v2149_v51, %v1700_v52  ;;  %v1701_v62 = vpop.f32.mrb[24].mxu0 }
 0x135   : > { %v1702_v63 = vpop.f32.mrb[25].mxu0 }
 0x136   : > { %v1703_v8 = vadd.f32 %v1702_v63, %v1701_v62 }
 0x138   : > { %v3016_v1 = vadd.f32 %v2161_v0, %v1703_v8  ;;  %v1704_v2 = vpop.f32.mrb[26].mxu0 }
 0x139   : > { %v1705_v3 = vpop.f32.mrb[27].mxu0 }
 0x13a   : > { %v1706_v10 = vadd.f32 %v1705_v3, %v1704_v2 }
 0x13c   : > { %v3019_v9 = vadd.f32 %v2157_v4, %v1706_v10  ;;  %v1707_v11 = vpop.f32.mrb[28].mxu0 }
 0x13d   : > { %v1708_v13 = vpop.f32.mrb[29].mxu0 }
 0x13e   : > { %v1709_v25 = vadd.f32 %v1708_v13, %v1707_v11 }
 0x140   : > { %v3022_v42 = vadd.f32 %v2169_v14, %v1709_v25  ;;  %v1710_v60 = vpop.f32.mrb[30].mxu0 }
 0x141   : > { %v1711_v28 = vpop.f32.mrb[31].mxu0 }
 0x142   : > { %v1712_v12 = vadd.f32 %v1711_v28, %v1710_v60 }
 0x144   : > { %v3024_v34 = vadd.f32 %v2165_v30, %v1712_v12  ;;  %v1769_v41 = vpop.f32.mrb[32].mxu0 }
 0x145   : > { %v1939_v16 = vpop.f32.mrb[0].mxu1  ;;  %v1770_v44 = vpop.f32.mrb[33].mxu0 }
 0x146   : > { %v1771_v53 = vadd.f32 %v1770_v44, %v1769_v41  ;;  %v1251_v55 = vpop.f32.mrb[1].mxu1 }
 0x148   : > { %v2147_v58 = vadd.f32 %v2146_v29, %v1771_v53  ;;  %v1772_v5 = vpop.f32.mrb[34].mxu0 }
 0x149   : > { %v1942_v23 = vpop.f32.mrb[2].mxu1  ;;  %v1773_v32 = vpop.f32.mrb[35].mxu0 }
 0x14a   : > { %v2148_v36 = vadd.f32 %v2147_v58, %v1251_v55  ;;  %v1774_v7 = vadd.f32 %v1773_v32, %v1772_v5  ;;  %v1261_v15 = vpop.f32.mrb[3].mxu1 }
 0x14c   : > { %1298 = vst [vmem:[%s3030_s9] sm:$0xff] %v2148_v36  ;;  %v2143_v17 = vadd.f32 %v2142_v39, %v1774_v7  ;;  %v1775_v18 = vpop.f32.mrb[36].mxu0  ;;  %v1319_v54 = vmul.f32 %v2148_v36, %v2148_v36 }
 0x14d   : > { %v1945_v19 = vpop.f32.mrb[4].mxu1  ;;  %v1776_v21 = vpop.f32.mrb[37].mxu0 }
 0x14e   : > { %v2144_v22 = vadd.f32 %v2143_v17, %v1939_v16  ;;  %v1777_v24 = vadd.f32 %v1776_v21, %v1775_v18  ;;  %v1271_v56 = vpop.f32.mrb[5].mxu1 }
 0x150   : > { %1299 = vst [vmem:[%s3030_s9 + $0x8] sm:$0xff] %v2144_v22  ;;  %v1306_v26 = vadd.f32 %v2148_v36, %v2144_v22  ;;  %v1320_v27 = vmul.f32 %v2144_v22, %v2144_v22  ;;  %v2155_v29 = vadd.f32 %v2154_v48, %v1777_v24  ;;  %v1778_v31 = vpop.f32.mrb[38].mxu0 }
 0x151   : > { %v1948_v59 = vpop.f32.mrb[6].mxu1  ;;  %v1779_v33 = vpop.f32.mrb[39].mxu0 }
 0x152   : > { %v1327_v35 = vadd.f32 %v1320_v27, %v1319_v54  ;;  %v2156_v38 = vadd.f32 %v2155_v29, %v1261_v15  ;;  %v1780_v40 = vadd.f32 %v1779_v33, %v1778_v31  ;;  %v1281_v39 = vpop.f32.mrb[7].mxu1 }
 0x154   : > { %1300 = vst [vmem:[%s3030_s9 + $0x10] sm:$0xff] %v2156_v38  ;;  %v1307_v43 = vadd.f32 %v2156_v38, %v1306_v26  ;;  %v1321_v45 = vmul.f32 %v2156_v38, %v2156_v38  ;;  %v2151_v46 = vadd.f32 %v2150_v61, %v1780_v40  ;;  %v1781_v47 = vpop.f32.mrb[40].mxu0 }
 0x155   : > { %v1782_v49 = vpop.f32.mrb[41].mxu0 }
 0x156   : > { %v1328_v50 = vadd.f32 %v1327_v35, %v1321_v45  ;;  %v2152_v51 = vadd.f32 %v2151_v46, %v1942_v23  ;;  %v1783_v52 = vadd.f32 %v1782_v49, %v1781_v47 }
 0x158   : > { %1301 = vst [vmem:[%s3030_s9 + $0x18] sm:$0xff] %v2152_v51  ;;  %v1308_v48 = vadd.f32 %v2152_v51, %v1307_v43  ;;  %v1322_v57 = vmul.f32 %v2152_v51, %v2152_v51  ;;  %v2163_v62 = vadd.f32 %v3016_v1, %v1783_v52  ;;  %v1784_v63 = vpop.f32.mrb[42].mxu0 }
 0x159   : > { %v1785_v0 = vpop.f32.mrb[43].mxu0 }
 0x15a   : > { %v1329_v8 = vadd.f32 %v1328_v50, %v1322_v57  ;;  %v2164_v20 = vadd.f32 %v2163_v62, %v1271_v56  ;;  %v1786_v2 = vadd.f32 %v1785_v0, %v1784_v63 }
 0x15c   : > { %1302 = vst [vmem:[%s3030_s9 + $0x20] sm:$0xff] %v2164_v20  ;;  %v1309_v3 = vadd.f32 %v2164_v20, %v1308_v48  ;;  %v1323_v4 = vmul.f32 %v2164_v20, %v2164_v20  ;;  %v2159_v61 = vadd.f32 %v3019_v9, %v1786_v2  ;;  %v1787_v10 = vpop.f32.mrb[44].mxu0 }
 0x15d   : > { %v1788_v6 = vpop.f32.mrb[45].mxu0 }
 0x15e   : > { %v1330_v11 = vadd.f32 %v1329_v8, %v1323_v4  ;;  %v2160_v13 = vadd.f32 %v2159_v61, %v1945_v19  ;;  %v1789_v14 = vadd.f32 %v1788_v6, %v1787_v10 }
 0x160   : > { %1303 = vst [vmem:[%s3030_s9 + $0x28] sm:$0xff] %v2160_v13  ;;  %v1310_v25 = vadd.f32 %v2160_v13, %v1309_v3  ;;  %v1324_v1 = vmul.f32 %v2160_v13, %v2160_v13  ;;  %v2171_v37 = vadd.f32 %v3022_v42, %v1789_v14  ;;  %v1790_v60 = vpop.f32.mrb[46].mxu0 }
 0x161   : > { %v1791_v28 = vpop.f32.mrb[47].mxu0 }
 0x162   : > { %v1331_v30 = vadd.f32 %v1330_v11, %v1324_v1  ;;  %v2172_v12 = vadd.f32 %v2171_v37, %v1281_v39  ;;  %v1792_v41 = vadd.f32 %v1791_v28, %v1790_v60 }
 0x164   : > { %1304 = vst [vmem:[%s3030_s9 + $0x30] sm:$0xff] %v2172_v12  ;;  %v1311_v16 = vadd.f32 %v2172_v12, %v1310_v25  ;;  %v1325_v9 = vmul.f32 %v2172_v12, %v2172_v12  ;;  %v2167_v44 = vadd.f32 %v3024_v34, %v1792_v41 }
 0x166   : > { %v1332_v53 = vadd.f32 %v1331_v30, %v1325_v9  ;;  %v2168_v55 = vadd.f32 %v2167_v44, %v1948_v59 }
 0x168   : > { %1305 = vst [vmem:[%s3030_s9 + $0x38] sm:$0xff] %v2168_v55  ;;  %v1312_v58 = vadd.f32 %v2168_v55, %v1311_v16  ;;  %v1326_v5 = vmul.f32 %v2168_v55, %v2168_v55 }
 0x16a   : > { %v1313_v23 = vrot.slane %v1312_v58, 4  ;;  %v1333_v32 = vadd.f32 %v1332_v53, %v1326_v5 }
 0x16c   : > { %v1314_v42 = vadd.f32 %v1313_v23, %v1312_v58  ;;  %v1334_v36 = vrot.slane %v1333_v32, 4 }
 0x16e   : > { %v1315_v7 = vrot.slane %v1314_v42, 2  ;;  %v1335_v15 = vadd.f32 %v1334_v36, %v1333_v32 }
 0x170   : > { %v1316_v17 = vadd.f32 %v1315_v7, %v1314_v42  ;;  %v1336_v18 = vrot.slane %v1335_v15, 2 }
 0x172   : > { %v1317_v19 = vrot.slane %v1316_v17, 1  ;;  %v1337_v21 = vadd.f32 %v1336_v18, %v1335_v15 }
 0x174   : > { %v1338_v34 = vrot.slane %v1337_v21, 1  ;;  %v1318_v22 = vadd.f32 %v1317_v19, %v1316_v17 }
 0x176   : > { %v1339_v24 = vadd.f32 %v1338_v34, %v1337_v21 }
 0x178   : > { %v1341_v56 = vsel %vm1340_vm0, %v1318_v22, %v1339_v24 }
 0x179   : > { %1342 = vst [vmem:[%s267_s12] sm:$0x3] %v1341_v56 }
 0x17a   : > { %2242 = shalt.err (!%p2239_p3)
}
 0x17b   : > { %s2243_s20 = scalar_lea.hbm %s3049_s14, 32  ;;  %s2247_s26 = scalar_lea.hbm %s3097_s6, 64 }
 0x17c   : > { %p2244_p4 = scmp.ne.s32.totalorder %s3049_s14, %s2243_s20  ;;  %p2248_p9 = scmp.lt.u32.totalorder %s3049_s14, %s3097_s6 }
 0x17d   : > { %p2249_p10 = scmp.lt.u32.totalorder %s2247_s26, %s2243_s20  ;;  %p2251_p12 = scmp.lt.u32.totalorder %s2243_s20, %s3049_s14 }
 0x17e   : > { %p2245_p7 = pnand %p2244_p4, %p2368_p5 }
 0x17f   : > { %p2250_p11 = por %p2249_p10, %p2248_p9 }
 0x180   : > { %p2246_p8 = pneg %p2245_p7 }
 0x181   : > { %p2252_p13 = por %p2251_p12, %p2250_p11 }
 0x183   : > { %p2253_p0 = pnand %p2252_p13, %p2246_p8 }
 0x185   : > { %2256 = shalt.err (!%p2253_p0)
}
 0x186   : > { %2189 = dma.vmem_to_hbm [thread:$0]  (%p2368_p5), %s3051_s13, 32, %s3049_s14, %s1349_s15  }
 0x187 PF: > { %p2195_p1 = scmp.ge.s32.totalorder %s2291_s24, 2  ;;  %s1385_s12 = sand.u32 1, %s2279_s21  }
 0x188   : > { %s1386_s17 = scalar_lea.sflag [#allocation4], %s1385_s12 }
 0x189   : > { %p2192_p2 = pnand %p2195_p1, %p2372_p6 }
 0x18b   : > { %2274 = dma.done.wait (!%p2192_p2), %s1386_s17, 32  }
 0x18c   : > { %2276 = vsyncadd (!%p2192_p2), %s1386_s17, 4294967264  ;;  %p17_p3 = scmp.ge.s32.totalorder %s2355_s27, 4   ;;  %s3100_s21 = smov %s2283_s22 }
 0x18d   : > { %s3101_s22 = smov %s2287_s23  ;;  %s3102_s23 = smov %s2366_s30 }
 0x18e   : > { %s3103_s24 = smov %s2355_s27  ;;  %19 = sbr.rel (!%p17_p3) target bundleno = 3 (0x3), region = 95 }
 0x195   :  { %1391 = vsyncpa [#allocation4], 1 }
 0x196   :  { %1393 = vsyncpa [#allocation4 + $0x1], 1 }

</bundles_post_ra>
